<compile_context>
chip_gen: v6e
topology: v6e:2x2x1
jax: 0.10.0
libtpu: 0.0.40
codegen_flags: <defaults>
</compile_context>

<pallas_src>
import functools

import jax
import jax.numpy as jnp
from jax.experimental import pallas as pl
from jax.experimental.pallas import tpu as pltpu


# ---------------------------------------------------------------------------
# Fused bidirectional LSTM layer: both directions, whole sequence, one launch.
# Inputs/outputs are time-major and flattened: x (T*B, D_in) -> out (T*B, 2H).
# ---------------------------------------------------------------------------
def _bilstm_layer_kernel(x_ref, wih_ref, whhf_ref, whhb_ref, b_ref,
                         out_ref, gin_sc, *, seq_len, batch, hidden):
    T, B, H = seq_len, batch, hidden

    # --- Prologue: one wide GEMM = input projection of BOTH directions for ALL
    # timesteps, (T*B, D) @ (D, 8H) + bias, staged in VMEM scratch.
    x_bf = x_ref[...].astype(jnp.bfloat16)
    gin_sc[...] = (jnp.dot(x_bf, wih_ref[...], preferred_element_type=jnp.float32)
                   + b_ref[...])

    # Hoist weight loads out of the recurrence loop.
    w_f = whhf_ref[...]
    w_b = whhb_ref[...]

    def cell(pre, h, c, w_hh):
        # PyTorch gate order: i, f, g, o.  Recurrent matmul in bf16, f32 accumulate.
        gates = pre + jnp.dot(h.astype(jnp.bfloat16), w_hh,
                              preferred_element_type=jnp.float32)
        i = jax.nn.sigmoid(gates[:, 0 * H:1 * H])
        f = jax.nn.sigmoid(gates[:, 1 * H:2 * H])
        g = jnp.tanh(gates[:, 2 * H:3 * H])
        o = jax.nn.sigmoid(gates[:, 3 * H:4 * H])
        c_new = f * c + i * g
        h_new = o * jnp.tanh(c_new)
        return h_new, c_new

    h_f = jnp.zeros((B, H), jnp.float32)
    c_f = jnp.zeros((B, H), jnp.float32)
    h_b = jnp.zeros((B, H), jnp.float32)
    c_b = jnp.zeros((B, H), jnp.float32)

    # T is small and static here -> fully unrolled loop with static slices.
    for t in range(T):
        tb = T - 1 - t  # backward direction walks time in reverse
        pre_f = gin_sc[t * B:(t + 1) * B, 0:4 * H]
        pre_b = gin_sc[tb * B:(tb + 1) * B, 4 * H:8 * H]
        h_f, c_f = cell(pre_f, h_f, c_f, w_f)
        h_b, c_b = cell(pre_b, h_b, c_b, w_b)
        # Write both direction halves straight into the fused (T*B, 2H) output
        # block (VMEM-resident; flushed to HBM once when the grid step ends).
        out_ref[t * B:(t + 1) * B, 0:H] = h_f
        out_ref[tb * B:(tb + 1) * B, H:2 * H] = h_b


def bilstm_layer(x_flat, w_ih_both, w_hh_f, w_hh_b, bias_both,
                 *, seq_len, batch, hidden):
    """x_flat: (T*B, D_in) time-major-flattened.  Returns (T*B, 2H) with the
    backward half already aligned to original timesteps (torch convention)."""
    TB, D = x_flat.shape
    H = hidden
    kernel = functools.partial(_bilstm_layer_kernel,
                               seq_len=seq_len, batch=batch, hidden=H)
    return pl.pallas_call(
        kernel,
        out_shape=jax.ShapeDtypeStruct((TB, 2 * H), jnp.float32),
        grid=(1,),
        in_specs=[
            pl.BlockSpec((TB, D), lambda i: (0, 0)),        # x (whole layer input)
            pl.BlockSpec((D, 8 * H), lambda i: (0, 0)),     # [W_ih_fwd | W_ih_bwd]
            pl.BlockSpec((H, 4 * H), lambda i: (0, 0)),     # W_hh_fwd
            pl.BlockSpec((H, 4 * H), lambda i: (0, 0)),     # W_hh_bwd
            pl.BlockSpec((1, 8 * H), lambda i: (0, 0)),     # [b_fwd | b_bwd]
        ],
        out_specs=pl.BlockSpec((TB, 2 * H), lambda i: (0, 0)),
        scratch_shapes=[pltpu.VMEM((TB, 8 * H), jnp.float32)],  # hoisted input gates
        compiler_params=pltpu.CompilerParams(
            dimension_semantics=("arbitrary",)),
    )(x_flat, w_ih_both, w_hh_f, w_hh_b, bias_both)


# ---------------------------------------------------------------------------
# Linear head: (N, 2H) @ (2H, O_pad) + b   (output padded to 128 lanes)
# ---------------------------------------------------------------------------
def _linear_kernel(x_ref, w_ref, b_ref, o_ref):
    o_ref[...] = (jnp.dot(x_ref[...].astype(jnp.bfloat16), w_ref[...],
                          preferred_element_type=jnp.float32)
                  + b_ref[...])


def linear_padded(x, w_pad, b_pad):
    N, D = x.shape
    Opad = w_pad.shape[1]
    return pl.pallas_call(
        _linear_kernel,
        out_shape=jax.ShapeDtypeStruct((N, Opad), jnp.float32),
        grid=(1,),
        in_specs=[
            pl.BlockSpec((N, D), lambda i: (0, 0)),
            pl.BlockSpec((D, Opad), lambda i: (0, 0)),
            pl.BlockSpec((1, Opad), lambda i: (0, 0)),
        ],
        out_specs=pl.BlockSpec((N, Opad), lambda i: (0, 0)),
    )(x, w_pad, b_pad)


# ---------------------------------------------------------------------------
# Full model forward (mirrors RNNModel.forward, eval semantics)
# ---------------------------------------------------------------------------
def rnn_model_forward(x, params):
    """x: (B, T, input_size) float32 -> (B, T, output_size) float32."""
    B, T, D = x.shape
    H = params["lstm"][0]["w_hh_f"].shape[0]
    O = params["output_size"]

    # Single layout change at the model boundary: batch-first -> time-major flat.
    h = jnp.transpose(x, (1, 0, 2)).reshape(T * B, D)
    for layer in params["lstm"]:
        h = bilstm_layer(h, layer["w_ih"], layer["w_hh_f"], layer["w_hh_b"],
                         layer["bias"], seq_len=T, batch=B, hidden=H)  # (T*B, 2H)

    out = linear_padded(h, params["w_out"], params["b_out"])[:, :O]    # (T*B, O)
    return out.reshape(T, B, O).transpose(1, 0, 2)                     # (B, T, O)


# ---------------------------------------------------------------------------
# Deterministic parameter init (PyTorch default: U(-1/sqrt(H), 1/sqrt(H)))
# Weight layouts are transposed vs. torch; matmul weights stored in bf16.
# ---------------------------------------------------------------------------
def init_params(key, input_size, output_size, hidden_size, num_layers=4):
    H = hidden_size
    k_lstm = 1.0 / jnp.sqrt(jnp.float32(H))

    def u(key, shape, bound):
        return jax.random.uniform(key, shape, jnp.float32, -bound, bound)

    layers = []
    for l in range(num_layers):
        d_in = input_size if l == 0 else 2 * H
        key, k1, k2, k3, k4, k5, k6, k7, k8 = jax.random.split(key, 9)
        wih_f = u(k1, (d_in, 4 * H), k_lstm)               # (D_in, 4H)
        wih_b = u(k2, (d_in, 4 * H), k_lstm)
        whh_f = u(k3, (H, 4 * H), k_lstm)                  # (H, 4H)
        whh_b = u(k4, (H, 4 * H), k_lstm)
        b_f = u(k5, (4 * H,), k_lstm) + u(k6, (4 * H,), k_lstm)   # b_ih + b_hh
        b_b = u(k7, (4 * H,), k_lstm) + u(k8, (4 * H,), k_lstm)
        layers.append({
            "w_ih": jnp.concatenate([wih_f, wih_b], axis=1).astype(jnp.bfloat16),
            "w_hh_f": whh_f.astype(jnp.bfloat16),
            "w_hh_b": whh_b.astype(jnp.bfloat16),
            "bias": jnp.concatenate([b_f, b_b]).reshape(1, 8 * H).astype(jnp.float32),
        })

    k_lin = 1.0 / jnp.sqrt(jnp.float32(2 * H))
    key, k1, k2 = jax.random.split(key, 3)
    w_out = u(k1, (2 * H, output_size), k_lin)             # (2H, O)
    b_out = u(k2, (output_size,), k_lin)

    # Pad the head to a 128-lane output (unmasked stores); sliced back outside.
    o_pad = ((output_size + 127) // 128) * 128
    w_out_p = jnp.zeros((2 * H, o_pad), jnp.float32).at[:, :output_size].set(w_out)
    b_out_p = jnp.zeros((1, o_pad), jnp.float32).at[0, :output_size].set(b_out)

    return {
        "lstm": layers,
        "w_out": w_out_p.astype(jnp.bfloat16),
        "b_out": b_out_p,
        "output_size": output_size,
    }


if __name__ == "__main__":
    B, T = 2, 8
    input_size, output_size, hidden_size = 16, 10, 32

    key = jax.random.PRNGKey(0)
    k_params, k_x = jax.random.split(key)
    params = init_params(k_params, input_size, output_size, hidden_size)
    x = jax.random.normal(k_x, (B, T, input_size), jnp.float32)

    fwd = jax.jit(functools.partial(rnn_model_forward, params=params))
    out = fwd(x)
    jax.block_until_ready(out)
    assert out.shape == (B, T, output_size), out.shape
    assert out.dtype == jnp.float32
    print("KERNEL_OK")
</pallas_src>

<mosaic_0001>
module attributes {stable_mosaic.version = 11 : i64} {
  func.func @_bilstm_layer_kernel(%arg0: i32, %arg1: memref<16x16xf32, #tpu.memory_space<vmem>>, %arg2: memref<16x256xbf16, #tpu.memory_space<vmem>>, %arg3: memref<32x128xbf16, #tpu.memory_space<vmem>>, %arg4: memref<32x128xbf16, #tpu.memory_space<vmem>>, %arg5: memref<1x256xf32, #tpu.memory_space<vmem>>, %arg6: memref<16x64xf32, #tpu.memory_space<vmem>>, %arg7: memref<16x256xf32, #tpu.memory_space<vmem>>) attributes {dimension_semantics = [#tpu.dimension_semantics<arbitrary>], iteration_bounds = array<i64: 1>, scalar_prefetch = 0 : i64, scratch_operands = 1 : i64, tpu.core_type = #tpu.core_type<tc>, window_params = [{pipeline_mode = #tpu.pipeline_mode<synchronous>, transform_indices = @transform_0, window_bounds = array<i64: 16, 16>}, {pipeline_mode = #tpu.pipeline_mode<synchronous>, transform_indices = @transform_1, window_bounds = array<i64: 16, 256>}, {pipeline_mode = #tpu.pipeline_mode<synchronous>, transform_indices = @transform_2, window_bounds = array<i64: 32, 128>}, {pipeline_mode = #tpu.pipeline_mode<synchronous>, transform_indices = @transform_3, window_bounds = array<i64: 32, 128>}, {pipeline_mode = #tpu.pipeline_mode<synchronous>, transform_indices = @transform_4, window_bounds = array<i64: 1, 256>}, {pipeline_mode = #tpu.pipeline_mode<synchronous>, transform_indices = @transform_5, window_bounds = array<i64: 16, 64>}]} {
    %c0 = arith.constant 0 : index
    %c0_0 = arith.constant 0 : index
    %0 = vector.load %arg1[%c0, %c0_0] : memref<16x16xf32, #tpu.memory_space<vmem>>, vector<16x16xf32>
    %1 = arith.truncf %0 : vector<16x16xf32> to vector<16x16xbf16>
    %c0_1 = arith.constant 0 : index
    %c0_2 = arith.constant 0 : index
    %2 = vector.load %arg2[%c0_1, %c0_2] : memref<16x256xbf16, #tpu.memory_space<vmem>>, vector<16x256xbf16>
    %cst = arith.constant dense<0.000000e+00> : vector<16x256xf32>
    %3 = tpu.matmul %1, %2, %cst {dimension_numbers = #tpu.dot_dimension_numbers<[1], [0], [0], [1], [0, 0, 1, 1], [], []>} : vector<16x16xbf16>, vector<16x256xbf16>, vector<16x256xf32> -> vector<16x256xf32>
    %c0_3 = arith.constant 0 : index
    %c0_4 = arith.constant 0 : index
    %4 = vector.load %arg5[%c0_3, %c0_4] : memref<1x256xf32, #tpu.memory_space<vmem>>, vector<1x256xf32>
    %5 = vector.broadcast %4 : vector<1x256xf32> to vector<16x256xf32>
    %6 = arith.addf %3, %5 : vector<16x256xf32>
    %c0_5 = arith.constant 0 : index
    %c0_6 = arith.constant 0 : index
    %7 = vector.load %arg7[%c0_5, %c0_6] : memref<16x256xf32, #tpu.memory_space<vmem>>, vector<16x256xf32>
    tpu.vector_store %arg7[%c0_5, %c0_6], %6 {strides = array<i32>} : memref<16x256xf32, #tpu.memory_space<vmem>>, vector<16x256xf32>,
    %c0_7 = arith.constant 0 : index
    %c0_8 = arith.constant 0 : index
    %8 = vector.load %arg3[%c0_7, %c0_8] : memref<32x128xbf16, #tpu.memory_space<vmem>>, vector<32x128xbf16>
    %c0_9 = arith.constant 0 : index
    %c0_10 = arith.constant 0 : index
    %9 = vector.load %arg4[%c0_9, %c0_10] : memref<32x128xbf16, #tpu.memory_space<vmem>>, vector<32x128xbf16>
    %cst_11 = arith.constant 0.000000e+00 : f32
    %10 = vector.broadcast %cst_11 : f32 to vector<2x32xf32>
    %cst_12 = arith.constant 0.000000e+00 : f32
    %11 = vector.broadcast %cst_12 : f32 to vector<2x32xf32>
    %cst_13 = arith.constant 0.000000e+00 : f32
    %12 = vector.broadcast %cst_13 : f32 to vector<2x32xf32>
    %cst_14 = arith.constant 0.000000e+00 : f32
    %13 = vector.broadcast %cst_14 : f32 to vector<2x32xf32>
    %c0_15 = arith.constant 0 : index
    %c0_16 = arith.constant 0 : index
    %14 = vector.load %arg7[%c0_15, %c0_16] : memref<16x256xf32, #tpu.memory_space<vmem>>, vector<2x128xf32>
    %c14 = arith.constant 14 : index
    %c128 = arith.constant 128 : index
    %15 = vector.load %arg7[%c14, %c128] : memref<16x256xf32, #tpu.memory_space<vmem>>, vector<2x128xf32>
    %16 = arith.truncf %10 : vector<2x32xf32> to vector<2x32xbf16>
    %cst_17 = arith.constant dense<0.000000e+00> : vector<2x128xf32>
    %17 = tpu.matmul %16, %8, %cst_17 {dimension_numbers = #tpu.dot_dimension_numbers<[1], [0], [0], [1], [0, 0, 1, 1], [], []>} : vector<2x32xbf16>, vector<32x128xbf16>, vector<2x128xf32> -> vector<2x128xf32>
    %18 = arith.addf %14, %17 : vector<2x128xf32>
    %19 = vector.extract_strided_slice %18 {offsets = [0, 0], sizes = [2, 32], strides = [1, 1]} : vector<2x128xf32> to vector<2x32xf32>
    %20 = arith.negf %19 : vector<2x32xf32>
    %21 = math.exp %20 : vector<2x32xf32>
    %cst_18 = arith.constant 1.000000e+00 : f32
    %22 = vector.broadcast %cst_18 : f32 to vector<2x32xf32>
    %23 = arith.addf %22, %21 : vector<2x32xf32>
    %24 = arith.divf %22, %23 : vector<2x32xf32>
    %25 = vector.extract_strided_slice %18 {offsets = [0, 32], sizes = [2, 32], strides = [1, 1]} : vector<2x128xf32> to vector<2x32xf32>
    %26 = arith.negf %25 : vector<2x32xf32>
    %27 = math.exp %26 : vector<2x32xf32>
    %cst_19 = arith.constant 1.000000e+00 : f32
    %28 = vector.broadcast %cst_19 : f32 to vector<2x32xf32>
    %29 = arith.addf %28, %27 : vector<2x32xf32>
    %30 = arith.divf %28, %29 : vector<2x32xf32>
    %31 = vector.extract_strided_slice %18 {offsets = [0, 64], sizes = [2, 32], strides = [1, 1]} : vector<2x128xf32> to vector<2x32xf32>
    %32 = math.tanh %31 : vector<2x32xf32>
    %33 = vector.extract_strided_slice %18 {offsets = [0, 96], sizes = [2, 32], strides = [1, 1]} : vector<2x128xf32> to vector<2x32xf32>
    %34 = arith.negf %33 : vector<2x32xf32>
    %35 = math.exp %34 : vector<2x32xf32>
    %cst_20 = arith.constant 1.000000e+00 : f32
    %36 = vector.broadcast %cst_20 : f32 to vector<2x32xf32>
    %37 = arith.addf %36, %35 : vector<2x32xf32>
    %38 = arith.divf %36, %37 : vector<2x32xf32>
    %39 = arith.mulf %30, %11 : vector<2x32xf32>
    %40 = arith.mulf %24, %32 : vector<2x32xf32>
    %41 = arith.addf %39, %40 : vector<2x32xf32>
    %42 = math.tanh %41 : vector<2x32xf32>
    %43 = arith.mulf %38, %42 : vector<2x32xf32>
    %44 = arith.truncf %12 : vector<2x32xf32> to vector<2x32xbf16>
    %cst_21 = arith.constant dense<0.000000e+00> : vector<2x128xf32>
    %45 = tpu.matmul %44, %9, %cst_21 {dimension_numbers = #tpu.dot_dimension_numbers<[1], [0], [0], [1], [0, 0, 1, 1], [], []>} : vector<2x32xbf16>, vector<32x128xbf16>, vector<2x128xf32> -> vector<2x128xf32>
    %46 = arith.addf %15, %45 : vector<2x128xf32>
    %47 = vector.extract_strided_slice %46 {offsets = [0, 0], sizes = [2, 32], strides = [1, 1]} : vector<2x128xf32> to vector<2x32xf32>
    %48 = arith.negf %47 : vector<2x32xf32>
    %49 = math.exp %48 : vector<2x32xf32>
    %cst_22 = arith.constant 1.000000e+00 : f32
    %50 = vector.broadcast %cst_22 : f32 to vector<2x32xf32>
    %51 = arith.addf %50, %49 : vector<2x32xf32>
    %52 = arith.divf %50, %51 : vector<2x32xf32>
    %53 = vector.extract_strided_slice %46 {offsets = [0, 32], sizes = [2, 32], strides = [1, 1]} : vector<2x128xf32> to vector<2x32xf32>
    %54 = arith.negf %53 : vector<2x32xf32>
    %55 = math.exp %54 : vector<2x32xf32>
    %cst_23 = arith.constant 1.000000e+00 : f32
    %56 = vector.broadcast %cst_23 : f32 to vector<2x32xf32>
    %57 = arith.addf %56, %55 : vector<2x32xf32>
    %58 = arith.divf %56, %57 : vector<2x32xf32>
    %59 = vector.extract_strided_slice %46 {offsets = [0, 64], sizes = [2, 32], strides = [1, 1]} : vector<2x128xf32> to vector<2x32xf32>
    %60 = math.tanh %59 : vector<2x32xf32>
    %61 = vector.extract_strided_slice %46 {offsets = [0, 96], sizes = [2, 32], strides = [1, 1]} : vector<2x128xf32> to vector<2x32xf32>
    %62 = arith.negf %61 : vector<2x32xf32>
    %63 = math.exp %62 : vector<2x32xf32>
    %cst_24 = arith.constant 1.000000e+00 : f32
    %64 = vector.broadcast %cst_24 : f32 to vector<2x32xf32>
    %65 = arith.addf %64, %63 : vector<2x32xf32>
    %66 = arith.divf %64, %65 : vector<2x32xf32>
    %67 = arith.mulf %58, %13 : vector<2x32xf32>
    %68 = arith.mulf %52, %60 : vector<2x32xf32>
    %69 = arith.addf %67, %68 : vector<2x32xf32>
    %70 = math.tanh %69 : vector<2x32xf32>
    %71 = arith.mulf %66, %70 : vector<2x32xf32>
    %c0_25 = arith.constant 0 : index
    %c0_26 = arith.constant 0 : index
    %72 = vector.load %arg6[%c0_25, %c0_26] : memref<16x64xf32, #tpu.memory_space<vmem>>, vector<2x32xf32>
    tpu.vector_store %arg6[%c0_25, %c0_26], %43 {strides = array<i32>} : memref<16x64xf32, #tpu.memory_space<vmem>>, vector<2x32xf32>,
    %c14_27 = arith.constant 14 : index
    %c32 = arith.constant 32 : index
    %73 = vector.load %arg6[%c14_27, %c32] : memref<16x64xf32, #tpu.memory_space<vmem>>, vector<2x32xf32>
    tpu.vector_store %arg6[%c14_27, %c32], %71 {strides = array<i32>} : memref<16x64xf32, #tpu.memory_space<vmem>>, vector<2x32xf32>,
    %c2 = arith.constant 2 : index
    %c0_28 = arith.constant 0 : index
    %74 = vector.load %arg7[%c2, %c0_28] : memref<16x256xf32, #tpu.memory_space<vmem>>, vector<2x128xf32>
    %c12 = arith.constant 12 : index
    %c128_29 = arith.constant 128 : index
    %75 = vector.load %arg7[%c12, %c128_29] : memref<16x256xf32, #tpu.memory_space<vmem>>, vector<2x128xf32>
    %76 = arith.truncf %43 : vector<2x32xf32> to vector<2x32xbf16>
    %cst_30 = arith.constant dense<0.000000e+00> : vector<2x128xf32>
    %77 = tpu.matmul %76, %8, %cst_30 {dimension_numbers = #tpu.dot_dimension_numbers<[1], [0], [0], [1], [0, 0, 1, 1], [], []>} : vector<2x32xbf16>, vector<32x128xbf16>, vector<2x128xf32> -> vector<2x128xf32>
    %78 = arith.addf %74, %77 : vector<2x128xf32>
    %79 = vector.extract_strided_slice %78 {offsets = [0, 0], sizes = [2, 32], strides = [1, 1]} : vector<2x128xf32> to vector<2x32xf32>
    %80 = arith.negf %79 : vector<2x32xf32>
    %81 = math.exp %80 : vector<2x32xf32>
    %cst_31 = arith.constant 1.000000e+00 : f32
    %82 = vector.broadcast %cst_31 : f32 to vector<2x32xf32>
    %83 = arith.addf %82, %81 : vector<2x32xf32>
    %84 = arith.divf %82, %83 : vector<2x32xf32>
    %85 = vector.extract_strided_slice %78 {offsets = [0, 32], sizes = [2, 32], strides = [1, 1]} : vector<2x128xf32> to vector<2x32xf32>
    %86 = arith.negf %85 : vector<2x32xf32>
    %87 = math.exp %86 : vector<2x32xf32>
    %cst_32 = arith.constant 1.000000e+00 : f32
    %88 = vector.broadcast %cst_32 : f32 to vector<2x32xf32>
    %89 = arith.addf %88, %87 : vector<2x32xf32>
    %90 = arith.divf %88, %89 : vector<2x32xf32>
    %91 = vector.extract_strided_slice %78 {offsets = [0, 64], sizes = [2, 32], strides = [1, 1]} : vector<2x128xf32> to vector<2x32xf32>
    %92 = math.tanh %91 : vector<2x32xf32>
    %93 = vector.extract_strided_slice %78 {offsets = [0, 96], sizes = [2, 32], strides = [1, 1]} : vector<2x128xf32> to vector<2x32xf32>
    %94 = arith.negf %93 : vector<2x32xf32>
    %95 = math.exp %94 : vector<2x32xf32>
    %cst_33 = arith.constant 1.000000e+00 : f32
    %96 = vector.broadcast %cst_33 : f32 to vector<2x32xf32>
    %97 = arith.addf %96, %95 : vector<2x32xf32>
    %98 = arith.divf %96, %97 : vector<2x32xf32>
    %99 = arith.mulf %90, %41 : vector<2x32xf32>
    %100 = arith.mulf %84, %92 : vector<2x32xf32>
    %101 = arith.addf %99, %100 : vector<2x32xf32>
    %102 = math.tanh %101 : vector<2x32xf32>
    %103 = arith.mulf %98, %102 : vector<2x32xf32>
    %104 = arith.truncf %71 : vector<2x32xf32> to vector<2x32xbf16>
    %cst_34 = arith.constant dense<0.000000e+00> : vector<2x128xf32>
    %105 = tpu.matmul %104, %9, %cst_34 {dimension_numbers = #tpu.dot_dimension_numbers<[1], [0], [0], [1], [0, 0, 1, 1], [], []>} : vector<2x32xbf16>, vector<32x128xbf16>, vector<2x128xf32> -> vector<2x128xf32>
    %106 = arith.addf %75, %105 : vector<2x128xf32>
    %107 = vector.extract_strided_slice %106 {offsets = [0, 0], sizes = [2, 32], strides = [1, 1]} : vector<2x128xf32> to vector<2x32xf32>
    %108 = arith.negf %107 : vector<2x32xf32>
    %109 = math.exp %108 : vector<2x32xf32>
    %cst_35 = arith.constant 1.000000e+00 : f32
    %110 = vector.broadcast %cst_35 : f32 to vector<2x32xf32>
    %111 = arith.addf %110, %109 : vector<2x32xf32>
    %112 = arith.divf %110, %111 : vector<2x32xf32>
    %113 = vector.extract_strided_slice %106 {offsets = [0, 32], sizes = [2, 32], strides = [1, 1]} : vector<2x128xf32> to vector<2x32xf32>
    %114 = arith.negf %113 : vector<2x32xf32>
    %115 = math.exp %114 : vector<2x32xf32>
    %cst_36 = arith.constant 1.000000e+00 : f32
    %116 = vector.broadcast %cst_36 : f32 to vector<2x32xf32>
    %117 = arith.addf %116, %115 : vector<2x32xf32>
    %118 = arith.divf %116, %117 : vector<2x32xf32>
    %119 = vector.extract_strided_slice %106 {offsets = [0, 64], sizes = [2, 32], strides = [1, 1]} : vector<2x128xf32> to vector<2x32xf32>
    %120 = math.tanh %119 : vector<2x32xf32>
    %121 = vector.extract_strided_slice %106 {offsets = [0, 96], sizes = [2, 32], strides = [1, 1]} : vector<2x128xf32> to vector<2x32xf32>
    %122 = arith.negf %121 : vector<2x32xf32>
    %123 = math.exp %122 : vector<2x32xf32>
    %cst_37 = arith.constant 1.000000e+00 : f32
    %124 = vector.broadcast %cst_37 : f32 to vector<2x32xf32>
    %125 = arith.addf %124, %123 : vector<2x32xf32>
    %126 = arith.divf %124, %125 : vector<2x32xf32>
    %127 = arith.mulf %118, %69 : vector<2x32xf32>
    %128 = arith.mulf %112, %120 : vector<2x32xf32>
    %129 = arith.addf %127, %128 : vector<2x32xf32>
    %130 = math.tanh %129 : vector<2x32xf32>
    %131 = arith.mulf %126, %130 : vector<2x32xf32>
    %c2_38 = arith.constant 2 : index
    %c0_39 = arith.constant 0 : index
    %132 = vector.load %arg6[%c2_38, %c0_39] : memref<16x64xf32, #tpu.memory_space<vmem>>, vector<2x32xf32>
    tpu.vector_store %arg6[%c2_38, %c0_39], %103 {strides = array<i32>} : memref<16x64xf32, #tpu.memory_space<vmem>>, vector<2x32xf32>,
    %c12_40 = arith.constant 12 : index
    %c32_41 = arith.constant 32 : index
    %133 = vector.load %arg6[%c12_40, %c32_41] : memref<16x64xf32, #tpu.memory_space<vmem>>, vector<2x32xf32>
    tpu.vector_store %arg6[%c12_40, %c32_41], %131 {strides = array<i32>} : memref<16x64xf32, #tpu.memory_space<vmem>>, vector<2x32xf32>,
    %c4 = arith.constant 4 : index
    %c0_42 = arith.constant 0 : index
    %134 = vector.load %arg7[%c4, %c0_42] : memref<16x256xf32, #tpu.memory_space<vmem>>, vector<2x128xf32>
    %c10 = arith.constant 10 : index
    %c128_43 = arith.constant 128 : index
    %135 = vector.load %arg7[%c10, %c128_43] : memref<16x256xf32, #tpu.memory_space<vmem>>, vector<2x128xf32>
    %136 = arith.truncf %103 : vector<2x32xf32> to vector<2x32xbf16>
    %cst_44 = arith.constant dense<0.000000e+00> : vector<2x128xf32>
    %137 = tpu.matmul %136, %8, %cst_44 {dimension_numbers = #tpu.dot_dimension_numbers<[1], [0], [0], [1], [0, 0, 1, 1], [], []>} : vector<2x32xbf16>, vector<32x128xbf16>, vector<2x128xf32> -> vector<2x128xf32>
    %138 = arith.addf %134, %137 : vector<2x128xf32>
    %139 = vector.extract_strided_slice %138 {offsets = [0, 0], sizes = [2, 32], strides = [1, 1]} : vector<2x128xf32> to vector<2x32xf32>
    %140 = arith.negf %139 : vector<2x32xf32>
    %141 = math.exp %140 : vector<2x32xf32>
    %cst_45 = arith.constant 1.000000e+00 : f32
    %142 = vector.broadcast %cst_45 : f32 to vector<2x32xf32>
    %143 = arith.addf %142, %141 : vector<2x32xf32>
    %144 = arith.divf %142, %143 : vector<2x32xf32>
    %145 = vector.extract_strided_slice %138 {offsets = [0, 32], sizes = [2, 32], strides = [1, 1]} : vector<2x128xf32> to vector<2x32xf32>
    %146 = arith.negf %145 : vector<2x32xf32>
    %147 = math.exp %146 : vector<2x32xf32>
    %cst_46 = arith.constant 1.000000e+00 : f32
    %148 = vector.broadcast %cst_46 : f32 to vector<2x32xf32>
    %149 = arith.addf %148, %147 : vector<2x32xf32>
    %150 = arith.divf %148, %149 : vector<2x32xf32>
    %151 = vector.extract_strided_slice %138 {offsets = [0, 64], sizes = [2, 32], strides = [1, 1]} : vector<2x128xf32> to vector<2x32xf32>
    %152 = math.tanh %151 : vector<2x32xf32>
    %153 = vector.extract_strided_slice %138 {offsets = [0, 96], sizes = [2, 32], strides = [1, 1]} : vector<2x128xf32> to vector<2x32xf32>
    %154 = arith.negf %153 : vector<2x32xf32>
    %155 = math.exp %154 : vector<2x32xf32>
    %cst_47 = arith.constant 1.000000e+00 : f32
    %156 = vector.broadcast %cst_47 : f32 to vector<2x32xf32>
    %157 = arith.addf %156, %155 : vector<2x32xf32>
    %158 = arith.divf %156, %157 : vector<2x32xf32>
    %159 = arith.mulf %150, %101 : vector<2x32xf32>
    %160 = arith.mulf %144, %152 : vector<2x32xf32>
    %161 = arith.addf %159, %160 : vector<2x32xf32>
    %162 = math.tanh %161 : vector<2x32xf32>
    %163 = arith.mulf %158, %162 : vector<2x32xf32>
    %164 = arith.truncf %131 : vector<2x32xf32> to vector<2x32xbf16>
    %cst_48 = arith.constant dense<0.000000e+00> : vector<2x128xf32>
    %165 = tpu.matmul %164, %9, %cst_48 {dimension_numbers = #tpu.dot_dimension_numbers<[1], [0], [0], [1], [0, 0, 1, 1], [], []>} : vector<2x32xbf16>, vector<32x128xbf16>, vector<2x128xf32> -> vector<2x128xf32>
    %166 = arith.addf %135, %165 : vector<2x128xf32>
    %167 = vector.extract_strided_slice %166 {offsets = [0, 0], sizes = [2, 32], strides = [1, 1]} : vector<2x128xf32> to vector<2x32xf32>
    %168 = arith.negf %167 : vector<2x32xf32>
    %169 = math.exp %168 : vector<2x32xf32>
    %cst_49 = arith.constant 1.000000e+00 : f32
    %170 = vector.broadcast %cst_49 : f32 to vector<2x32xf32>
    %171 = arith.addf %170, %169 : vector<2x32xf32>
    %172 = arith.divf %170, %171 : vector<2x32xf32>
    %173 = vector.extract_strided_slice %166 {offsets = [0, 32], sizes = [2, 32], strides = [1, 1]} : vector<2x128xf32> to vector<2x32xf32>
    %174 = arith.negf %173 : vector<2x32xf32>
    %175 = math.exp %174 : vector<2x32xf32>
    %cst_50 = arith.constant 1.000000e+00 : f32
    %176 = vector.broadcast %cst_50 : f32 to vector<2x32xf32>
    %177 = arith.addf %176, %175 : vector<2x32xf32>
    %178 = arith.divf %176, %177 : vector<2x32xf32>
    %179 = vector.extract_strided_slice %166 {offsets = [0, 64], sizes = [2, 32], strides = [1, 1]} : vector<2x128xf32> to vector<2x32xf32>
    %180 = math.tanh %179 : vector<2x32xf32>
    %181 = vector.extract_strided_slice %166 {offsets = [0, 96], sizes = [2, 32], strides = [1, 1]} : vector<2x128xf32> to vector<2x32xf32>
    %182 = arith.negf %181 : vector<2x32xf32>
    %183 = math.exp %182 : vector<2x32xf32>
    %cst_51 = arith.constant 1.000000e+00 : f32
    %184 = vector.broadcast %cst_51 : f32 to vector<2x32xf32>
    %185 = arith.addf %184, %183 : vector<2x32xf32>
    %186 = arith.divf %184, %185 : vector<2x32xf32>
    %187 = arith.mulf %178, %129 : vector<2x32xf32>
    %188 = arith.mulf %172, %180 : vector<2x32xf32>
    %189 = arith.addf %187, %188 : vector<2x32xf32>
    %190 = math.tanh %189 : vector<2x32xf32>
    %191 = arith.mulf %186, %190 : vector<2x32xf32>
    %c4_52 = arith.constant 4 : index
    %c0_53 = arith.constant 0 : index
    %192 = vector.load %arg6[%c4_52, %c0_53] : memref<16x64xf32, #tpu.memory_space<vmem>>, vector<2x32xf32>
    tpu.vector_store %arg6[%c4_52, %c0_53], %163 {strides = array<i32>} : memref<16x64xf32, #tpu.memory_space<vmem>>, vector<2x32xf32>,
    %c10_54 = arith.constant 10 : index
    %c32_55 = arith.constant 32 : index
    %193 = vector.load %arg6[%c10_54, %c32_55] : memref<16x64xf32, #tpu.memory_space<vmem>>, vector<2x32xf32>
    tpu.vector_store %arg6[%c10_54, %c32_55], %191 {strides = array<i32>} : memref<16x64xf32, #tpu.memory_space<vmem>>, vector<2x32xf32>,
    %c6 = arith.constant 6 : index
    %c0_56 = arith.constant 0 : index
    %194 = vector.load %arg7[%c6, %c0_56] : memref<16x256xf32, #tpu.memory_space<vmem>>, vector<2x128xf32>
    %c8 = arith.constant 8 : index
    %c128_57 = arith.constant 128 : index
    %195 = vector.load %arg7[%c8, %c128_57] : memref<16x256xf32, #tpu.memory_space<vmem>>, vector<2x128xf32>
    %196 = arith.truncf %163 : vector<2x32xf32> to vector<2x32xbf16>
    %cst_58 = arith.constant dense<0.000000e+00> : vector<2x128xf32>
    %197 = tpu.matmul %196, %8, %cst_58 {dimension_numbers = #tpu.dot_dimension_numbers<[1], [0], [0], [1], [0, 0, 1, 1], [], []>} : vector<2x32xbf16>, vector<32x128xbf16>, vector<2x128xf32> -> vector<2x128xf32>
    %198 = arith.addf %194, %197 : vector<2x128xf32>
    %199 = vector.extract_strided_slice %198 {offsets = [0, 0], sizes = [2, 32], strides = [1, 1]} : vector<2x128xf32> to vector<2x32xf32>
    %200 = arith.negf %199 : vector<2x32xf32>
    %201 = math.exp %200 : vector<2x32xf32>
    %cst_59 = arith.constant 1.000000e+00 : f32
    %202 = vector.broadcast %cst_59 : f32 to vector<2x32xf32>
    %203 = arith.addf %202, %201 : vector<2x32xf32>
    %204 = arith.divf %202, %203 : vector<2x32xf32>
    %205 = vector.extract_strided_slice %198 {offsets = [0, 32], sizes = [2, 32], strides = [1, 1]} : vector<2x128xf32> to vector<2x32xf32>
    %206 = arith.negf %205 : vector<2x32xf32>
    %207 = math.exp %206 : vector<2x32xf32>
    %cst_60 = arith.constant 1.000000e+00 : f32
    %208 = vector.broadcast %cst_60 : f32 to vector<2x32xf32>
    %209 = arith.addf %208, %207 : vector<2x32xf32>
    %210 = arith.divf %208, %209 : vector<2x32xf32>
    %211 = vector.extract_strided_slice %198 {offsets = [0, 64], sizes = [2, 32], strides = [1, 1]} : vector<2x128xf32> to vector<2x32xf32>
    %212 = math.tanh %211 : vector<2x32xf32>
    %213 = vector.extract_strided_slice %198 {offsets = [0, 96], sizes = [2, 32], strides = [1, 1]} : vector<2x128xf32> to vector<2x32xf32>
    %214 = arith.negf %213 : vector<2x32xf32>
    %215 = math.exp %214 : vector<2x32xf32>
    %cst_61 = arith.constant 1.000000e+00 : f32
    %216 = vector.broadcast %cst_61 : f32 to vector<2x32xf32>
    %217 = arith.addf %216, %215 : vector<2x32xf32>
    %218 = arith.divf %216, %217 : vector<2x32xf32>
    %219 = arith.mulf %210, %161 : vector<2x32xf32>
    %220 = arith.mulf %204, %212 : vector<2x32xf32>
    %221 = arith.addf %219, %220 : vector<2x32xf32>
    %222 = math.tanh %221 : vector<2x32xf32>
    %223 = arith.mulf %218, %222 : vector<2x32xf32>
    %224 = arith.truncf %191 : vector<2x32xf32> to vector<2x32xbf16>
    %cst_62 = arith.constant dense<0.000000e+00> : vector<2x128xf32>
    %225 = tpu.matmul %224, %9, %cst_62 {dimension_numbers = #tpu.dot_dimension_numbers<[1], [0], [0], [1], [0, 0, 1, 1], [], []>} : vector<2x32xbf16>, vector<32x128xbf16>, vector<2x128xf32> -> vector<2x128xf32>
    %226 = arith.addf %195, %225 : vector<2x128xf32>
    %227 = vector.extract_strided_slice %226 {offsets = [0, 0], sizes = [2, 32], strides = [1, 1]} : vector<2x128xf32> to vector<2x32xf32>
    %228 = arith.negf %227 : vector<2x32xf32>
    %229 = math.exp %228 : vector<2x32xf32>
    %cst_63 = arith.constant 1.000000e+00 : f32
    %230 = vector.broadcast %cst_63 : f32 to vector<2x32xf32>
    %231 = arith.addf %230, %229 : vector<2x32xf32>
    %232 = arith.divf %230, %231 : vector<2x32xf32>
    %233 = vector.extract_strided_slice %226 {offsets = [0, 32], sizes = [2, 32], strides = [1, 1]} : vector<2x128xf32> to vector<2x32xf32>
    %234 = arith.negf %233 : vector<2x32xf32>
    %235 = math.exp %234 : vector<2x32xf32>
    %cst_64 = arith.constant 1.000000e+00 : f32
    %236 = vector.broadcast %cst_64 : f32 to vector<2x32xf32>
    %237 = arith.addf %236, %235 : vector<2x32xf32>
    %238 = arith.divf %236, %237 : vector<2x32xf32>
    %239 = vector.extract_strided_slice %226 {offsets = [0, 64], sizes = [2, 32], strides = [1, 1]} : vector<2x128xf32> to vector<2x32xf32>
    %240 = math.tanh %239 : vector<2x32xf32>
    %241 = vector.extract_strided_slice %226 {offsets = [0, 96], sizes = [2, 32], strides = [1, 1]} : vector<2x128xf32> to vector<2x32xf32>
    %242 = arith.negf %241 : vector<2x32xf32>
    %243 = math.exp %242 : vector<2x32xf32>
    %cst_65 = arith.constant 1.000000e+00 : f32
    %244 = vector.broadcast %cst_65 : f32 to vector<2x32xf32>
    %245 = arith.addf %244, %243 : vector<2x32xf32>
    %246 = arith.divf %244, %245 : vector<2x32xf32>
    %247 = arith.mulf %238, %189 : vector<2x32xf32>
    %248 = arith.mulf %232, %240 : vector<2x32xf32>
    %249 = arith.addf %247, %248 : vector<2x32xf32>
    %250 = math.tanh %249 : vector<2x32xf32>
    %251 = arith.mulf %246, %250 : vector<2x32xf32>
    %c6_66 = arith.constant 6 : index
    %c0_67 = arith.constant 0 : index
    %252 = vector.load %arg6[%c6_66, %c0_67] : memref<16x64xf32, #tpu.memory_space<vmem>>, vector<2x32xf32>
    tpu.vector_store %arg6[%c6_66, %c0_67], %223 {strides = array<i32>} : memref<16x64xf32, #tpu.memory_space<vmem>>, vector<2x32xf32>,
    %c8_68 = arith.constant 8 : index
    %c32_69 = arith.constant 32 : index
    %253 = vector.load %arg6[%c8_68, %c32_69] : memref<16x64xf32, #tpu.memory_space<vmem>>, vector<2x32xf32>
    tpu.vector_store %arg6[%c8_68, %c32_69], %251 {strides = array<i32>} : memref<16x64xf32, #tpu.memory_space<vmem>>, vector<2x32xf32>,
    %c8_70 = arith.constant 8 : index
    %c0_71 = arith.constant 0 : index
    %254 = vector.load %arg7[%c8_70, %c0_71] : memref<16x256xf32, #tpu.memory_space<vmem>>, vector<2x128xf32>
    %c6_72 = arith.constant 6 : index
    %c128_73 = arith.constant 128 : index
    %255 = vector.load %arg7[%c6_72, %c128_73] : memref<16x256xf32, #tpu.memory_space<vmem>>, vector<2x128xf32>
    %256 = arith.truncf %223 : vector<2x32xf32> to vector<2x32xbf16>
    %cst_74 = arith.constant dense<0.000000e+00> : vector<2x128xf32>
    %257 = tpu.matmul %256, %8, %cst_74 {dimension_numbers = #tpu.dot_dimension_numbers<[1], [0], [0], [1], [0, 0, 1, 1], [], []>} : vector<2x32xbf16>, vector<32x128xbf16>, vector<2x128xf32> -> vector<2x128xf32>
    %258 = arith.addf %254, %257 : vector<2x128xf32>
    %259 = vector.extract_strided_slice %258 {offsets = [0, 0], sizes = [2, 32], strides = [1, 1]} : vector<2x128xf32> to vector<2x32xf32>
    %260 = arith.negf %259 : vector<2x32xf32>
    %261 = math.exp %260 : vector<2x32xf32>
    %cst_75 = arith.constant 1.000000e+00 : f32
    %262 = vector.broadcast %cst_75 : f32 to vector<2x32xf32>
    %263 = arith.addf %262, %261 : vector<2x32xf32>
    %264 = arith.divf %262, %263 : vector<2x32xf32>
    %265 = vector.extract_strided_slice %258 {offsets = [0, 32], sizes = [2, 32], strides = [1, 1]} : vector<2x128xf32> to vector<2x32xf32>
    %266 = arith.negf %265 : vector<2x32xf32>
    %267 = math.exp %266 : vector<2x32xf32>
    %cst_76 = arith.constant 1.000000e+00 : f32
    %268 = vector.broadcast %cst_76 : f32 to vector<2x32xf32>
    %269 = arith.addf %268, %267 : vector<2x32xf32>
    %270 = arith.divf %268, %269 : vector<2x32xf32>
    %271 = vector.extract_strided_slice %258 {offsets = [0, 64], sizes = [2, 32], strides = [1, 1]} : vector<2x128xf32> to vector<2x32xf32>
    %272 = math.tanh %271 : vector<2x32xf32>
    %273 = vector.extract_strided_slice %258 {offsets = [0, 96], sizes = [2, 32], strides = [1, 1]} : vector<2x128xf32> to vector<2x32xf32>
    %274 = arith.negf %273 : vector<2x32xf32>
    %275 = math.exp %274 : vector<2x32xf32>
    %cst_77 = arith.constant 1.000000e+00 : f32
    %276 = vector.broadcast %cst_77 : f32 to vector<2x32xf32>
    %277 = arith.addf %276, %275 : vector<2x32xf32>
    %278 = arith.divf %276, %277 : vector<2x32xf32>
    %279 = arith.mulf %270, %221 : vector<2x32xf32>
    %280 = arith.mulf %264, %272 : vector<2x32xf32>
    %281 = arith.addf %279, %280 : vector<2x32xf32>
    %282 = math.tanh %281 : vector<2x32xf32>
    %283 = arith.mulf %278, %282 : vector<2x32xf32>
    %284 = arith.truncf %251 : vector<2x32xf32> to vector<2x32xbf16>
    %cst_78 = arith.constant dense<0.000000e+00> : vector<2x128xf32>
    %285 = tpu.matmul %284, %9, %cst_78 {dimension_numbers = #tpu.dot_dimension_numbers<[1], [0], [0], [1], [0, 0, 1, 1], [], []>} : vector<2x32xbf16>, vector<32x128xbf16>, vector<2x128xf32> -> vector<2x128xf32>
    %286 = arith.addf %255, %285 : vector<2x128xf32>
    %287 = vector.extract_strided_slice %286 {offsets = [0, 0], sizes = [2, 32], strides = [1, 1]} : vector<2x128xf32> to vector<2x32xf32>
    %288 = arith.negf %287 : vector<2x32xf32>
    %289 = math.exp %288 : vector<2x32xf32>
    %cst_79 = arith.constant 1.000000e+00 : f32
    %290 = vector.broadcast %cst_79 : f32 to vector<2x32xf32>
    %291 = arith.addf %290, %289 : vector<2x32xf32>
    %292 = arith.divf %290, %291 : vector<2x32xf32>
    %293 = vector.extract_strided_slice %286 {offsets = [0, 32], sizes = [2, 32], strides = [1, 1]} : vector<2x128xf32> to vector<2x32xf32>
    %294 = arith.negf %293 : vector<2x32xf32>
    %295 = math.exp %294 : vector<2x32xf32>
    %cst_80 = arith.constant 1.000000e+00 : f32
    %296 = vector.broadcast %cst_80 : f32 to vector<2x32xf32>
    %297 = arith.addf %296, %295 : vector<2x32xf32>
    %298 = arith.divf %296, %297 : vector<2x32xf32>
    %299 = vector.extract_strided_slice %286 {offsets = [0, 64], sizes = [2, 32], strides = [1, 1]} : vector<2x128xf32> to vector<2x32xf32>
    %300 = math.tanh %299 : vector<2x32xf32>
    %301 = vector.extract_strided_slice %286 {offsets = [0, 96], sizes = [2, 32], strides = [1, 1]} : vector<2x128xf32> to vector<2x32xf32>
    %302 = arith.negf %301 : vector<2x32xf32>
    %303 = math.exp %302 : vector<2x32xf32>
    %cst_81 = arith.constant 1.000000e+00 : f32
    %304 = vector.broadcast %cst_81 : f32 to vector<2x32xf32>
    %305 = arith.addf %304, %303 : vector<2x32xf32>
    %306 = arith.divf %304, %305 : vector<2x32xf32>
    %307 = arith.mulf %298, %249 : vector<2x32xf32>
    %308 = arith.mulf %292, %300 : vector<2x32xf32>
    %309 = arith.addf %307, %308 : vector<2x32xf32>
    %310 = math.tanh %309 : vector<2x32xf32>
    %311 = arith.mulf %306, %310 : vector<2x32xf32>
    %c8_82 = arith.constant 8 : index
    %c0_83 = arith.constant 0 : index
    %312 = vector.load %arg6[%c8_82, %c0_83] : memref<16x64xf32, #tpu.memory_space<vmem>>, vector<2x32xf32>
    tpu.vector_store %arg6[%c8_82, %c0_83], %283 {strides = array<i32>} : memref<16x64xf32, #tpu.memory_space<vmem>>, vector<2x32xf32>,
    %c6_84 = arith.constant 6 : index
    %c32_85 = arith.constant 32 : index
    %313 = vector.load %arg6[%c6_84, %c32_85] : memref<16x64xf32, #tpu.memory_space<vmem>>, vector<2x32xf32>
    tpu.vector_store %arg6[%c6_84, %c32_85], %311 {strides = array<i32>} : memref<16x64xf32, #tpu.memory_space<vmem>>, vector<2x32xf32>,
    %c10_86 = arith.constant 10 : index
    %c0_87 = arith.constant 0 : index
    %314 = vector.load %arg7[%c10_86, %c0_87] : memref<16x256xf32, #tpu.memory_space<vmem>>, vector<2x128xf32>
    %c4_88 = arith.constant 4 : index
    %c128_89 = arith.constant 128 : index
    %315 = vector.load %arg7[%c4_88, %c128_89] : memref<16x256xf32, #tpu.memory_space<vmem>>, vector<2x128xf32>
    %316 = arith.truncf %283 : vector<2x32xf32> to vector<2x32xbf16>
    %cst_90 = arith.constant dense<0.000000e+00> : vector<2x128xf32>
    %317 = tpu.matmul %316, %8, %cst_90 {dimension_numbers = #tpu.dot_dimension_numbers<[1], [0], [0], [1], [0, 0, 1, 1], [], []>} : vector<2x32xbf16>, vector<32x128xbf16>, vector<2x128xf32> -> vector<2x128xf32>
    %318 = arith.addf %314, %317 : vector<2x128xf32>
    %319 = vector.extract_strided_slice %318 {offsets = [0, 0], sizes = [2, 32], strides = [1, 1]} : vector<2x128xf32> to vector<2x32xf32>
    %320 = arith.negf %319 : vector<2x32xf32>
    %321 = math.exp %320 : vector<2x32xf32>
    %cst_91 = arith.constant 1.000000e+00 : f32
    %322 = vector.broadcast %cst_91 : f32 to vector<2x32xf32>
    %323 = arith.addf %322, %321 : vector<2x32xf32>
    %324 = arith.divf %322, %323 : vector<2x32xf32>
    %325 = vector.extract_strided_slice %318 {offsets = [0, 32], sizes = [2, 32], strides = [1, 1]} : vector<2x128xf32> to vector<2x32xf32>
    %326 = arith.negf %325 : vector<2x32xf32>
    %327 = math.exp %326 : vector<2x32xf32>
    %cst_92 = arith.constant 1.000000e+00 : f32
    %328 = vector.broadcast %cst_92 : f32 to vector<2x32xf32>
    %329 = arith.addf %328, %327 : vector<2x32xf32>
    %330 = arith.divf %328, %329 : vector<2x32xf32>
    %331 = vector.extract_strided_slice %318 {offsets = [0, 64], sizes = [2, 32], strides = [1, 1]} : vector<2x128xf32> to vector<2x32xf32>
    %332 = math.tanh %331 : vector<2x32xf32>
    %333 = vector.extract_strided_slice %318 {offsets = [0, 96], sizes = [2, 32], strides = [1, 1]} : vector<2x128xf32> to vector<2x32xf32>
    %334 = arith.negf %333 : vector<2x32xf32>
    %335 = math.exp %334 : vector<2x32xf32>
    %cst_93 = arith.constant 1.000000e+00 : f32
    %336 = vector.broadcast %cst_93 : f32 to vector<2x32xf32>
    %337 = arith.addf %336, %335 : vector<2x32xf32>
    %338 = arith.divf %336, %337 : vector<2x32xf32>
    %339 = arith.mulf %330, %281 : vector<2x32xf32>
    %340 = arith.mulf %324, %332 : vector<2x32xf32>
    %341 = arith.addf %339, %340 : vector<2x32xf32>
    %342 = math.tanh %341 : vector<2x32xf32>
    %343 = arith.mulf %338, %342 : vector<2x32xf32>
    %344 = arith.truncf %311 : vector<2x32xf32> to vector<2x32xbf16>
    %cst_94 = arith.constant dense<0.000000e+00> : vector<2x128xf32>
    %345 = tpu.matmul %344, %9, %cst_94 {dimension_numbers = #tpu.dot_dimension_numbers<[1], [0], [0], [1], [0, 0, 1, 1], [], []>} : vector<2x32xbf16>, vector<32x128xbf16>, vector<2x128xf32> -> vector<2x128xf32>
    %346 = arith.addf %315, %345 : vector<2x128xf32>
    %347 = vector.extract_strided_slice %346 {offsets = [0, 0], sizes = [2, 32], strides = [1, 1]} : vector<2x128xf32> to vector<2x32xf32>
    %348 = arith.negf %347 : vector<2x32xf32>
    %349 = math.exp %348 : vector<2x32xf32>
    %cst_95 = arith.constant 1.000000e+00 : f32
    %350 = vector.broadcast %cst_95 : f32 to vector<2x32xf32>
    %351 = arith.addf %350, %349 : vector<2x32xf32>
    %352 = arith.divf %350, %351 : vector<2x32xf32>
    %353 = vector.extract_strided_slice %346 {offsets = [0, 32], sizes = [2, 32], strides = [1, 1]} : vector<2x128xf32> to vector<2x32xf32>
    %354 = arith.negf %353 : vector<2x32xf32>
    %355 = math.exp %354 : vector<2x32xf32>
    %cst_96 = arith.constant 1.000000e+00 : f32
    %356 = vector.broadcast %cst_96 : f32 to vector<2x32xf32>
    %357 = arith.addf %356, %355 : vector<2x32xf32>
    %358 = arith.divf %356, %357 : vector<2x32xf32>
    %359 = vector.extract_strided_slice %346 {offsets = [0, 64], sizes = [2, 32], strides = [1, 1]} : vector<2x128xf32> to vector<2x32xf32>
    %360 = math.tanh %359 : vector<2x32xf32>
    %361 = vector.extract_strided_slice %346 {offsets = [0, 96], sizes = [2, 32], strides = [1, 1]} : vector<2x128xf32> to vector<2x32xf32>
    %362 = arith.negf %361 : vector<2x32xf32>
    %363 = math.exp %362 : vector<2x32xf32>
    %cst_97 = arith.constant 1.000000e+00 : f32
    %364 = vector.broadcast %cst_97 : f32 to vector<2x32xf32>
    %365 = arith.addf %364, %363 : vector<2x32xf32>
    %366 = arith.divf %364, %365 : vector<2x32xf32>
    %367 = arith.mulf %358, %309 : vector<2x32xf32>
    %368 = arith.mulf %352, %360 : vector<2x32xf32>
    %369 = arith.addf %367, %368 : vector<2x32xf32>
    %370 = math.tanh %369 : vector<2x32xf32>
    %371 = arith.mulf %366, %370 : vector<2x32xf32>
    %c10_98 = arith.constant 10 : index
    %c0_99 = arith.constant 0 : index
    %372 = vector.load %arg6[%c10_98, %c0_99] : memref<16x64xf32, #tpu.memory_space<vmem>>, vector<2x32xf32>
    tpu.vector_store %arg6[%c10_98, %c0_99], %343 {strides = array<i32>} : memref<16x64xf32, #tpu.memory_space<vmem>>, vector<2x32xf32>,
    %c4_100 = arith.constant 4 : index
    %c32_101 = arith.constant 32 : index
    %373 = vector.load %arg6[%c4_100, %c32_101] : memref<16x64xf32, #tpu.memory_space<vmem>>, vector<2x32xf32>
    tpu.vector_store %arg6[%c4_100, %c32_101], %371 {strides = array<i32>} : memref<16x64xf32, #tpu.memory_space<vmem>>, vector<2x32xf32>,
    %c12_102 = arith.constant 12 : index
    %c0_103 = arith.constant 0 : index
    %374 = vector.load %arg7[%c12_102, %c0_103] : memref<16x256xf32, #tpu.memory_space<vmem>>, vector<2x128xf32>
    %c2_104 = arith.constant 2 : index
    %c128_105 = arith.constant 128 : index
    %375 = vector.load %arg7[%c2_104, %c128_105] : memref<16x256xf32, #tpu.memory_space<vmem>>, vector<2x128xf32>
    %376 = arith.truncf %343 : vector<2x32xf32> to vector<2x32xbf16>
    %cst_106 = arith.constant dense<0.000000e+00> : vector<2x128xf32>
    %377 = tpu.matmul %376, %8, %cst_106 {dimension_numbers = #tpu.dot_dimension_numbers<[1], [0], [0], [1], [0, 0, 1, 1], [], []>} : vector<2x32xbf16>, vector<32x128xbf16>, vector<2x128xf32> -> vector<2x128xf32>
    %378 = arith.addf %374, %377 : vector<2x128xf32>
    %379 = vector.extract_strided_slice %378 {offsets = [0, 0], sizes = [2, 32], strides = [1, 1]} : vector<2x128xf32> to vector<2x32xf32>
    %380 = arith.negf %379 : vector<2x32xf32>
    %381 = math.exp %380 : vector<2x32xf32>
    %cst_107 = arith.constant 1.000000e+00 : f32
    %382 = vector.broadcast %cst_107 : f32 to vector<2x32xf32>
    %383 = arith.addf %382, %381 : vector<2x32xf32>
    %384 = arith.divf %382, %383 : vector<2x32xf32>
    %385 = vector.extract_strided_slice %378 {offsets = [0, 32], sizes = [2, 32], strides = [1, 1]} : vector<2x128xf32> to vector<2x32xf32>
    %386 = arith.negf %385 : vector<2x32xf32>
    %387 = math.exp %386 : vector<2x32xf32>
    %cst_108 = arith.constant 1.000000e+00 : f32
    %388 = vector.broadcast %cst_108 : f32 to vector<2x32xf32>
    %389 = arith.addf %388, %387 : vector<2x32xf32>
    %390 = arith.divf %388, %389 : vector<2x32xf32>
    %391 = vector.extract_strided_slice %378 {offsets = [0, 64], sizes = [2, 32], strides = [1, 1]} : vector<2x128xf32> to vector<2x32xf32>
    %392 = math.tanh %391 : vector<2x32xf32>
    %393 = vector.extract_strided_slice %378 {offsets = [0, 96], sizes = [2, 32], strides = [1, 1]} : vector<2x128xf32> to vector<2x32xf32>
    %394 = arith.negf %393 : vector<2x32xf32>
    %395 = math.exp %394 : vector<2x32xf32>
    %cst_109 = arith.constant 1.000000e+00 : f32
    %396 = vector.broadcast %cst_109 : f32 to vector<2x32xf32>
    %397 = arith.addf %396, %395 : vector<2x32xf32>
    %398 = arith.divf %396, %397 : vector<2x32xf32>
    %399 = arith.mulf %390, %341 : vector<2x32xf32>
    %400 = arith.mulf %384, %392 : vector<2x32xf32>
    %401 = arith.addf %399, %400 : vector<2x32xf32>
    %402 = math.tanh %401 : vector<2x32xf32>
    %403 = arith.mulf %398, %402 : vector<2x32xf32>
    %404 = arith.truncf %371 : vector<2x32xf32> to vector<2x32xbf16>
    %cst_110 = arith.constant dense<0.000000e+00> : vector<2x128xf32>
    %405 = tpu.matmul %404, %9, %cst_110 {dimension_numbers = #tpu.dot_dimension_numbers<[1], [0], [0], [1], [0, 0, 1, 1], [], []>} : vector<2x32xbf16>, vector<32x128xbf16>, vector<2x128xf32> -> vector<2x128xf32>
    %406 = arith.addf %375, %405 : vector<2x128xf32>
    %407 = vector.extract_strided_slice %406 {offsets = [0, 0], sizes = [2, 32], strides = [1, 1]} : vector<2x128xf32> to vector<2x32xf32>
    %408 = arith.negf %407 : vector<2x32xf32>
    %409 = math.exp %408 : vector<2x32xf32>
    %cst_111 = arith.constant 1.000000e+00 : f32
    %410 = vector.broadcast %cst_111 : f32 to vector<2x32xf32>
    %411 = arith.addf %410, %409 : vector<2x32xf32>
    %412 = arith.divf %410, %411 : vector<2x32xf32>
    %413 = vector.extract_strided_slice %406 {offsets = [0, 32], sizes = [2, 32], strides = [1, 1]} : vector<2x128xf32> to vector<2x32xf32>
    %414 = arith.negf %413 : vector<2x32xf32>
    %415 = math.exp %414 : vector<2x32xf32>
    %cst_112 = arith.constant 1.000000e+00 : f32
    %416 = vector.broadcast %cst_112 : f32 to vector<2x32xf32>
    %417 = arith.addf %416, %415 : vector<2x32xf32>
    %418 = arith.divf %416, %417 : vector<2x32xf32>
    %419 = vector.extract_strided_slice %406 {offsets = [0, 64], sizes = [2, 32], strides = [1, 1]} : vector<2x128xf32> to vector<2x32xf32>
    %420 = math.tanh %419 : vector<2x32xf32>
    %421 = vector.extract_strided_slice %406 {offsets = [0, 96], sizes = [2, 32], strides = [1, 1]} : vector<2x128xf32> to vector<2x32xf32>
    %422 = arith.negf %421 : vector<2x32xf32>
    %423 = math.exp %422 : vector<2x32xf32>
    %cst_113 = arith.constant 1.000000e+00 : f32
    %424 = vector.broadcast %cst_113 : f32 to vector<2x32xf32>
    %425 = arith.addf %424, %423 : vector<2x32xf32>
    %426 = arith.divf %424, %425 : vector<2x32xf32>
    %427 = arith.mulf %418, %369 : vector<2x32xf32>
    %428 = arith.mulf %412, %420 : vector<2x32xf32>
    %429 = arith.addf %427, %428 : vector<2x32xf32>
    %430 = math.tanh %429 : vector<2x32xf32>
    %431 = arith.mulf %426, %430 : vector<2x32xf32>
    %c12_114 = arith.constant 12 : index
    %c0_115 = arith.constant 0 : index
    %432 = vector.load %arg6[%c12_114, %c0_115] : memref<16x64xf32, #tpu.memory_space<vmem>>, vector<2x32xf32>
    tpu.vector_store %arg6[%c12_114, %c0_115], %403 {strides = array<i32>} : memref<16x64xf32, #tpu.memory_space<vmem>>, vector<2x32xf32>,
    %c2_116 = arith.constant 2 : index
    %c32_117 = arith.constant 32 : index
    %433 = vector.load %arg6[%c2_116, %c32_117] : memref<16x64xf32, #tpu.memory_space<vmem>>, vector<2x32xf32>
    tpu.vector_store %arg6[%c2_116, %c32_117], %431 {strides = array<i32>} : memref<16x64xf32, #tpu.memory_space<vmem>>, vector<2x32xf32>,
    %c14_118 = arith.constant 14 : index
    %c0_119 = arith.constant 0 : index
    %434 = vector.load %arg7[%c14_118, %c0_119] : memref<16x256xf32, #tpu.memory_space<vmem>>, vector<2x128xf32>
    %c0_120 = arith.constant 0 : index
    %c128_121 = arith.constant 128 : index
    %435 = vector.load %arg7[%c0_120, %c128_121] : memref<16x256xf32, #tpu.memory_space<vmem>>, vector<2x128xf32>
    %436 = arith.truncf %403 : vector<2x32xf32> to vector<2x32xbf16>
    %cst_122 = arith.constant dense<0.000000e+00> : vector<2x128xf32>
    %437 = tpu.matmul %436, %8, %cst_122 {dimension_numbers = #tpu.dot_dimension_numbers<[1], [0], [0], [1], [0, 0, 1, 1], [], []>} : vector<2x32xbf16>, vector<32x128xbf16>, vector<2x128xf32> -> vector<2x128xf32>
    %438 = arith.addf %434, %437 : vector<2x128xf32>
    %439 = vector.extract_strided_slice %438 {offsets = [0, 0], sizes = [2, 32], strides = [1, 1]} : vector<2x128xf32> to vector<2x32xf32>
    %440 = arith.negf %439 : vector<2x32xf32>
    %441 = math.exp %440 : vector<2x32xf32>
    %cst_123 = arith.constant 1.000000e+00 : f32
    %442 = vector.broadcast %cst_123 : f32 to vector<2x32xf32>
    %443 = arith.addf %442, %441 : vector<2x32xf32>
    %444 = arith.divf %442, %443 : vector<2x32xf32>
    %445 = vector.extract_strided_slice %438 {offsets = [0, 32], sizes = [2, 32], strides = [1, 1]} : vector<2x128xf32> to vector<2x32xf32>
    %446 = arith.negf %445 : vector<2x32xf32>
    %447 = math.exp %446 : vector<2x32xf32>
    %cst_124 = arith.constant 1.000000e+00 : f32
    %448 = vector.broadcast %cst_124 : f32 to vector<2x32xf32>
    %449 = arith.addf %448, %447 : vector<2x32xf32>
    %450 = arith.divf %448, %449 : vector<2x32xf32>
    %451 = vector.extract_strided_slice %438 {offsets = [0, 64], sizes = [2, 32], strides = [1, 1]} : vector<2x128xf32> to vector<2x32xf32>
    %452 = math.tanh %451 : vector<2x32xf32>
    %453 = vector.extract_strided_slice %438 {offsets = [0, 96], sizes = [2, 32], strides = [1, 1]} : vector<2x128xf32> to vector<2x32xf32>
    %454 = arith.negf %453 : vector<2x32xf32>
    %455 = math.exp %454 : vector<2x32xf32>
    %cst_125 = arith.constant 1.000000e+00 : f32
    %456 = vector.broadcast %cst_125 : f32 to vector<2x32xf32>
    %457 = arith.addf %456, %455 : vector<2x32xf32>
    %458 = arith.divf %456, %457 : vector<2x32xf32>
    %459 = arith.mulf %450, %401 : vector<2x32xf32>
    %460 = arith.mulf %444, %452 : vector<2x32xf32>
    %461 = arith.addf %459, %460 : vector<2x32xf32>
    %462 = math.tanh %461 : vector<2x32xf32>
    %463 = arith.mulf %458, %462 : vector<2x32xf32>
    %464 = arith.truncf %431 : vector<2x32xf32> to vector<2x32xbf16>
    %cst_126 = arith.constant dense<0.000000e+00> : vector<2x128xf32>
    %465 = tpu.matmul %464, %9, %cst_126 {dimension_numbers = #tpu.dot_dimension_numbers<[1], [0], [0], [1], [0, 0, 1, 1], [], []>} : vector<2x32xbf16>, vector<32x128xbf16>, vector<2x128xf32> -> vector<2x128xf32>
    %466 = arith.addf %435, %465 : vector<2x128xf32>
    %467 = vector.extract_strided_slice %466 {offsets = [0, 0], sizes = [2, 32], strides = [1, 1]} : vector<2x128xf32> to vector<2x32xf32>
    %468 = arith.negf %467 : vector<2x32xf32>
    %469 = math.exp %468 : vector<2x32xf32>
    %cst_127 = arith.constant 1.000000e+00 : f32
    %470 = vector.broadcast %cst_127 : f32 to vector<2x32xf32>
    %471 = arith.addf %470, %469 : vector<2x32xf32>
    %472 = arith.divf %470, %471 : vector<2x32xf32>
    %473 = vector.extract_strided_slice %466 {offsets = [0, 32], sizes = [2, 32], strides = [1, 1]} : vector<2x128xf32> to vector<2x32xf32>
    %474 = arith.negf %473 : vector<2x32xf32>
    %475 = math.exp %474 : vector<2x32xf32>
    %cst_128 = arith.constant 1.000000e+00 : f32
    %476 = vector.broadcast %cst_128 : f32 to vector<2x32xf32>
    %477 = arith.addf %476, %475 : vector<2x32xf32>
    %478 = arith.divf %476, %477 : vector<2x32xf32>
    %479 = vector.extract_strided_slice %466 {offsets = [0, 64], sizes = [2, 32], strides = [1, 1]} : vector<2x128xf32> to vector<2x32xf32>
    %480 = math.tanh %479 : vector<2x32xf32>
    %481 = vector.extract_strided_slice %466 {offsets = [0, 96], sizes = [2, 32], strides = [1, 1]} : vector<2x128xf32> to vector<2x32xf32>
    %482 = arith.negf %481 : vector<2x32xf32>
    %483 = math.exp %482 : vector<2x32xf32>
    %cst_129 = arith.constant 1.000000e+00 : f32
    %484 = vector.broadcast %cst_129 : f32 to vector<2x32xf32>
    %485 = arith.addf %484, %483 : vector<2x32xf32>
    %486 = arith.divf %484, %485 : vector<2x32xf32>
    %487 = arith.mulf %478, %429 : vector<2x32xf32>
    %488 = arith.mulf %472, %480 : vector<2x32xf32>
    %489 = arith.addf %487, %488 : vector<2x32xf32>
    %490 = math.tanh %489 : vector<2x32xf32>
    %491 = arith.mulf %486, %490 : vector<2x32xf32>
    %c14_130 = arith.constant 14 : index
    %c0_131 = arith.constant 0 : index
    %492 = vector.load %arg6[%c14_130, %c0_131] : memref<16x64xf32, #tpu.memory_space<vmem>>, vector<2x32xf32>
    tpu.vector_store %arg6[%c14_130, %c0_131], %463 {strides = array<i32>} : memref<16x64xf32, #tpu.memory_space<vmem>>, vector<2x32xf32>,
    %c0_132 = arith.constant 0 : index
    %c32_133 = arith.constant 32 : index
    %493 = vector.load %arg6[%c0_132, %c32_133] : memref<16x64xf32, #tpu.memory_space<vmem>>, vector<2x32xf32>
    tpu.vector_store %arg6[%c0_132, %c32_133], %491 {strides = array<i32>} : memref<16x64xf32, #tpu.memory_space<vmem>>, vector<2x32xf32>,
    return
  }
  func.func @transform_0(%arg0: i32) -> (i32, i32) {
    %c0_i32 = arith.constant 0 : i32
    %c0_i32_0 = arith.constant 0 : i32
    %c0_i32_1 = arith.constant 0 : i32
    return %c0_i32, %c0_i32_0 : i32, i32
  }
  func.func @transform_1(%arg0: i32) -> (i32, i32) {
    %c0_i32 = arith.constant 0 : i32
    %c0_i32_0 = arith.constant 0 : i32
    %c0_i32_1 = arith.constant 0 : i32
    return %c0_i32, %c0_i32_0 : i32, i32
  }
  func.func @transform_2(%arg0: i32) -> (i32, i32) {
    %c0_i32 = arith.constant 0 : i32
    %c0_i32_0 = arith.constant 0 : i32
    %c0_i32_1 = arith.constant 0 : i32
    return %c0_i32, %c0_i32_0 : i32, i32
  }
  func.func @transform_3(%arg0: i32) -> (i32, i32) {
    %c0_i32 = arith.constant 0 : i32
    %c0_i32_0 = arith.constant 0 : i32
    %c0_i32_1 = arith.constant 0 : i32
    return %c0_i32, %c0_i32_0 : i32, i32
  }
  func.func @transform_4(%arg0: i32) -> (i32, i32) {
    %c0_i32 = arith.constant 0 : i32
    %c0_i32_0 = arith.constant 0 : i32
    %c0_i32_1 = arith.constant 0 : i32
    return %c0_i32, %c0_i32_0 : i32, i32
  }
  func.func @transform_5(%arg0: i32) -> (i32, i32) {
    %c0_i32 = arith.constant 0 : i32
    %c0_i32_0 = arith.constant 0 : i32
    %c0_i32_1 = arith.constant 0 : i32
    return %c0_i32, %c0_i32_0 : i32, i32
  }
}

module attributes {stable_mosaic.version = 11 : i64} {
  func.func @_bilstm_layer_kernel(%arg0: i32, %arg1: memref<16x64xf32, #tpu.memory_space<vmem>>, %arg2: memref<64x256xbf16, #tpu.memory_space<vmem>>, %arg3: memref<32x128xbf16, #tpu.memory_space<vmem>>, %arg4: memref<32x128xbf16, #tpu.memory_space<vmem>>, %arg5: memref<1x256xf32, #tpu.memory_space<vmem>>, %arg6: memref<16x64xf32, #tpu.memory_space<vmem>>, %arg7: memref<16x256xf32, #tpu.memory_space<vmem>>) attributes {dimension_semantics = [#tpu.dimension_semantics<arbitrary>], iteration_bounds = array<i64: 1>, scalar_prefetch = 0 : i64, scratch_operands = 1 : i64, tpu.core_type = #tpu.core_type<tc>, window_params = [{pipeline_mode = #tpu.pipeline_mode<synchronous>, transform_indices = @transform_0, window_bounds = array<i64: 16, 64>}, {pipeline_mode = #tpu.pipeline_mode<synchronous>, transform_indices = @transform_1, window_bounds = array<i64: 64, 256>}, {pipeline_mode = #tpu.pipeline_mode<synchronous>, transform_indices = @transform_2, window_bounds = array<i64: 32, 128>}, {pipeline_mode = #tpu.pipeline_mode<synchronous>, transform_indices = @transform_3, window_bounds = array<i64: 32, 128>}, {pipeline_mode = #tpu.pipeline_mode<synchronous>, transform_indices = @transform_4, window_bounds = array<i64: 1, 256>}, {pipeline_mode = #tpu.pipeline_mode<synchronous>, transform_indices = @transform_5, window_bounds = array<i64: 16, 64>}]} {
    %c0 = arith.constant 0 : index
    %c0_0 = arith.constant 0 : index
    %0 = vector.load %arg1[%c0, %c0_0] : memref<16x64xf32, #tpu.memory_space<vmem>>, vector<16x64xf32>
    %1 = arith.truncf %0 : vector<16x64xf32> to vector<16x64xbf16>
    %c0_1 = arith.constant 0 : index
    %c0_2 = arith.constant 0 : index
    %2 = vector.load %arg2[%c0_1, %c0_2] : memref<64x256xbf16, #tpu.memory_space<vmem>>, vector<64x256xbf16>
    %cst = arith.constant dense<0.000000e+00> : vector<16x256xf32>
    %3 = tpu.matmul %1, %2, %cst {dimension_numbers = #tpu.dot_dimension_numbers<[1], [0], [0], [1], [0, 0, 1, 1], [], []>} : vector<16x64xbf16>, vector<64x256xbf16>, vector<16x256xf32> -> vector<16x256xf32>
    %c0_3 = arith.constant 0 : index
    %c0_4 = arith.constant 0 : index
    %4 = vector.load %arg5[%c0_3, %c0_4] : memref<1x256xf32, #tpu.memory_space<vmem>>, vector<1x256xf32>
    %5 = vector.broadcast %4 : vector<1x256xf32> to vector<16x256xf32>
    %6 = arith.addf %3, %5 : vector<16x256xf32>
    %c0_5 = arith.constant 0 : index
    %c0_6 = arith.constant 0 : index
    %7 = vector.load %arg7[%c0_5, %c0_6] : memref<16x256xf32, #tpu.memory_space<vmem>>, vector<16x256xf32>
    tpu.vector_store %arg7[%c0_5, %c0_6], %6 {strides = array<i32>} : memref<16x256xf32, #tpu.memory_space<vmem>>, vector<16x256xf32>,
    %c0_7 = arith.constant 0 : index
    %c0_8 = arith.constant 0 : index
    %8 = vector.load %arg3[%c0_7, %c0_8] : memref<32x128xbf16, #tpu.memory_space<vmem>>, vector<32x128xbf16>
    %c0_9 = arith.constant 0 : index
    %c0_10 = arith.constant 0 : index
    %9 = vector.load %arg4[%c0_9, %c0_10] : memref<32x128xbf16, #tpu.memory_space<vmem>>, vector<32x128xbf16>
    %cst_11 = arith.constant 0.000000e+00 : f32
    %10 = vector.broadcast %cst_11 : f32 to vector<2x32xf32>
    %cst_12 = arith.constant 0.000000e+00 : f32
    %11 = vector.broadcast %cst_12 : f32 to vector<2x32xf32>
    %cst_13 = arith.constant 0.000000e+00 : f32
    %12 = vector.broadcast %cst_13 : f32 to vector<2x32xf32>
    %cst_14 = arith.constant 0.000000e+00 : f32
    %13 = vector.broadcast %cst_14 : f32 to vector<2x32xf32>
    %c0_15 = arith.constant 0 : index
    %c0_16 = arith.constant 0 : index
    %14 = vector.load %arg7[%c0_15, %c0_16] : memref<16x256xf32, #tpu.memory_space<vmem>>, vector<2x128xf32>
    %c14 = arith.constant 14 : index
    %c128 = arith.constant 128 : index
    %15 = vector.load %arg7[%c14, %c128] : memref<16x256xf32, #tpu.memory_space<vmem>>, vector<2x128xf32>
    %16 = arith.truncf %10 : vector<2x32xf32> to vector<2x32xbf16>
    %cst_17 = arith.constant dense<0.000000e+00> : vector<2x128xf32>
    %17 = tpu.matmul %16, %8, %cst_17 {dimension_numbers = #tpu.dot_dimension_numbers<[1], [0], [0], [1], [0, 0, 1, 1], [], []>} : vector<2x32xbf16>, vector<32x128xbf16>, vector<2x128xf32> -> vector<2x128xf32>
    %18 = arith.addf %14, %17 : vector<2x128xf32>
    %19 = vector.extract_strided_slice %18 {offsets = [0, 0], sizes = [2, 32], strides = [1, 1]} : vector<2x128xf32> to vector<2x32xf32>
    %20 = arith.negf %19 : vector<2x32xf32>
    %21 = math.exp %20 : vector<2x32xf32>
    %cst_18 = arith.constant 1.000000e+00 : f32
    %22 = vector.broadcast %cst_18 : f32 to vector<2x32xf32>
    %23 = arith.addf %22, %21 : vector<2x32xf32>
    %24 = arith.divf %22, %23 : vector<2x32xf32>
    %25 = vector.extract_strided_slice %18 {offsets = [0, 32], sizes = [2, 32], strides = [1, 1]} : vector<2x128xf32> to vector<2x32xf32>
    %26 = arith.negf %25 : vector<2x32xf32>
    %27 = math.exp %26 : vector<2x32xf32>
    %cst_19 = arith.constant 1.000000e+00 : f32
    %28 = vector.broadcast %cst_19 : f32 to vector<2x32xf32>
    %29 = arith.addf %28, %27 : vector<2x32xf32>
    %30 = arith.divf %28, %29 : vector<2x32xf32>
    %31 = vector.extract_strided_slice %18 {offsets = [0, 64], sizes = [2, 32], strides = [1, 1]} : vector<2x128xf32> to vector<2x32xf32>
    %32 = math.tanh %31 : vector<2x32xf32>
    %33 = vector.extract_strided_slice %18 {offsets = [0, 96], sizes = [2, 32], strides = [1, 1]} : vector<2x128xf32> to vector<2x32xf32>
    %34 = arith.negf %33 : vector<2x32xf32>
    %35 = math.exp %34 : vector<2x32xf32>
    %cst_20 = arith.constant 1.000000e+00 : f32
    %36 = vector.broadcast %cst_20 : f32 to vector<2x32xf32>
    %37 = arith.addf %36, %35 : vector<2x32xf32>
    %38 = arith.divf %36, %37 : vector<2x32xf32>
    %39 = arith.mulf %30, %11 : vector<2x32xf32>
    %40 = arith.mulf %24, %32 : vector<2x32xf32>
    %41 = arith.addf %39, %40 : vector<2x32xf32>
    %42 = math.tanh %41 : vector<2x32xf32>
    %43 = arith.mulf %38, %42 : vector<2x32xf32>
    %44 = arith.truncf %12 : vector<2x32xf32> to vector<2x32xbf16>
    %cst_21 = arith.constant dense<0.000000e+00> : vector<2x128xf32>
    %45 = tpu.matmul %44, %9, %cst_21 {dimension_numbers = #tpu.dot_dimension_numbers<[1], [0], [0], [1], [0, 0, 1, 1], [], []>} : vector<2x32xbf16>, vector<32x128xbf16>, vector<2x128xf32> -> vector<2x128xf32>
    %46 = arith.addf %15, %45 : vector<2x128xf32>
    %47 = vector.extract_strided_slice %46 {offsets = [0, 0], sizes = [2, 32], strides = [1, 1]} : vector<2x128xf32> to vector<2x32xf32>
    %48 = arith.negf %47 : vector<2x32xf32>
    %49 = math.exp %48 : vector<2x32xf32>
    %cst_22 = arith.constant 1.000000e+00 : f32
    %50 = vector.broadcast %cst_22 : f32 to vector<2x32xf32>
    %51 = arith.addf %50, %49 : vector<2x32xf32>
    %52 = arith.divf %50, %51 : vector<2x32xf32>
    %53 = vector.extract_strided_slice %46 {offsets = [0, 32], sizes = [2, 32], strides = [1, 1]} : vector<2x128xf32> to vector<2x32xf32>
    %54 = arith.negf %53 : vector<2x32xf32>
    %55 = math.exp %54 : vector<2x32xf32>
    %cst_23 = arith.constant 1.000000e+00 : f32
    %56 = vector.broadcast %cst_23 : f32 to vector<2x32xf32>
    %57 = arith.addf %56, %55 : vector<2x32xf32>
    %58 = arith.divf %56, %57 : vector<2x32xf32>
    %59 = vector.extract_strided_slice %46 {offsets = [0, 64], sizes = [2, 32], strides = [1, 1]} : vector<2x128xf32> to vector<2x32xf32>
    %60 = math.tanh %59 : vector<2x32xf32>
    %61 = vector.extract_strided_slice %46 {offsets = [0, 96], sizes = [2, 32], strides = [1, 1]} : vector<2x128xf32> to vector<2x32xf32>
    %62 = arith.negf %61 : vector<2x32xf32>
    %63 = math.exp %62 : vector<2x32xf32>
    %cst_24 = arith.constant 1.000000e+00 : f32
    %64 = vector.broadcast %cst_24 : f32 to vector<2x32xf32>
    %65 = arith.addf %64, %63 : vector<2x32xf32>
    %66 = arith.divf %64, %65 : vector<2x32xf32>
    %67 = arith.mulf %58, %13 : vector<2x32xf32>
    %68 = arith.mulf %52, %60 : vector<2x32xf32>
    %69 = arith.addf %67, %68 : vector<2x32xf32>
    %70 = math.tanh %69 : vector<2x32xf32>
    %71 = arith.mulf %66, %70 : vector<2x32xf32>
    %c0_25 = arith.constant 0 : index
    %c0_26 = arith.constant 0 : index
    %72 = vector.load %arg6[%c0_25, %c0_26] : memref<16x64xf32, #tpu.memory_space<vmem>>, vector<2x32xf32>
    tpu.vector_store %arg6[%c0_25, %c0_26], %43 {strides = array<i32>} : memref<16x64xf32, #tpu.memory_space<vmem>>, vector<2x32xf32>,
    %c14_27 = arith.constant 14 : index
    %c32 = arith.constant 32 : index
    %73 = vector.load %arg6[%c14_27, %c32] : memref<16x64xf32, #tpu.memory_space<vmem>>, vector<2x32xf32>
    tpu.vector_store %arg6[%c14_27, %c32], %71 {strides = array<i32>} : memref<16x64xf32, #tpu.memory_space<vmem>>, vector<2x32xf32>,
    %c2 = arith.constant 2 : index
    %c0_28 = arith.constant 0 : index
    %74 = vector.load %arg7[%c2, %c0_28] : memref<16x256xf32, #tpu.memory_space<vmem>>, vector<2x128xf32>
    %c12 = arith.constant 12 : index
    %c128_29 = arith.constant 128 : index
    %75 = vector.load %arg7[%c12, %c128_29] : memref<16x256xf32, #tpu.memory_space<vmem>>, vector<2x128xf32>
    %76 = arith.truncf %43 : vector<2x32xf32> to vector<2x32xbf16>
    %cst_30 = arith.constant dense<0.000000e+00> : vector<2x128xf32>
    %77 = tpu.matmul %76, %8, %cst_30 {dimension_numbers = #tpu.dot_dimension_numbers<[1], [0], [0], [1], [0, 0, 1, 1], [], []>} : vector<2x32xbf16>, vector<32x128xbf16>, vector<2x128xf32> -> vector<2x128xf32>
    %78 = arith.addf %74, %77 : vector<2x128xf32>
    %79 = vector.extract_strided_slice %78 {offsets = [0, 0], sizes = [2, 32], strides = [1, 1]} : vector<2x128xf32> to vector<2x32xf32>
    %80 = arith.negf %79 : vector<2x32xf32>
    %81 = math.exp %80 : vector<2x32xf32>
    %cst_31 = arith.constant 1.000000e+00 : f32
    %82 = vector.broadcast %cst_31 : f32 to vector<2x32xf32>
    %83 = arith.addf %82, %81 : vector<2x32xf32>
    %84 = arith.divf %82, %83 : vector<2x32xf32>
    %85 = vector.extract_strided_slice %78 {offsets = [0, 32], sizes = [2, 32], strides = [1, 1]} : vector<2x128xf32> to vector<2x32xf32>
    %86 = arith.negf %85 : vector<2x32xf32>
    %87 = math.exp %86 : vector<2x32xf32>
    %cst_32 = arith.constant 1.000000e+00 : f32
    %88 = vector.broadcast %cst_32 : f32 to vector<2x32xf32>
    %89 = arith.addf %88, %87 : vector<2x32xf32>
    %90 = arith.divf %88, %89 : vector<2x32xf32>
    %91 = vector.extract_strided_slice %78 {offsets = [0, 64], sizes = [2, 32], strides = [1, 1]} : vector<2x128xf32> to vector<2x32xf32>
    %92 = math.tanh %91 : vector<2x32xf32>
    %93 = vector.extract_strided_slice %78 {offsets = [0, 96], sizes = [2, 32], strides = [1, 1]} : vector<2x128xf32> to vector<2x32xf32>
    %94 = arith.negf %93 : vector<2x32xf32>
    %95 = math.exp %94 : vector<2x32xf32>
    %cst_33 = arith.constant 1.000000e+00 : f32
    %96 = vector.broadcast %cst_33 : f32 to vector<2x32xf32>
    %97 = arith.addf %96, %95 : vector<2x32xf32>
    %98 = arith.divf %96, %97 : vector<2x32xf32>
    %99 = arith.mulf %90, %41 : vector<2x32xf32>
    %100 = arith.mulf %84, %92 : vector<2x32xf32>
    %101 = arith.addf %99, %100 : vector<2x32xf32>
    %102 = math.tanh %101 : vector<2x32xf32>
    %103 = arith.mulf %98, %102 : vector<2x32xf32>
    %104 = arith.truncf %71 : vector<2x32xf32> to vector<2x32xbf16>
    %cst_34 = arith.constant dense<0.000000e+00> : vector<2x128xf32>
    %105 = tpu.matmul %104, %9, %cst_34 {dimension_numbers = #tpu.dot_dimension_numbers<[1], [0], [0], [1], [0, 0, 1, 1], [], []>} : vector<2x32xbf16>, vector<32x128xbf16>, vector<2x128xf32> -> vector<2x128xf32>
    %106 = arith.addf %75, %105 : vector<2x128xf32>
    %107 = vector.extract_strided_slice %106 {offsets = [0, 0], sizes = [2, 32], strides = [1, 1]} : vector<2x128xf32> to vector<2x32xf32>
    %108 = arith.negf %107 : vector<2x32xf32>
    %109 = math.exp %108 : vector<2x32xf32>
    %cst_35 = arith.constant 1.000000e+00 : f32
    %110 = vector.broadcast %cst_35 : f32 to vector<2x32xf32>
    %111 = arith.addf %110, %109 : vector<2x32xf32>
    %112 = arith.divf %110, %111 : vector<2x32xf32>
    %113 = vector.extract_strided_slice %106 {offsets = [0, 32], sizes = [2, 32], strides = [1, 1]} : vector<2x128xf32> to vector<2x32xf32>
    %114 = arith.negf %113 : vector<2x32xf32>
    %115 = math.exp %114 : vector<2x32xf32>
    %cst_36 = arith.constant 1.000000e+00 : f32
    %116 = vector.broadcast %cst_36 : f32 to vector<2x32xf32>
    %117 = arith.addf %116, %115 : vector<2x32xf32>
    %118 = arith.divf %116, %117 : vector<2x32xf32>
    %119 = vector.extract_strided_slice %106 {offsets = [0, 64], sizes = [2, 32], strides = [1, 1]} : vector<2x128xf32> to vector<2x32xf32>
    %120 = math.tanh %119 : vector<2x32xf32>
    %121 = vector.extract_strided_slice %106 {offsets = [0, 96], sizes = [2, 32], strides = [1, 1]} : vector<2x128xf32> to vector<2x32xf32>
    %122 = arith.negf %121 : vector<2x32xf32>
    %123 = math.exp %122 : vector<2x32xf32>
    %cst_37 = arith.constant 1.000000e+00 : f32
    %124 = vector.broadcast %cst_37 : f32 to vector<2x32xf32>
    %125 = arith.addf %124, %123 : vector<2x32xf32>
    %126 = arith.divf %124, %125 : vector<2x32xf32>
    %127 = arith.mulf %118, %69 : vector<2x32xf32>
    %128 = arith.mulf %112, %120 : vector<2x32xf32>
    %129 = arith.addf %127, %128 : vector<2x32xf32>
    %130 = math.tanh %129 : vector<2x32xf32>
    %131 = arith.mulf %126, %130 : vector<2x32xf32>
    %c2_38 = arith.constant 2 : index
    %c0_39 = arith.constant 0 : index
    %132 = vector.load %arg6[%c2_38, %c0_39] : memref<16x64xf32, #tpu.memory_space<vmem>>, vector<2x32xf32>
    tpu.vector_store %arg6[%c2_38, %c0_39], %103 {strides = array<i32>} : memref<16x64xf32, #tpu.memory_space<vmem>>, vector<2x32xf32>,
    %c12_40 = arith.constant 12 : index
    %c32_41 = arith.constant 32 : index
    %133 = vector.load %arg6[%c12_40, %c32_41] : memref<16x64xf32, #tpu.memory_space<vmem>>, vector<2x32xf32>
    tpu.vector_store %arg6[%c12_40, %c32_41], %131 {strides = array<i32>} : memref<16x64xf32, #tpu.memory_space<vmem>>, vector<2x32xf32>,
    %c4 = arith.constant 4 : index
    %c0_42 = arith.constant 0 : index
    %134 = vector.load %arg7[%c4, %c0_42] : memref<16x256xf32, #tpu.memory_space<vmem>>, vector<2x128xf32>
    %c10 = arith.constant 10 : index
    %c128_43 = arith.constant 128 : index
    %135 = vector.load %arg7[%c10, %c128_43] : memref<16x256xf32, #tpu.memory_space<vmem>>, vector<2x128xf32>
    %136 = arith.truncf %103 : vector<2x32xf32> to vector<2x32xbf16>
    %cst_44 = arith.constant dense<0.000000e+00> : vector<2x128xf32>
    %137 = tpu.matmul %136, %8, %cst_44 {dimension_numbers = #tpu.dot_dimension_numbers<[1], [0], [0], [1], [0, 0, 1, 1], [], []>} : vector<2x32xbf16>, vector<32x128xbf16>, vector<2x128xf32> -> vector<2x128xf32>
    %138 = arith.addf %134, %137 : vector<2x128xf32>
    %139 = vector.extract_strided_slice %138 {offsets = [0, 0], sizes = [2, 32], strides = [1, 1]} : vector<2x128xf32> to vector<2x32xf32>
    %140 = arith.negf %139 : vector<2x32xf32>
    %141 = math.exp %140 : vector<2x32xf32>
    %cst_45 = arith.constant 1.000000e+00 : f32
    %142 = vector.broadcast %cst_45 : f32 to vector<2x32xf32>
    %143 = arith.addf %142, %141 : vector<2x32xf32>
    %144 = arith.divf %142, %143 : vector<2x32xf32>
    %145 = vector.extract_strided_slice %138 {offsets = [0, 32], sizes = [2, 32], strides = [1, 1]} : vector<2x128xf32> to vector<2x32xf32>
    %146 = arith.negf %145 : vector<2x32xf32>
    %147 = math.exp %146 : vector<2x32xf32>
    %cst_46 = arith.constant 1.000000e+00 : f32
    %148 = vector.broadcast %cst_46 : f32 to vector<2x32xf32>
    %149 = arith.addf %148, %147 : vector<2x32xf32>
    %150 = arith.divf %148, %149 : vector<2x32xf32>
    %151 = vector.extract_strided_slice %138 {offsets = [0, 64], sizes = [2, 32], strides = [1, 1]} : vector<2x128xf32> to vector<2x32xf32>
    %152 = math.tanh %151 : vector<2x32xf32>
    %153 = vector.extract_strided_slice %138 {offsets = [0, 96], sizes = [2, 32], strides = [1, 1]} : vector<2x128xf32> to vector<2x32xf32>
    %154 = arith.negf %153 : vector<2x32xf32>
    %155 = math.exp %154 : vector<2x32xf32>
    %cst_47 = arith.constant 1.000000e+00 : f32
    %156 = vector.broadcast %cst_47 : f32 to vector<2x32xf32>
    %157 = arith.addf %156, %155 : vector<2x32xf32>
    %158 = arith.divf %156, %157 : vector<2x32xf32>
    %159 = arith.mulf %150, %101 : vector<2x32xf32>
    %160 = arith.mulf %144, %152 : vector<2x32xf32>
    %161 = arith.addf %159, %160 : vector<2x32xf32>
    %162 = math.tanh %161 : vector<2x32xf32>
    %163 = arith.mulf %158, %162 : vector<2x32xf32>
    %164 = arith.truncf %131 : vector<2x32xf32> to vector<2x32xbf16>
    %cst_48 = arith.constant dense<0.000000e+00> : vector<2x128xf32>
    %165 = tpu.matmul %164, %9, %cst_48 {dimension_numbers = #tpu.dot_dimension_numbers<[1], [0], [0], [1], [0, 0, 1, 1], [], []>} : vector<2x32xbf16>, vector<32x128xbf16>, vector<2x128xf32> -> vector<2x128xf32>
    %166 = arith.addf %135, %165 : vector<2x128xf32>
    %167 = vector.extract_strided_slice %166 {offsets = [0, 0], sizes = [2, 32], strides = [1, 1]} : vector<2x128xf32> to vector<2x32xf32>
    %168 = arith.negf %167 : vector<2x32xf32>
    %169 = math.exp %168 : vector<2x32xf32>
    %cst_49 = arith.constant 1.000000e+00 : f32
    %170 = vector.broadcast %cst_49 : f32 to vector<2x32xf32>
    %171 = arith.addf %170, %169 : vector<2x32xf32>
    %172 = arith.divf %170, %171 : vector<2x32xf32>
    %173 = vector.extract_strided_slice %166 {offsets = [0, 32], sizes = [2, 32], strides = [1, 1]} : vector<2x128xf32> to vector<2x32xf32>
    %174 = arith.negf %173 : vector<2x32xf32>
    %175 = math.exp %174 : vector<2x32xf32>
    %cst_50 = arith.constant 1.000000e+00 : f32
    %176 = vector.broadcast %cst_50 : f32 to vector<2x32xf32>
    %177 = arith.addf %176, %175 : vector<2x32xf32>
    %178 = arith.divf %176, %177 : vector<2x32xf32>
    %179 = vector.extract_strided_slice %166 {offsets = [0, 64], sizes = [2, 32], strides = [1, 1]} : vector<2x128xf32> to vector<2x32xf32>
    %180 = math.tanh %179 : vector<2x32xf32>
    %181 = vector.extract_strided_slice %166 {offsets = [0, 96], sizes = [2, 32], strides = [1, 1]} : vector<2x128xf32> to vector<2x32xf32>
    %182 = arith.negf %181 : vector<2x32xf32>
    %183 = math.exp %182 : vector<2x32xf32>
    %cst_51 = arith.constant 1.000000e+00 : f32
    %184 = vector.broadcast %cst_51 : f32 to vector<2x32xf32>
    %185 = arith.addf %184, %183 : vector<2x32xf32>
    %186 = arith.divf %184, %185 : vector<2x32xf32>
    %187 = arith.mulf %178, %129 : vector<2x32xf32>
    %188 = arith.mulf %172, %180 : vector<2x32xf32>
    %189 = arith.addf %187, %188 : vector<2x32xf32>
    %190 = math.tanh %189 : vector<2x32xf32>
    %191 = arith.mulf %186, %190 : vector<2x32xf32>
    %c4_52 = arith.constant 4 : index
    %c0_53 = arith.constant 0 : index
    %192 = vector.load %arg6[%c4_52, %c0_53] : memref<16x64xf32, #tpu.memory_space<vmem>>, vector<2x32xf32>
    tpu.vector_store %arg6[%c4_52, %c0_53], %163 {strides = array<i32>} : memref<16x64xf32, #tpu.memory_space<vmem>>, vector<2x32xf32>,
    %c10_54 = arith.constant 10 : index
    %c32_55 = arith.constant 32 : index
    %193 = vector.load %arg6[%c10_54, %c32_55] : memref<16x64xf32, #tpu.memory_space<vmem>>, vector<2x32xf32>
    tpu.vector_store %arg6[%c10_54, %c32_55], %191 {strides = array<i32>} : memref<16x64xf32, #tpu.memory_space<vmem>>, vector<2x32xf32>,
    %c6 = arith.constant 6 : index
    %c0_56 = arith.constant 0 : index
    %194 = vector.load %arg7[%c6, %c0_56] : memref<16x256xf32, #tpu.memory_space<vmem>>, vector<2x128xf32>
    %c8 = arith.constant 8 : index
    %c128_57 = arith.constant 128 : index
    %195 = vector.load %arg7[%c8, %c128_57] : memref<16x256xf32, #tpu.memory_space<vmem>>, vector<2x128xf32>
    %196 = arith.truncf %163 : vector<2x32xf32> to vector<2x32xbf16>
    %cst_58 = arith.constant dense<0.000000e+00> : vector<2x128xf32>
    %197 = tpu.matmul %196, %8, %cst_58 {dimension_numbers = #tpu.dot_dimension_numbers<[1], [0], [0], [1], [0, 0, 1, 1], [], []>} : vector<2x32xbf16>, vector<32x128xbf16>, vector<2x128xf32> -> vector<2x128xf32>
    %198 = arith.addf %194, %197 : vector<2x128xf32>
    %199 = vector.extract_strided_slice %198 {offsets = [0, 0], sizes = [2, 32], strides = [1, 1]} : vector<2x128xf32> to vector<2x32xf32>
    %200 = arith.negf %199 : vector<2x32xf32>
    %201 = math.exp %200 : vector<2x32xf32>
    %cst_59 = arith.constant 1.000000e+00 : f32
    %202 = vector.broadcast %cst_59 : f32 to vector<2x32xf32>
    %203 = arith.addf %202, %201 : vector<2x32xf32>
    %204 = arith.divf %202, %203 : vector<2x32xf32>
    %205 = vector.extract_strided_slice %198 {offsets = [0, 32], sizes = [2, 32], strides = [1, 1]} : vector<2x128xf32> to vector<2x32xf32>
    %206 = arith.negf %205 : vector<2x32xf32>
    %207 = math.exp %206 : vector<2x32xf32>
    %cst_60 = arith.constant 1.000000e+00 : f32
    %208 = vector.broadcast %cst_60 : f32 to vector<2x32xf32>
    %209 = arith.addf %208, %207 : vector<2x32xf32>
    %210 = arith.divf %208, %209 : vector<2x32xf32>
    %211 = vector.extract_strided_slice %198 {offsets = [0, 64], sizes = [2, 32], strides = [1, 1]} : vector<2x128xf32> to vector<2x32xf32>
    %212 = math.tanh %211 : vector<2x32xf32>
    %213 = vector.extract_strided_slice %198 {offsets = [0, 96], sizes = [2, 32], strides = [1, 1]} : vector<2x128xf32> to vector<2x32xf32>
    %214 = arith.negf %213 : vector<2x32xf32>
    %215 = math.exp %214 : vector<2x32xf32>
    %cst_61 = arith.constant 1.000000e+00 : f32
    %216 = vector.broadcast %cst_61 : f32 to vector<2x32xf32>
    %217 = arith.addf %216, %215 : vector<2x32xf32>
    %218 = arith.divf %216, %217 : vector<2x32xf32>
    %219 = arith.mulf %210, %161 : vector<2x32xf32>
    %220 = arith.mulf %204, %212 : vector<2x32xf32>
    %221 = arith.addf %219, %220 : vector<2x32xf32>
    %222 = math.tanh %221 : vector<2x32xf32>
    %223 = arith.mulf %218, %222 : vector<2x32xf32>
    %224 = arith.truncf %191 : vector<2x32xf32> to vector<2x32xbf16>
    %cst_62 = arith.constant dense<0.000000e+00> : vector<2x128xf32>
    %225 = tpu.matmul %224, %9, %cst_62 {dimension_numbers = #tpu.dot_dimension_numbers<[1], [0], [0], [1], [0, 0, 1, 1], [], []>} : vector<2x32xbf16>, vector<32x128xbf16>, vector<2x128xf32> -> vector<2x128xf32>
    %226 = arith.addf %195, %225 : vector<2x128xf32>
    %227 = vector.extract_strided_slice %226 {offsets = [0, 0], sizes = [2, 32], strides = [1, 1]} : vector<2x128xf32> to vector<2x32xf32>
    %228 = arith.negf %227 : vector<2x32xf32>
    %229 = math.exp %228 : vector<2x32xf32>
    %cst_63 = arith.constant 1.000000e+00 : f32
    %230 = vector.broadcast %cst_63 : f32 to vector<2x32xf32>
    %231 = arith.addf %230, %229 : vector<2x32xf32>
    %232 = arith.divf %230, %231 : vector<2x32xf32>
    %233 = vector.extract_strided_slice %226 {offsets = [0, 32], sizes = [2, 32], strides = [1, 1]} : vector<2x128xf32> to vector<2x32xf32>
    %234 = arith.negf %233 : vector<2x32xf32>
    %235 = math.exp %234 : vector<2x32xf32>
    %cst_64 = arith.constant 1.000000e+00 : f32
    %236 = vector.broadcast %cst_64 : f32 to vector<2x32xf32>
    %237 = arith.addf %236, %235 : vector<2x32xf32>
    %238 = arith.divf %236, %237 : vector<2x32xf32>
    %239 = vector.extract_strided_slice %226 {offsets = [0, 64], sizes = [2, 32], strides = [1, 1]} : vector<2x128xf32> to vector<2x32xf32>
    %240 = math.tanh %239 : vector<2x32xf32>
    %241 = vector.extract_strided_slice %226 {offsets = [0, 96], sizes = [2, 32], strides = [1, 1]} : vector<2x128xf32> to vector<2x32xf32>
    %242 = arith.negf %241 : vector<2x32xf32>
    %243 = math.exp %242 : vector<2x32xf32>
    %cst_65 = arith.constant 1.000000e+00 : f32
    %244 = vector.broadcast %cst_65 : f32 to vector<2x32xf32>
    %245 = arith.addf %244, %243 : vector<2x32xf32>
    %246 = arith.divf %244, %245 : vector<2x32xf32>
    %247 = arith.mulf %238, %189 : vector<2x32xf32>
    %248 = arith.mulf %232, %240 : vector<2x32xf32>
    %249 = arith.addf %247, %248 : vector<2x32xf32>
    %250 = math.tanh %249 : vector<2x32xf32>
    %251 = arith.mulf %246, %250 : vector<2x32xf32>
    %c6_66 = arith.constant 6 : index
    %c0_67 = arith.constant 0 : index
    %252 = vector.load %arg6[%c6_66, %c0_67] : memref<16x64xf32, #tpu.memory_space<vmem>>, vector<2x32xf32>
    tpu.vector_store %arg6[%c6_66, %c0_67], %223 {strides = array<i32>} : memref<16x64xf32, #tpu.memory_space<vmem>>, vector<2x32xf32>,
    %c8_68 = arith.constant 8 : index
    %c32_69 = arith.constant 32 : index
    %253 = vector.load %arg6[%c8_68, %c32_69] : memref<16x64xf32, #tpu.memory_space<vmem>>, vector<2x32xf32>
    tpu.vector_store %arg6[%c8_68, %c32_69], %251 {strides = array<i32>} : memref<16x64xf32, #tpu.memory_space<vmem>>, vector<2x32xf32>,
    %c8_70 = arith.constant 8 : index
    %c0_71 = arith.constant 0 : index
    %254 = vector.load %arg7[%c8_70, %c0_71] : memref<16x256xf32, #tpu.memory_space<vmem>>, vector<2x128xf32>
    %c6_72 = arith.constant 6 : index
    %c128_73 = arith.constant 128 : index
    %255 = vector.load %arg7[%c6_72, %c128_73] : memref<16x256xf32, #tpu.memory_space<vmem>>, vector<2x128xf32>
    %256 = arith.truncf %223 : vector<2x32xf32> to vector<2x32xbf16>
    %cst_74 = arith.constant dense<0.000000e+00> : vector<2x128xf32>
    %257 = tpu.matmul %256, %8, %cst_74 {dimension_numbers = #tpu.dot_dimension_numbers<[1], [0], [0], [1], [0, 0, 1, 1], [], []>} : vector<2x32xbf16>, vector<32x128xbf16>, vector<2x128xf32> -> vector<2x128xf32>
    %258 = arith.addf %254, %257 : vector<2x128xf32>
    %259 = vector.extract_strided_slice %258 {offsets = [0, 0], sizes = [2, 32], strides = [1, 1]} : vector<2x128xf32> to vector<2x32xf32>
    %260 = arith.negf %259 : vector<2x32xf32>
    %261 = math.exp %260 : vector<2x32xf32>
    %cst_75 = arith.constant 1.000000e+00 : f32
    %262 = vector.broadcast %cst_75 : f32 to vector<2x32xf32>
    %263 = arith.addf %262, %261 : vector<2x32xf32>
    %264 = arith.divf %262, %263 : vector<2x32xf32>
    %265 = vector.extract_strided_slice %258 {offsets = [0, 32], sizes = [2, 32], strides = [1, 1]} : vector<2x128xf32> to vector<2x32xf32>
    %266 = arith.negf %265 : vector<2x32xf32>
    %267 = math.exp %266 : vector<2x32xf32>
    %cst_76 = arith.constant 1.000000e+00 : f32
    %268 = vector.broadcast %cst_76 : f32 to vector<2x32xf32>
    %269 = arith.addf %268, %267 : vector<2x32xf32>
    %270 = arith.divf %268, %269 : vector<2x32xf32>
    %271 = vector.extract_strided_slice %258 {offsets = [0, 64], sizes = [2, 32], strides = [1, 1]} : vector<2x128xf32> to vector<2x32xf32>
    %272 = math.tanh %271 : vector<2x32xf32>
    %273 = vector.extract_strided_slice %258 {offsets = [0, 96], sizes = [2, 32], strides = [1, 1]} : vector<2x128xf32> to vector<2x32xf32>
    %274 = arith.negf %273 : vector<2x32xf32>
    %275 = math.exp %274 : vector<2x32xf32>
    %cst_77 = arith.constant 1.000000e+00 : f32
    %276 = vector.broadcast %cst_77 : f32 to vector<2x32xf32>
    %277 = arith.addf %276, %275 : vector<2x32xf32>
    %278 = arith.divf %276, %277 : vector<2x32xf32>
    %279 = arith.mulf %270, %221 : vector<2x32xf32>
    %280 = arith.mulf %264, %272 : vector<2x32xf32>
    %281 = arith.addf %279, %280 : vector<2x32xf32>
    %282 = math.tanh %281 : vector<2x32xf32>
    %283 = arith.mulf %278, %282 : vector<2x32xf32>
    %284 = arith.truncf %251 : vector<2x32xf32> to vector<2x32xbf16>
    %cst_78 = arith.constant dense<0.000000e+00> : vector<2x128xf32>
    %285 = tpu.matmul %284, %9, %cst_78 {dimension_numbers = #tpu.dot_dimension_numbers<[1], [0], [0], [1], [0, 0, 1, 1], [], []>} : vector<2x32xbf16>, vector<32x128xbf16>, vector<2x128xf32> -> vector<2x128xf32>
    %286 = arith.addf %255, %285 : vector<2x128xf32>
    %287 = vector.extract_strided_slice %286 {offsets = [0, 0], sizes = [2, 32], strides = [1, 1]} : vector<2x128xf32> to vector<2x32xf32>
    %288 = arith.negf %287 : vector<2x32xf32>
    %289 = math.exp %288 : vector<2x32xf32>
    %cst_79 = arith.constant 1.000000e+00 : f32
    %290 = vector.broadcast %cst_79 : f32 to vector<2x32xf32>
    %291 = arith.addf %290, %289 : vector<2x32xf32>
    %292 = arith.divf %290, %291 : vector<2x32xf32>
    %293 = vector.extract_strided_slice %286 {offsets = [0, 32], sizes = [2, 32], strides = [1, 1]} : vector<2x128xf32> to vector<2x32xf32>
    %294 = arith.negf %293 : vector<2x32xf32>
    %295 = math.exp %294 : vector<2x32xf32>
    %cst_80 = arith.constant 1.000000e+00 : f32
    %296 = vector.broadcast %cst_80 : f32 to vector<2x32xf32>
    %297 = arith.addf %296, %295 : vector<2x32xf32>
    %298 = arith.divf %296, %297 : vector<2x32xf32>
    %299 = vector.extract_strided_slice %286 {offsets = [0, 64], sizes = [2, 32], strides = [1, 1]} : vector<2x128xf32> to vector<2x32xf32>
    %300 = math.tanh %299 : vector<2x32xf32>
    %301 = vector.extract_strided_slice %286 {offsets = [0, 96], sizes = [2, 32], strides = [1, 1]} : vector<2x128xf32> to vector<2x32xf32>
    %302 = arith.negf %301 : vector<2x32xf32>
    %303 = math.exp %302 : vector<2x32xf32>
    %cst_81 = arith.constant 1.000000e+00 : f32
    %304 = vector.broadcast %cst_81 : f32 to vector<2x32xf32>
    %305 = arith.addf %304, %303 : vector<2x32xf32>
    %306 = arith.divf %304, %305 : vector<2x32xf32>
    %307 = arith.mulf %298, %249 : vector<2x32xf32>
    %308 = arith.mulf %292, %300 : vector<2x32xf32>
    %309 = arith.addf %307, %308 : vector<2x32xf32>
    %310 = math.tanh %309 : vector<2x32xf32>
    %311 = arith.mulf %306, %310 : vector<2x32xf32>
    %c8_82 = arith.constant 8 : index
    %c0_83 = arith.constant 0 : index
    %312 = vector.load %arg6[%c8_82, %c0_83] : memref<16x64xf32, #tpu.memory_space<vmem>>, vector<2x32xf32>
    tpu.vector_store %arg6[%c8_82, %c0_83], %283 {strides = array<i32>} : memref<16x64xf32, #tpu.memory_space<vmem>>, vector<2x32xf32>,
    %c6_84 = arith.constant 6 : index
    %c32_85 = arith.constant 32 : index
    %313 = vector.load %arg6[%c6_84, %c32_85] : memref<16x64xf32, #tpu.memory_space<vmem>>, vector<2x32xf32>
    tpu.vector_store %arg6[%c6_84, %c32_85], %311 {strides = array<i32>} : memref<16x64xf32, #tpu.memory_space<vmem>>, vector<2x32xf32>,
    %c10_86 = arith.constant 10 : index
    %c0_87 = arith.constant 0 : index
    %314 = vector.load %arg7[%c10_86, %c0_87] : memref<16x256xf32, #tpu.memory_space<vmem>>, vector<2x128xf32>
    %c4_88 = arith.constant 4 : index
    %c128_89 = arith.constant 128 : index
    %315 = vector.load %arg7[%c4_88, %c128_89] : memref<16x256xf32, #tpu.memory_space<vmem>>, vector<2x128xf32>
    %316 = arith.truncf %283 : vector<2x32xf32> to vector<2x32xbf16>
    %cst_90 = arith.constant dense<0.000000e+00> : vector<2x128xf32>
    %317 = tpu.matmul %316, %8, %cst_90 {dimension_numbers = #tpu.dot_dimension_numbers<[1], [0], [0], [1], [0, 0, 1, 1], [], []>} : vector<2x32xbf16>, vector<32x128xbf16>, vector<2x128xf32> -> vector<2x128xf32>
    %318 = arith.addf %314, %317 : vector<2x128xf32>
    %319 = vector.extract_strided_slice %318 {offsets = [0, 0], sizes = [2, 32], strides = [1, 1]} : vector<2x128xf32> to vector<2x32xf32>
    %320 = arith.negf %319 : vector<2x32xf32>
    %321 = math.exp %320 : vector<2x32xf32>
    %cst_91 = arith.constant 1.000000e+00 : f32
    %322 = vector.broadcast %cst_91 : f32 to vector<2x32xf32>
    %323 = arith.addf %322, %321 : vector<2x32xf32>
    %324 = arith.divf %322, %323 : vector<2x32xf32>
    %325 = vector.extract_strided_slice %318 {offsets = [0, 32], sizes = [2, 32], strides = [1, 1]} : vector<2x128xf32> to vector<2x32xf32>
    %326 = arith.negf %325 : vector<2x32xf32>
    %327 = math.exp %326 : vector<2x32xf32>
    %cst_92 = arith.constant 1.000000e+00 : f32
    %328 = vector.broadcast %cst_92 : f32 to vector<2x32xf32>
    %329 = arith.addf %328, %327 : vector<2x32xf32>
    %330 = arith.divf %328, %329 : vector<2x32xf32>
    %331 = vector.extract_strided_slice %318 {offsets = [0, 64], sizes = [2, 32], strides = [1, 1]} : vector<2x128xf32> to vector<2x32xf32>
    %332 = math.tanh %331 : vector<2x32xf32>
    %333 = vector.extract_strided_slice %318 {offsets = [0, 96], sizes = [2, 32], strides = [1, 1]} : vector<2x128xf32> to vector<2x32xf32>
    %334 = arith.negf %333 : vector<2x32xf32>
    %335 = math.exp %334 : vector<2x32xf32>
    %cst_93 = arith.constant 1.000000e+00 : f32
    %336 = vector.broadcast %cst_93 : f32 to vector<2x32xf32>
    %337 = arith.addf %336, %335 : vector<2x32xf32>
    %338 = arith.divf %336, %337 : vector<2x32xf32>
    %339 = arith.mulf %330, %281 : vector<2x32xf32>
    %340 = arith.mulf %324, %332 : vector<2x32xf32>
    %341 = arith.addf %339, %340 : vector<2x32xf32>
    %342 = math.tanh %341 : vector<2x32xf32>
    %343 = arith.mulf %338, %342 : vector<2x32xf32>
    %344 = arith.truncf %311 : vector<2x32xf32> to vector<2x32xbf16>
    %cst_94 = arith.constant dense<0.000000e+00> : vector<2x128xf32>
    %345 = tpu.matmul %344, %9, %cst_94 {dimension_numbers = #tpu.dot_dimension_numbers<[1], [0], [0], [1], [0, 0, 1, 1], [], []>} : vector<2x32xbf16>, vector<32x128xbf16>, vector<2x128xf32> -> vector<2x128xf32>
    %346 = arith.addf %315, %345 : vector<2x128xf32>
    %347 = vector.extract_strided_slice %346 {offsets = [0, 0], sizes = [2, 32], strides = [1, 1]} : vector<2x128xf32> to vector<2x32xf32>
    %348 = arith.negf %347 : vector<2x32xf32>
    %349 = math.exp %348 : vector<2x32xf32>
    %cst_95 = arith.constant 1.000000e+00 : f32
    %350 = vector.broadcast %cst_95 : f32 to vector<2x32xf32>
    %351 = arith.addf %350, %349 : vector<2x32xf32>
    %352 = arith.divf %350, %351 : vector<2x32xf32>
    %353 = vector.extract_strided_slice %346 {offsets = [0, 32], sizes = [2, 32], strides = [1, 1]} : vector<2x128xf32> to vector<2x32xf32>
    %354 = arith.negf %353 : vector<2x32xf32>
    %355 = math.exp %354 : vector<2x32xf32>
    %cst_96 = arith.constant 1.000000e+00 : f32
    %356 = vector.broadcast %cst_96 : f32 to vector<2x32xf32>
    %357 = arith.addf %356, %355 : vector<2x32xf32>
    %358 = arith.divf %356, %357 : vector<2x32xf32>
    %359 = vector.extract_strided_slice %346 {offsets = [0, 64], sizes = [2, 32], strides = [1, 1]} : vector<2x128xf32> to vector<2x32xf32>
    %360 = math.tanh %359 : vector<2x32xf32>
    %361 = vector.extract_strided_slice %346 {offsets = [0, 96], sizes = [2, 32], strides = [1, 1]} : vector<2x128xf32> to vector<2x32xf32>
    %362 = arith.negf %361 : vector<2x32xf32>
    %363 = math.exp %362 : vector<2x32xf32>
    %cst_97 = arith.constant 1.000000e+00 : f32
    %364 = vector.broadcast %cst_97 : f32 to vector<2x32xf32>
    %365 = arith.addf %364, %363 : vector<2x32xf32>
    %366 = arith.divf %364, %365 : vector<2x32xf32>
    %367 = arith.mulf %358, %309 : vector<2x32xf32>
    %368 = arith.mulf %352, %360 : vector<2x32xf32>
    %369 = arith.addf %367, %368 : vector<2x32xf32>
    %370 = math.tanh %369 : vector<2x32xf32>
    %371 = arith.mulf %366, %370 : vector<2x32xf32>
    %c10_98 = arith.constant 10 : index
    %c0_99 = arith.constant 0 : index
    %372 = vector.load %arg6[%c10_98, %c0_99] : memref<16x64xf32, #tpu.memory_space<vmem>>, vector<2x32xf32>
    tpu.vector_store %arg6[%c10_98, %c0_99], %343 {strides = array<i32>} : memref<16x64xf32, #tpu.memory_space<vmem>>, vector<2x32xf32>,
    %c4_100 = arith.constant 4 : index
    %c32_101 = arith.constant 32 : index
    %373 = vector.load %arg6[%c4_100, %c32_101] : memref<16x64xf32, #tpu.memory_space<vmem>>, vector<2x32xf32>
    tpu.vector_store %arg6[%c4_100, %c32_101], %371 {strides = array<i32>} : memref<16x64xf32, #tpu.memory_space<vmem>>, vector<2x32xf32>,
    %c12_102 = arith.constant 12 : index
    %c0_103 = arith.constant 0 : index
    %374 = vector.load %arg7[%c12_102, %c0_103] : memref<16x256xf32, #tpu.memory_space<vmem>>, vector<2x128xf32>
    %c2_104 = arith.constant 2 : index
    %c128_105 = arith.constant 128 : index
    %375 = vector.load %arg7[%c2_104, %c128_105] : memref<16x256xf32, #tpu.memory_space<vmem>>, vector<2x128xf32>
    %376 = arith.truncf %343 : vector<2x32xf32> to vector<2x32xbf16>
    %cst_106 = arith.constant dense<0.000000e+00> : vector<2x128xf32>
    %377 = tpu.matmul %376, %8, %cst_106 {dimension_numbers = #tpu.dot_dimension_numbers<[1], [0], [0], [1], [0, 0, 1, 1], [], []>} : vector<2x32xbf16>, vector<32x128xbf16>, vector<2x128xf32> -> vector<2x128xf32>
    %378 = arith.addf %374, %377 : vector<2x128xf32>
    %379 = vector.extract_strided_slice %378 {offsets = [0, 0], sizes = [2, 32], strides = [1, 1]} : vector<2x128xf32> to vector<2x32xf32>
    %380 = arith.negf %379 : vector<2x32xf32>
    %381 = math.exp %380 : vector<2x32xf32>
    %cst_107 = arith.constant 1.000000e+00 : f32
    %382 = vector.broadcast %cst_107 : f32 to vector<2x32xf32>
    %383 = arith.addf %382, %381 : vector<2x32xf32>
    %384 = arith.divf %382, %383 : vector<2x32xf32>
    %385 = vector.extract_strided_slice %378 {offsets = [0, 32], sizes = [2, 32], strides = [1, 1]} : vector<2x128xf32> to vector<2x32xf32>
    %386 = arith.negf %385 : vector<2x32xf32>
    %387 = math.exp %386 : vector<2x32xf32>
    %cst_108 = arith.constant 1.000000e+00 : f32
    %388 = vector.broadcast %cst_108 : f32 to vector<2x32xf32>
    %389 = arith.addf %388, %387 : vector<2x32xf32>
    %390 = arith.divf %388, %389 : vector<2x32xf32>
    %391 = vector.extract_strided_slice %378 {offsets = [0, 64], sizes = [2, 32], strides = [1, 1]} : vector<2x128xf32> to vector<2x32xf32>
    %392 = math.tanh %391 : vector<2x32xf32>
    %393 = vector.extract_strided_slice %378 {offsets = [0, 96], sizes = [2, 32], strides = [1, 1]} : vector<2x128xf32> to vector<2x32xf32>
    %394 = arith.negf %393 : vector<2x32xf32>
    %395 = math.exp %394 : vector<2x32xf32>
    %cst_109 = arith.constant 1.000000e+00 : f32
    %396 = vector.broadcast %cst_109 : f32 to vector<2x32xf32>
    %397 = arith.addf %396, %395 : vector<2x32xf32>
    %398 = arith.divf %396, %397 : vector<2x32xf32>
    %399 = arith.mulf %390, %341 : vector<2x32xf32>
    %400 = arith.mulf %384, %392 : vector<2x32xf32>
    %401 = arith.addf %399, %400 : vector<2x32xf32>
    %402 = math.tanh %401 : vector<2x32xf32>
    %403 = arith.mulf %398, %402 : vector<2x32xf32>
    %404 = arith.truncf %371 : vector<2x32xf32> to vector<2x32xbf16>
    %cst_110 = arith.constant dense<0.000000e+00> : vector<2x128xf32>
    %405 = tpu.matmul %404, %9, %cst_110 {dimension_numbers = #tpu.dot_dimension_numbers<[1], [0], [0], [1], [0, 0, 1, 1], [], []>} : vector<2x32xbf16>, vector<32x128xbf16>, vector<2x128xf32> -> vector<2x128xf32>
    %406 = arith.addf %375, %405 : vector<2x128xf32>
    %407 = vector.extract_strided_slice %406 {offsets = [0, 0], sizes = [2, 32], strides = [1, 1]} : vector<2x128xf32> to vector<2x32xf32>
    %408 = arith.negf %407 : vector<2x32xf32>
    %409 = math.exp %408 : vector<2x32xf32>
    %cst_111 = arith.constant 1.000000e+00 : f32
    %410 = vector.broadcast %cst_111 : f32 to vector<2x32xf32>
    %411 = arith.addf %410, %409 : vector<2x32xf32>
    %412 = arith.divf %410, %411 : vector<2x32xf32>
    %413 = vector.extract_strided_slice %406 {offsets = [0, 32], sizes = [2, 32], strides = [1, 1]} : vector<2x128xf32> to vector<2x32xf32>
    %414 = arith.negf %413 : vector<2x32xf32>
    %415 = math.exp %414 : vector<2x32xf32>
    %cst_112 = arith.constant 1.000000e+00 : f32
    %416 = vector.broadcast %cst_112 : f32 to vector<2x32xf32>
    %417 = arith.addf %416, %415 : vector<2x32xf32>
    %418 = arith.divf %416, %417 : vector<2x32xf32>
    %419 = vector.extract_strided_slice %406 {offsets = [0, 64], sizes = [2, 32], strides = [1, 1]} : vector<2x128xf32> to vector<2x32xf32>
    %420 = math.tanh %419 : vector<2x32xf32>
    %421 = vector.extract_strided_slice %406 {offsets = [0, 96], sizes = [2, 32], strides = [1, 1]} : vector<2x128xf32> to vector<2x32xf32>
    %422 = arith.negf %421 : vector<2x32xf32>
    %423 = math.exp %422 : vector<2x32xf32>
    %cst_113 = arith.constant 1.000000e+00 : f32
    %424 = vector.broadcast %cst_113 : f32 to vector<2x32xf32>
    %425 = arith.addf %424, %423 : vector<2x32xf32>
    %426 = arith.divf %424, %425 : vector<2x32xf32>
    %427 = arith.mulf %418, %369 : vector<2x32xf32>
    %428 = arith.mulf %412, %420 : vector<2x32xf32>
    %429 = arith.addf %427, %428 : vector<2x32xf32>
    %430 = math.tanh %429 : vector<2x32xf32>
    %431 = arith.mulf %426, %430 : vector<2x32xf32>
    %c12_114 = arith.constant 12 : index
    %c0_115 = arith.constant 0 : index
    %432 = vector.load %arg6[%c12_114, %c0_115] : memref<16x64xf32, #tpu.memory_space<vmem>>, vector<2x32xf32>
    tpu.vector_store %arg6[%c12_114, %c0_115], %403 {strides = array<i32>} : memref<16x64xf32, #tpu.memory_space<vmem>>, vector<2x32xf32>,
    %c2_116 = arith.constant 2 : index
    %c32_117 = arith.constant 32 : index
    %433 = vector.load %arg6[%c2_116, %c32_117] : memref<16x64xf32, #tpu.memory_space<vmem>>, vector<2x32xf32>
    tpu.vector_store %arg6[%c2_116, %c32_117], %431 {strides = array<i32>} : memref<16x64xf32, #tpu.memory_space<vmem>>, vector<2x32xf32>,
    %c14_118 = arith.constant 14 : index
    %c0_119 = arith.constant 0 : index
    %434 = vector.load %arg7[%c14_118, %c0_119] : memref<16x256xf32, #tpu.memory_space<vmem>>, vector<2x128xf32>
    %c0_120 = arith.constant 0 : index
    %c128_121 = arith.constant 128 : index
    %435 = vector.load %arg7[%c0_120, %c128_121] : memref<16x256xf32, #tpu.memory_space<vmem>>, vector<2x128xf32>
    %436 = arith.truncf %403 : vector<2x32xf32> to vector<2x32xbf16>
    %cst_122 = arith.constant dense<0.000000e+00> : vector<2x128xf32>
    %437 = tpu.matmul %436, %8, %cst_122 {dimension_numbers = #tpu.dot_dimension_numbers<[1], [0], [0], [1], [0, 0, 1, 1], [], []>} : vector<2x32xbf16>, vector<32x128xbf16>, vector<2x128xf32> -> vector<2x128xf32>
    %438 = arith.addf %434, %437 : vector<2x128xf32>
    %439 = vector.extract_strided_slice %438 {offsets = [0, 0], sizes = [2, 32], strides = [1, 1]} : vector<2x128xf32> to vector<2x32xf32>
    %440 = arith.negf %439 : vector<2x32xf32>
    %441 = math.exp %440 : vector<2x32xf32>
    %cst_123 = arith.constant 1.000000e+00 : f32
    %442 = vector.broadcast %cst_123 : f32 to vector<2x32xf32>
    %443 = arith.addf %442, %441 : vector<2x32xf32>
    %444 = arith.divf %442, %443 : vector<2x32xf32>
    %445 = vector.extract_strided_slice %438 {offsets = [0, 32], sizes = [2, 32], strides = [1, 1]} : vector<2x128xf32> to vector<2x32xf32>
    %446 = arith.negf %445 : vector<2x32xf32>
    %447 = math.exp %446 : vector<2x32xf32>
    %cst_124 = arith.constant 1.000000e+00 : f32
    %448 = vector.broadcast %cst_124 : f32 to vector<2x32xf32>
    %449 = arith.addf %448, %447 : vector<2x32xf32>
    %450 = arith.divf %448, %449 : vector<2x32xf32>
    %451 = vector.extract_strided_slice %438 {offsets = [0, 64], sizes = [2, 32], strides = [1, 1]} : vector<2x128xf32> to vector<2x32xf32>
    %452 = math.tanh %451 : vector<2x32xf32>
    %453 = vector.extract_strided_slice %438 {offsets = [0, 96], sizes = [2, 32], strides = [1, 1]} : vector<2x128xf32> to vector<2x32xf32>
    %454 = arith.negf %453 : vector<2x32xf32>
    %455 = math.exp %454 : vector<2x32xf32>
    %cst_125 = arith.constant 1.000000e+00 : f32
    %456 = vector.broadcast %cst_125 : f32 to vector<2x32xf32>
    %457 = arith.addf %456, %455 : vector<2x32xf32>
    %458 = arith.divf %456, %457 : vector<2x32xf32>
    %459 = arith.mulf %450, %401 : vector<2x32xf32>
    %460 = arith.mulf %444, %452 : vector<2x32xf32>
    %461 = arith.addf %459, %460 : vector<2x32xf32>
    %462 = math.tanh %461 : vector<2x32xf32>
    %463 = arith.mulf %458, %462 : vector<2x32xf32>
    %464 = arith.truncf %431 : vector<2x32xf32> to vector<2x32xbf16>
    %cst_126 = arith.constant dense<0.000000e+00> : vector<2x128xf32>
    %465 = tpu.matmul %464, %9, %cst_126 {dimension_numbers = #tpu.dot_dimension_numbers<[1], [0], [0], [1], [0, 0, 1, 1], [], []>} : vector<2x32xbf16>, vector<32x128xbf16>, vector<2x128xf32> -> vector<2x128xf32>
    %466 = arith.addf %435, %465 : vector<2x128xf32>
    %467 = vector.extract_strided_slice %466 {offsets = [0, 0], sizes = [2, 32], strides = [1, 1]} : vector<2x128xf32> to vector<2x32xf32>
    %468 = arith.negf %467 : vector<2x32xf32>
    %469 = math.exp %468 : vector<2x32xf32>
    %cst_127 = arith.constant 1.000000e+00 : f32
    %470 = vector.broadcast %cst_127 : f32 to vector<2x32xf32>
    %471 = arith.addf %470, %469 : vector<2x32xf32>
    %472 = arith.divf %470, %471 : vector<2x32xf32>
    %473 = vector.extract_strided_slice %466 {offsets = [0, 32], sizes = [2, 32], strides = [1, 1]} : vector<2x128xf32> to vector<2x32xf32>
    %474 = arith.negf %473 : vector<2x32xf32>
    %475 = math.exp %474 : vector<2x32xf32>
    %cst_128 = arith.constant 1.000000e+00 : f32
    %476 = vector.broadcast %cst_128 : f32 to vector<2x32xf32>
    %477 = arith.addf %476, %475 : vector<2x32xf32>
    %478 = arith.divf %476, %477 : vector<2x32xf32>
    %479 = vector.extract_strided_slice %466 {offsets = [0, 64], sizes = [2, 32], strides = [1, 1]} : vector<2x128xf32> to vector<2x32xf32>
    %480 = math.tanh %479 : vector<2x32xf32>
    %481 = vector.extract_strided_slice %466 {offsets = [0, 96], sizes = [2, 32], strides = [1, 1]} : vector<2x128xf32> to vector<2x32xf32>
    %482 = arith.negf %481 : vector<2x32xf32>
    %483 = math.exp %482 : vector<2x32xf32>
    %cst_129 = arith.constant 1.000000e+00 : f32
    %484 = vector.broadcast %cst_129 : f32 to vector<2x32xf32>
    %485 = arith.addf %484, %483 : vector<2x32xf32>
    %486 = arith.divf %484, %485 : vector<2x32xf32>
    %487 = arith.mulf %478, %429 : vector<2x32xf32>
    %488 = arith.mulf %472, %480 : vector<2x32xf32>
    %489 = arith.addf %487, %488 : vector<2x32xf32>
    %490 = math.tanh %489 : vector<2x32xf32>
    %491 = arith.mulf %486, %490 : vector<2x32xf32>
    %c14_130 = arith.constant 14 : index
    %c0_131 = arith.constant 0 : index
    %492 = vector.load %arg6[%c14_130, %c0_131] : memref<16x64xf32, #tpu.memory_space<vmem>>, vector<2x32xf32>
    tpu.vector_store %arg6[%c14_130, %c0_131], %463 {strides = array<i32>} : memref<16x64xf32, #tpu.memory_space<vmem>>, vector<2x32xf32>,
    %c0_132 = arith.constant 0 : index
    %c32_133 = arith.constant 32 : index
    %493 = vector.load %arg6[%c0_132, %c32_133] : memref<16x64xf32, #tpu.memory_space<vmem>>, vector<2x32xf32>
    tpu.vector_store %arg6[%c0_132, %c32_133], %491 {strides = array<i32>} : memref<16x64xf32, #tpu.memory_space<vmem>>, vector<2x32xf32>,
    return
  }
  func.func @transform_0(%arg0: i32) -> (i32, i32) {
    %c0_i32 = arith.constant 0 : i32
    %c0_i32_0 = arith.constant 0 : i32
    %c0_i32_1 = arith.constant 0 : i32
    return %c0_i32, %c0_i32_0 : i32, i32
  }
  func.func @transform_1(%arg0: i32) -> (i32, i32) {
    %c0_i32 = arith.constant 0 : i32
    %c0_i32_0 = arith.constant 0 : i32
    %c0_i32_1 = arith.constant 0 : i32
    return %c0_i32, %c0_i32_0 : i32, i32
  }
  func.func @transform_2(%arg0: i32) -> (i32, i32) {
    %c0_i32 = arith.constant 0 : i32
    %c0_i32_0 = arith.constant 0 : i32
    %c0_i32_1 = arith.constant 0 : i32
    return %c0_i32, %c0_i32_0 : i32, i32
  }
  func.func @transform_3(%arg0: i32) -> (i32, i32) {
    %c0_i32 = arith.constant 0 : i32
    %c0_i32_0 = arith.constant 0 : i32
    %c0_i32_1 = arith.constant 0 : i32
    return %c0_i32, %c0_i32_0 : i32, i32
  }
  func.func @transform_4(%arg0: i32) -> (i32, i32) {
    %c0_i32 = arith.constant 0 : i32
    %c0_i32_0 = arith.constant 0 : i32
    %c0_i32_1 = arith.constant 0 : i32
    return %c0_i32, %c0_i32_0 : i32, i32
  }
  func.func @transform_5(%arg0: i32) -> (i32, i32) {
    %c0_i32 = arith.constant 0 : i32
    %c0_i32_0 = arith.constant 0 : i32
    %c0_i32_1 = arith.constant 0 : i32
    return %c0_i32, %c0_i32_0 : i32, i32
  }
}

module attributes {stable_mosaic.version = 11 : i64} {
  func.func @_bilstm_layer_kernel(%arg0: i32, %arg1: memref<16x64xf32, #tpu.memory_space<vmem>>, %arg2: memref<64x256xbf16, #tpu.memory_space<vmem>>, %arg3: memref<32x128xbf16, #tpu.memory_space<vmem>>, %arg4: memref<32x128xbf16, #tpu.memory_space<vmem>>, %arg5: memref<1x256xf32, #tpu.memory_space<vmem>>, %arg6: memref<16x64xf32, #tpu.memory_space<vmem>>, %arg7: memref<16x256xf32, #tpu.memory_space<vmem>>) attributes {dimension_semantics = [#tpu.dimension_semantics<arbitrary>], iteration_bounds = array<i64: 1>, scalar_prefetch = 0 : i64, scratch_operands = 1 : i64, tpu.core_type = #tpu.core_type<tc>, window_params = [{pipeline_mode = #tpu.pipeline_mode<synchronous>, transform_indices = @transform_0, window_bounds = array<i64: 16, 64>}, {pipeline_mode = #tpu.pipeline_mode<synchronous>, transform_indices = @transform_1, window_bounds = array<i64: 64, 256>}, {pipeline_mode = #tpu.pipeline_mode<synchronous>, transform_indices = @transform_2, window_bounds = array<i64: 32, 128>}, {pipeline_mode = #tpu.pipeline_mode<synchronous>, transform_indices = @transform_3, window_bounds = array<i64: 32, 128>}, {pipeline_mode = #tpu.pipeline_mode<synchronous>, transform_indices = @transform_4, window_bounds = array<i64: 1, 256>}, {pipeline_mode = #tpu.pipeline_mode<synchronous>, transform_indices = @transform_5, window_bounds = array<i64: 16, 64>}]} {
    %c0 = arith.constant 0 : index
    %c0_0 = arith.constant 0 : index
    %0 = vector.load %arg1[%c0, %c0_0] : memref<16x64xf32, #tpu.memory_space<vmem>>, vector<16x64xf32>
    %1 = arith.truncf %0 : vector<16x64xf32> to vector<16x64xbf16>
    %c0_1 = arith.constant 0 : index
    %c0_2 = arith.constant 0 : index
    %2 = vector.load %arg2[%c0_1, %c0_2] : memref<64x256xbf16, #tpu.memory_space<vmem>>, vector<64x256xbf16>
    %cst = arith.constant dense<0.000000e+00> : vector<16x256xf32>
    %3 = tpu.matmul %1, %2, %cst {dimension_numbers = #tpu.dot_dimension_numbers<[1], [0], [0], [1], [0, 0, 1, 1], [], []>} : vector<16x64xbf16>, vector<64x256xbf16>, vector<16x256xf32> -> vector<16x256xf32>
    %c0_3 = arith.constant 0 : index
    %c0_4 = arith.constant 0 : index
    %4 = vector.load %arg5[%c0_3, %c0_4] : memref<1x256xf32, #tpu.memory_space<vmem>>, vector<1x256xf32>
    %5 = vector.broadcast %4 : vector<1x256xf32> to vector<16x256xf32>
    %6 = arith.addf %3, %5 : vector<16x256xf32>
    %c0_5 = arith.constant 0 : index
    %c0_6 = arith.constant 0 : index
    %7 = vector.load %arg7[%c0_5, %c0_6] : memref<16x256xf32, #tpu.memory_space<vmem>>, vector<16x256xf32>
    tpu.vector_store %arg7[%c0_5, %c0_6], %6 {strides = array<i32>} : memref<16x256xf32, #tpu.memory_space<vmem>>, vector<16x256xf32>,
    %c0_7 = arith.constant 0 : index
    %c0_8 = arith.constant 0 : index
    %8 = vector.load %arg3[%c0_7, %c0_8] : memref<32x128xbf16, #tpu.memory_space<vmem>>, vector<32x128xbf16>
    %c0_9 = arith.constant 0 : index
    %c0_10 = arith.constant 0 : index
    %9 = vector.load %arg4[%c0_9, %c0_10] : memref<32x128xbf16, #tpu.memory_space<vmem>>, vector<32x128xbf16>
    %cst_11 = arith.constant 0.000000e+00 : f32
    %10 = vector.broadcast %cst_11 : f32 to vector<2x32xf32>
    %cst_12 = arith.constant 0.000000e+00 : f32
    %11 = vector.broadcast %cst_12 : f32 to vector<2x32xf32>
    %cst_13 = arith.constant 0.000000e+00 : f32
    %12 = vector.broadcast %cst_13 : f32 to vector<2x32xf32>
    %cst_14 = arith.constant 0.000000e+00 : f32
    %13 = vector.broadcast %cst_14 : f32 to vector<2x32xf32>
    %c0_15 = arith.constant 0 : index
    %c0_16 = arith.constant 0 : index
    %14 = vector.load %arg7[%c0_15, %c0_16] : memref<16x256xf32, #tpu.memory_space<vmem>>, vector<2x128xf32>
    %c14 = arith.constant 14 : index
    %c128 = arith.constant 128 : index
    %15 = vector.load %arg7[%c14, %c128] : memref<16x256xf32, #tpu.memory_space<vmem>>, vector<2x128xf32>
    %16 = arith.truncf %10 : vector<2x32xf32> to vector<2x32xbf16>
    %cst_17 = arith.constant dense<0.000000e+00> : vector<2x128xf32>
    %17 = tpu.matmul %16, %8, %cst_17 {dimension_numbers = #tpu.dot_dimension_numbers<[1], [0], [0], [1], [0, 0, 1, 1], [], []>} : vector<2x32xbf16>, vector<32x128xbf16>, vector<2x128xf32> -> vector<2x128xf32>
    %18 = arith.addf %14, %17 : vector<2x128xf32>
    %19 = vector.extract_strided_slice %18 {offsets = [0, 0], sizes = [2, 32], strides = [1, 1]} : vector<2x128xf32> to vector<2x32xf32>
    %20 = arith.negf %19 : vector<2x32xf32>
    %21 = math.exp %20 : vector<2x32xf32>
    %cst_18 = arith.constant 1.000000e+00 : f32
    %22 = vector.broadcast %cst_18 : f32 to vector<2x32xf32>
    %23 = arith.addf %22, %21 : vector<2x32xf32>
    %24 = arith.divf %22, %23 : vector<2x32xf32>
    %25 = vector.extract_strided_slice %18 {offsets = [0, 32], sizes = [2, 32], strides = [1, 1]} : vector<2x128xf32> to vector<2x32xf32>
    %26 = arith.negf %25 : vector<2x32xf32>
    %27 = math.exp %26 : vector<2x32xf32>
    %cst_19 = arith.constant 1.000000e+00 : f32
    %28 = vector.broadcast %cst_19 : f32 to vector<2x32xf32>
    %29 = arith.addf %28, %27 : vector<2x32xf32>
    %30 = arith.divf %28, %29 : vector<2x32xf32>
    %31 = vector.extract_strided_slice %18 {offsets = [0, 64], sizes = [2, 32], strides = [1, 1]} : vector<2x128xf32> to vector<2x32xf32>
    %32 = math.tanh %31 : vector<2x32xf32>
    %33 = vector.extract_strided_slice %18 {offsets = [0, 96], sizes = [2, 32], strides = [1, 1]} : vector<2x128xf32> to vector<2x32xf32>
    %34 = arith.negf %33 : vector<2x32xf32>
    %35 = math.exp %34 : vector<2x32xf32>
    %cst_20 = arith.constant 1.000000e+00 : f32
    %36 = vector.broadcast %cst_20 : f32 to vector<2x32xf32>
    %37 = arith.addf %36, %35 : vector<2x32xf32>
    %38 = arith.divf %36, %37 : vector<2x32xf32>
    %39 = arith.mulf %30, %11 : vector<2x32xf32>
    %40 = arith.mulf %24, %32 : vector<2x32xf32>
    %41 = arith.addf %39, %40 : vector<2x32xf32>
    %42 = math.tanh %41 : vector<2x32xf32>
    %43 = arith.mulf %38, %42 : vector<2x32xf32>
    %44 = arith.truncf %12 : vector<2x32xf32> to vector<2x32xbf16>
    %cst_21 = arith.constant dense<0.000000e+00> : vector<2x128xf32>
    %45 = tpu.matmul %44, %9, %cst_21 {dimension_numbers = #tpu.dot_dimension_numbers<[1], [0], [0], [1], [0, 0, 1, 1], [], []>} : vector<2x32xbf16>, vector<32x128xbf16>, vector<2x128xf32> -> vector<2x128xf32>
    %46 = arith.addf %15, %45 : vector<2x128xf32>
    %47 = vector.extract_strided_slice %46 {offsets = [0, 0], sizes = [2, 32], strides = [1, 1]} : vector<2x128xf32> to vector<2x32xf32>
    %48 = arith.negf %47 : vector<2x32xf32>
    %49 = math.exp %48 : vector<2x32xf32>
    %cst_22 = arith.constant 1.000000e+00 : f32
    %50 = vector.broadcast %cst_22 : f32 to vector<2x32xf32>
    %51 = arith.addf %50, %49 : vector<2x32xf32>
    %52 = arith.divf %50, %51 : vector<2x32xf32>
    %53 = vector.extract_strided_slice %46 {offsets = [0, 32], sizes = [2, 32], strides = [1, 1]} : vector<2x128xf32> to vector<2x32xf32>
    %54 = arith.negf %53 : vector<2x32xf32>
    %55 = math.exp %54 : vector<2x32xf32>
    %cst_23 = arith.constant 1.000000e+00 : f32
    %56 = vector.broadcast %cst_23 : f32 to vector<2x32xf32>
    %57 = arith.addf %56, %55 : vector<2x32xf32>
    %58 = arith.divf %56, %57 : vector<2x32xf32>
    %59 = vector.extract_strided_slice %46 {offsets = [0, 64], sizes = [2, 32], strides = [1, 1]} : vector<2x128xf32> to vector<2x32xf32>
    %60 = math.tanh %59 : vector<2x32xf32>
    %61 = vector.extract_strided_slice %46 {offsets = [0, 96], sizes = [2, 32], strides = [1, 1]} : vector<2x128xf32> to vector<2x32xf32>
    %62 = arith.negf %61 : vector<2x32xf32>
    %63 = math.exp %62 : vector<2x32xf32>
    %cst_24 = arith.constant 1.000000e+00 : f32
    %64 = vector.broadcast %cst_24 : f32 to vector<2x32xf32>
    %65 = arith.addf %64, %63 : vector<2x32xf32>
    %66 = arith.divf %64, %65 : vector<2x32xf32>
    %67 = arith.mulf %58, %13 : vector<2x32xf32>
    %68 = arith.mulf %52, %60 : vector<2x32xf32>
    %69 = arith.addf %67, %68 : vector<2x32xf32>
    %70 = math.tanh %69 : vector<2x32xf32>
    %71 = arith.mulf %66, %70 : vector<2x32xf32>
    %c0_25 = arith.constant 0 : index
    %c0_26 = arith.constant 0 : index
    %72 = vector.load %arg6[%c0_25, %c0_26] : memref<16x64xf32, #tpu.memory_space<vmem>>, vector<2x32xf32>
    tpu.vector_store %arg6[%c0_25, %c0_26], %43 {strides = array<i32>} : memref<16x64xf32, #tpu.memory_space<vmem>>, vector<2x32xf32>,
    %c14_27 = arith.constant 14 : index
    %c32 = arith.constant 32 : index
    %73 = vector.load %arg6[%c14_27, %c32] : memref<16x64xf32, #tpu.memory_space<vmem>>, vector<2x32xf32>
    tpu.vector_store %arg6[%c14_27, %c32], %71 {strides = array<i32>} : memref<16x64xf32, #tpu.memory_space<vmem>>, vector<2x32xf32>,
    %c2 = arith.constant 2 : index
    %c0_28 = arith.constant 0 : index
    %74 = vector.load %arg7[%c2, %c0_28] : memref<16x256xf32, #tpu.memory_space<vmem>>, vector<2x128xf32>
    %c12 = arith.constant 12 : index
    %c128_29 = arith.constant 128 : index
    %75 = vector.load %arg7[%c12, %c128_29] : memref<16x256xf32, #tpu.memory_space<vmem>>, vector<2x128xf32>
    %76 = arith.truncf %43 : vector<2x32xf32> to vector<2x32xbf16>
    %cst_30 = arith.constant dense<0.000000e+00> : vector<2x128xf32>
    %77 = tpu.matmul %76, %8, %cst_30 {dimension_numbers = #tpu.dot_dimension_numbers<[1], [0], [0], [1], [0, 0, 1, 1], [], []>} : vector<2x32xbf16>, vector<32x128xbf16>, vector<2x128xf32> -> vector<2x128xf32>
    %78 = arith.addf %74, %77 : vector<2x128xf32>
    %79 = vector.extract_strided_slice %78 {offsets = [0, 0], sizes = [2, 32], strides = [1, 1]} : vector<2x128xf32> to vector<2x32xf32>
    %80 = arith.negf %79 : vector<2x32xf32>
    %81 = math.exp %80 : vector<2x32xf32>
    %cst_31 = arith.constant 1.000000e+00 : f32
    %82 = vector.broadcast %cst_31 : f32 to vector<2x32xf32>
    %83 = arith.addf %82, %81 : vector<2x32xf32>
    %84 = arith.divf %82, %83 : vector<2x32xf32>
    %85 = vector.extract_strided_slice %78 {offsets = [0, 32], sizes = [2, 32], strides = [1, 1]} : vector<2x128xf32> to vector<2x32xf32>
    %86 = arith.negf %85 : vector<2x32xf32>
    %87 = math.exp %86 : vector<2x32xf32>
    %cst_32 = arith.constant 1.000000e+00 : f32
    %88 = vector.broadcast %cst_32 : f32 to vector<2x32xf32>
    %89 = arith.addf %88, %87 : vector<2x32xf32>
    %90 = arith.divf %88, %89 : vector<2x32xf32>
    %91 = vector.extract_strided_slice %78 {offsets = [0, 64], sizes = [2, 32], strides = [1, 1]} : vector<2x128xf32> to vector<2x32xf32>
    %92 = math.tanh %91 : vector<2x32xf32>
    %93 = vector.extract_strided_slice %78 {offsets = [0, 96], sizes = [2, 32], strides = [1, 1]} : vector<2x128xf32> to vector<2x32xf32>
    %94 = arith.negf %93 : vector<2x32xf32>
    %95 = math.exp %94 : vector<2x32xf32>
    %cst_33 = arith.constant 1.000000e+00 : f32
    %96 = vector.broadcast %cst_33 : f32 to vector<2x32xf32>
    %97 = arith.addf %96, %95 : vector<2x32xf32>
    %98 = arith.divf %96, %97 : vector<2x32xf32>
    %99 = arith.mulf %90, %41 : vector<2x32xf32>
    %100 = arith.mulf %84, %92 : vector<2x32xf32>
    %101 = arith.addf %99, %100 : vector<2x32xf32>
    %102 = math.tanh %101 : vector<2x32xf32>
    %103 = arith.mulf %98, %102 : vector<2x32xf32>
    %104 = arith.truncf %71 : vector<2x32xf32> to vector<2x32xbf16>
    %cst_34 = arith.constant dense<0.000000e+00> : vector<2x128xf32>
    %105 = tpu.matmul %104, %9, %cst_34 {dimension_numbers = #tpu.dot_dimension_numbers<[1], [0], [0], [1], [0, 0, 1, 1], [], []>} : vector<2x32xbf16>, vector<32x128xbf16>, vector<2x128xf32> -> vector<2x128xf32>
    %106 = arith.addf %75, %105 : vector<2x128xf32>
    %107 = vector.extract_strided_slice %106 {offsets = [0, 0], sizes = [2, 32], strides = [1, 1]} : vector<2x128xf32> to vector<2x32xf32>
    %108 = arith.negf %107 : vector<2x32xf32>
    %109 = math.exp %108 : vector<2x32xf32>
    %cst_35 = arith.constant 1.000000e+00 : f32
    %110 = vector.broadcast %cst_35 : f32 to vector<2x32xf32>
    %111 = arith.addf %110, %109 : vector<2x32xf32>
    %112 = arith.divf %110, %111 : vector<2x32xf32>
    %113 = vector.extract_strided_slice %106 {offsets = [0, 32], sizes = [2, 32], strides = [1, 1]} : vector<2x128xf32> to vector<2x32xf32>
    %114 = arith.negf %113 : vector<2x32xf32>
    %115 = math.exp %114 : vector<2x32xf32>
    %cst_36 = arith.constant 1.000000e+00 : f32
    %116 = vector.broadcast %cst_36 : f32 to vector<2x32xf32>
    %117 = arith.addf %116, %115 : vector<2x32xf32>
    %118 = arith.divf %116, %117 : vector<2x32xf32>
    %119 = vector.extract_strided_slice %106 {offsets = [0, 64], sizes = [2, 32], strides = [1, 1]} : vector<2x128xf32> to vector<2x32xf32>
    %120 = math.tanh %119 : vector<2x32xf32>
    %121 = vector.extract_strided_slice %106 {offsets = [0, 96], sizes = [2, 32], strides = [1, 1]} : vector<2x128xf32> to vector<2x32xf32>
    %122 = arith.negf %121 : vector<2x32xf32>
    %123 = math.exp %122 : vector<2x32xf32>
    %cst_37 = arith.constant 1.000000e+00 : f32
    %124 = vector.broadcast %cst_37 : f32 to vector<2x32xf32>
    %125 = arith.addf %124, %123 : vector<2x32xf32>
    %126 = arith.divf %124, %125 : vector<2x32xf32>
    %127 = arith.mulf %118, %69 : vector<2x32xf32>
    %128 = arith.mulf %112, %120 : vector<2x32xf32>
    %129 = arith.addf %127, %128 : vector<2x32xf32>
    %130 = math.tanh %129 : vector<2x32xf32>
    %131 = arith.mulf %126, %130 : vector<2x32xf32>
    %c2_38 = arith.constant 2 : index
    %c0_39 = arith.constant 0 : index
    %132 = vector.load %arg6[%c2_38, %c0_39] : memref<16x64xf32, #tpu.memory_space<vmem>>, vector<2x32xf32>
    tpu.vector_store %arg6[%c2_38, %c0_39], %103 {strides = array<i32>} : memref<16x64xf32, #tpu.memory_space<vmem>>, vector<2x32xf32>,
    %c12_40 = arith.constant 12 : index
    %c32_41 = arith.constant 32 : index
    %133 = vector.load %arg6[%c12_40, %c32_41] : memref<16x64xf32, #tpu.memory_space<vmem>>, vector<2x32xf32>
    tpu.vector_store %arg6[%c12_40, %c32_41], %131 {strides = array<i32>} : memref<16x64xf32, #tpu.memory_space<vmem>>, vector<2x32xf32>,
    %c4 = arith.constant 4 : index
    %c0_42 = arith.constant 0 : index
    %134 = vector.load %arg7[%c4, %c0_42] : memref<16x256xf32, #tpu.memory_space<vmem>>, vector<2x128xf32>
    %c10 = arith.constant 10 : index
    %c128_43 = arith.constant 128 : index
    %135 = vector.load %arg7[%c10, %c128_43] : memref<16x256xf32, #tpu.memory_space<vmem>>, vector<2x128xf32>
    %136 = arith.truncf %103 : vector<2x32xf32> to vector<2x32xbf16>
    %cst_44 = arith.constant dense<0.000000e+00> : vector<2x128xf32>
    %137 = tpu.matmul %136, %8, %cst_44 {dimension_numbers = #tpu.dot_dimension_numbers<[1], [0], [0], [1], [0, 0, 1, 1], [], []>} : vector<2x32xbf16>, vector<32x128xbf16>, vector<2x128xf32> -> vector<2x128xf32>
    %138 = arith.addf %134, %137 : vector<2x128xf32>
    %139 = vector.extract_strided_slice %138 {offsets = [0, 0], sizes = [2, 32], strides = [1, 1]} : vector<2x128xf32> to vector<2x32xf32>
    %140 = arith.negf %139 : vector<2x32xf32>
    %141 = math.exp %140 : vector<2x32xf32>
    %cst_45 = arith.constant 1.000000e+00 : f32
    %142 = vector.broadcast %cst_45 : f32 to vector<2x32xf32>
    %143 = arith.addf %142, %141 : vector<2x32xf32>
    %144 = arith.divf %142, %143 : vector<2x32xf32>
    %145 = vector.extract_strided_slice %138 {offsets = [0, 32], sizes = [2, 32], strides = [1, 1]} : vector<2x128xf32> to vector<2x32xf32>
    %146 = arith.negf %145 : vector<2x32xf32>
    %147 = math.exp %146 : vector<2x32xf32>
    %cst_46 = arith.constant 1.000000e+00 : f32
    %148 = vector.broadcast %cst_46 : f32 to vector<2x32xf32>
    %149 = arith.addf %148, %147 : vector<2x32xf32>
    %150 = arith.divf %148, %149 : vector<2x32xf32>
    %151 = vector.extract_strided_slice %138 {offsets = [0, 64], sizes = [2, 32], strides = [1, 1]} : vector<2x128xf32> to vector<2x32xf32>
    %152 = math.tanh %151 : vector<2x32xf32>
    %153 = vector.extract_strided_slice %138 {offsets = [0, 96], sizes = [2, 32], strides = [1, 1]} : vector<2x128xf32> to vector<2x32xf32>
    %154 = arith.negf %153 : vector<2x32xf32>
    %155 = math.exp %154 : vector<2x32xf32>
    %cst_47 = arith.constant 1.000000e+00 : f32
    %156 = vector.broadcast %cst_47 : f32 to vector<2x32xf32>
    %157 = arith.addf %156, %155 : vector<2x32xf32>
    %158 = arith.divf %156, %157 : vector<2x32xf32>
    %159 = arith.mulf %150, %101 : vector<2x32xf32>
    %160 = arith.mulf %144, %152 : vector<2x32xf32>
    %161 = arith.addf %159, %160 : vector<2x32xf32>
    %162 = math.tanh %161 : vector<2x32xf32>
    %163 = arith.mulf %158, %162 : vector<2x32xf32>
    %164 = arith.truncf %131 : vector<2x32xf32> to vector<2x32xbf16>
    %cst_48 = arith.constant dense<0.000000e+00> : vector<2x128xf32>
    %165 = tpu.matmul %164, %9, %cst_48 {dimension_numbers = #tpu.dot_dimension_numbers<[1], [0], [0], [1], [0, 0, 1, 1], [], []>} : vector<2x32xbf16>, vector<32x128xbf16>, vector<2x128xf32> -> vector<2x128xf32>
    %166 = arith.addf %135, %165 : vector<2x128xf32>
    %167 = vector.extract_strided_slice %166 {offsets = [0, 0], sizes = [2, 32], strides = [1, 1]} : vector<2x128xf32> to vector<2x32xf32>
    %168 = arith.negf %167 : vector<2x32xf32>
    %169 = math.exp %168 : vector<2x32xf32>
    %cst_49 = arith.constant 1.000000e+00 : f32
    %170 = vector.broadcast %cst_49 : f32 to vector<2x32xf32>
    %171 = arith.addf %170, %169 : vector<2x32xf32>
    %172 = arith.divf %170, %171 : vector<2x32xf32>
    %173 = vector.extract_strided_slice %166 {offsets = [0, 32], sizes = [2, 32], strides = [1, 1]} : vector<2x128xf32> to vector<2x32xf32>
    %174 = arith.negf %173 : vector<2x32xf32>
    %175 = math.exp %174 : vector<2x32xf32>
    %cst_50 = arith.constant 1.000000e+00 : f32
    %176 = vector.broadcast %cst_50 : f32 to vector<2x32xf32>
    %177 = arith.addf %176, %175 : vector<2x32xf32>
    %178 = arith.divf %176, %177 : vector<2x32xf32>
    %179 = vector.extract_strided_slice %166 {offsets = [0, 64], sizes = [2, 32], strides = [1, 1]} : vector<2x128xf32> to vector<2x32xf32>
    %180 = math.tanh %179 : vector<2x32xf32>
    %181 = vector.extract_strided_slice %166 {offsets = [0, 96], sizes = [2, 32], strides = [1, 1]} : vector<2x128xf32> to vector<2x32xf32>
    %182 = arith.negf %181 : vector<2x32xf32>
    %183 = math.exp %182 : vector<2x32xf32>
    %cst_51 = arith.constant 1.000000e+00 : f32
    %184 = vector.broadcast %cst_51 : f32 to vector<2x32xf32>
    %185 = arith.addf %184, %183 : vector<2x32xf32>
    %186 = arith.divf %184, %185 : vector<2x32xf32>
    %187 = arith.mulf %178, %129 : vector<2x32xf32>
    %188 = arith.mulf %172, %180 : vector<2x32xf32>
    %189 = arith.addf %187, %188 : vector<2x32xf32>
    %190 = math.tanh %189 : vector<2x32xf32>
    %191 = arith.mulf %186, %190 : vector<2x32xf32>
    %c4_52 = arith.constant 4 : index
    %c0_53 = arith.constant 0 : index
    %192 = vector.load %arg6[%c4_52, %c0_53] : memref<16x64xf32, #tpu.memory_space<vmem>>, vector<2x32xf32>
    tpu.vector_store %arg6[%c4_52, %c0_53], %163 {strides = array<i32>} : memref<16x64xf32, #tpu.memory_space<vmem>>, vector<2x32xf32>,
    %c10_54 = arith.constant 10 : index
    %c32_55 = arith.constant 32 : index
    %193 = vector.load %arg6[%c10_54, %c32_55] : memref<16x64xf32, #tpu.memory_space<vmem>>, vector<2x32xf32>
    tpu.vector_store %arg6[%c10_54, %c32_55], %191 {strides = array<i32>} : memref<16x64xf32, #tpu.memory_space<vmem>>, vector<2x32xf32>,
    %c6 = arith.constant 6 : index
    %c0_56 = arith.constant 0 : index
    %194 = vector.load %arg7[%c6, %c0_56] : memref<16x256xf32, #tpu.memory_space<vmem>>, vector<2x128xf32>
    %c8 = arith.constant 8 : index
    %c128_57 = arith.constant 128 : index
    %195 = vector.load %arg7[%c8, %c128_57] : memref<16x256xf32, #tpu.memory_space<vmem>>, vector<2x128xf32>
    %196 = arith.truncf %163 : vector<2x32xf32> to vector<2x32xbf16>
    %cst_58 = arith.constant dense<0.000000e+00> : vector<2x128xf32>
    %197 = tpu.matmul %196, %8, %cst_58 {dimension_numbers = #tpu.dot_dimension_numbers<[1], [0], [0], [1], [0, 0, 1, 1], [], []>} : vector<2x32xbf16>, vector<32x128xbf16>, vector<2x128xf32> -> vector<2x128xf32>
    %198 = arith.addf %194, %197 : vector<2x128xf32>
    %199 = vector.extract_strided_slice %198 {offsets = [0, 0], sizes = [2, 32], strides = [1, 1]} : vector<2x128xf32> to vector<2x32xf32>
    %200 = arith.negf %199 : vector<2x32xf32>
    %201 = math.exp %200 : vector<2x32xf32>
    %cst_59 = arith.constant 1.000000e+00 : f32
    %202 = vector.broadcast %cst_59 : f32 to vector<2x32xf32>
    %203 = arith.addf %202, %201 : vector<2x32xf32>
    %204 = arith.divf %202, %203 : vector<2x32xf32>
    %205 = vector.extract_strided_slice %198 {offsets = [0, 32], sizes = [2, 32], strides = [1, 1]} : vector<2x128xf32> to vector<2x32xf32>
    %206 = arith.negf %205 : vector<2x32xf32>
    %207 = math.exp %206 : vector<2x32xf32>
    %cst_60 = arith.constant 1.000000e+00 : f32
    %208 = vector.broadcast %cst_60 : f32 to vector<2x32xf32>
    %209 = arith.addf %208, %207 : vector<2x32xf32>
    %210 = arith.divf %208, %209 : vector<2x32xf32>
    %211 = vector.extract_strided_slice %198 {offsets = [0, 64], sizes = [2, 32], strides = [1, 1]} : vector<2x128xf32> to vector<2x32xf32>
    %212 = math.tanh %211 : vector<2x32xf32>
    %213 = vector.extract_strided_slice %198 {offsets = [0, 96], sizes = [2, 32], strides = [1, 1]} : vector<2x128xf32> to vector<2x32xf32>
    %214 = arith.negf %213 : vector<2x32xf32>
    %215 = math.exp %214 : vector<2x32xf32>
    %cst_61 = arith.constant 1.000000e+00 : f32
    %216 = vector.broadcast %cst_61 : f32 to vector<2x32xf32>
    %217 = arith.addf %216, %215 : vector<2x32xf32>
    %218 = arith.divf %216, %217 : vector<2x32xf32>
    %219 = arith.mulf %210, %161 : vector<2x32xf32>
    %220 = arith.mulf %204, %212 : vector<2x32xf32>
    %221 = arith.addf %219, %220 : vector<2x32xf32>
    %222 = math.tanh %221 : vector<2x32xf32>
    %223 = arith.mulf %218, %222 : vector<2x32xf32>
    %224 = arith.truncf %191 : vector<2x32xf32> to vector<2x32xbf16>
    %cst_62 = arith.constant dense<0.000000e+00> : vector<2x128xf32>
    %225 = tpu.matmul %224, %9, %cst_62 {dimension_numbers = #tpu.dot_dimension_numbers<[1], [0], [0], [1], [0, 0, 1, 1], [], []>} : vector<2x32xbf16>, vector<32x128xbf16>, vector<2x128xf32> -> vector<2x128xf32>
    %226 = arith.addf %195, %225 : vector<2x128xf32>
    %227 = vector.extract_strided_slice %226 {offsets = [0, 0], sizes = [2, 32], strides = [1, 1]} : vector<2x128xf32> to vector<2x32xf32>
    %228 = arith.negf %227 : vector<2x32xf32>
    %229 = math.exp %228 : vector<2x32xf32>
    %cst_63 = arith.constant 1.000000e+00 : f32
    %230 = vector.broadcast %cst_63 : f32 to vector<2x32xf32>
    %231 = arith.addf %230, %229 : vector<2x32xf32>
    %232 = arith.divf %230, %231 : vector<2x32xf32>
    %233 = vector.extract_strided_slice %226 {offsets = [0, 32], sizes = [2, 32], strides = [1, 1]} : vector<2x128xf32> to vector<2x32xf32>
    %234 = arith.negf %233 : vector<2x32xf32>
    %235 = math.exp %234 : vector<2x32xf32>
    %cst_64 = arith.constant 1.000000e+00 : f32
    %236 = vector.broadcast %cst_64 : f32 to vector<2x32xf32>
    %237 = arith.addf %236, %235 : vector<2x32xf32>
    %238 = arith.divf %236, %237 : vector<2x32xf32>
    %239 = vector.extract_strided_slice %226 {offsets = [0, 64], sizes = [2, 32], strides = [1, 1]} : vector<2x128xf32> to vector<2x32xf32>
    %240 = math.tanh %239 : vector<2x32xf32>
    %241 = vector.extract_strided_slice %226 {offsets = [0, 96], sizes = [2, 32], strides = [1, 1]} : vector<2x128xf32> to vector<2x32xf32>
    %242 = arith.negf %241 : vector<2x32xf32>
    %243 = math.exp %242 : vector<2x32xf32>
    %cst_65 = arith.constant 1.000000e+00 : f32
    %244 = vector.broadcast %cst_65 : f32 to vector<2x32xf32>
    %245 = arith.addf %244, %243 : vector<2x32xf32>
    %246 = arith.divf %244, %245 : vector<2x32xf32>
    %247 = arith.mulf %238, %189 : vector<2x32xf32>
    %248 = arith.mulf %232, %240 : vector<2x32xf32>
    %249 = arith.addf %247, %248 : vector<2x32xf32>
    %250 = math.tanh %249 : vector<2x32xf32>
    %251 = arith.mulf %246, %250 : vector<2x32xf32>
    %c6_66 = arith.constant 6 : index
    %c0_67 = arith.constant 0 : index
    %252 = vector.load %arg6[%c6_66, %c0_67] : memref<16x64xf32, #tpu.memory_space<vmem>>, vector<2x32xf32>
    tpu.vector_store %arg6[%c6_66, %c0_67], %223 {strides = array<i32>} : memref<16x64xf32, #tpu.memory_space<vmem>>, vector<2x32xf32>,
    %c8_68 = arith.constant 8 : index
    %c32_69 = arith.constant 32 : index
    %253 = vector.load %arg6[%c8_68, %c32_69] : memref<16x64xf32, #tpu.memory_space<vmem>>, vector<2x32xf32>
    tpu.vector_store %arg6[%c8_68, %c32_69], %251 {strides = array<i32>} : memref<16x64xf32, #tpu.memory_space<vmem>>, vector<2x32xf32>,
    %c8_70 = arith.constant 8 : index
    %c0_71 = arith.constant 0 : index
    %254 = vector.load %arg7[%c8_70, %c0_71] : memref<16x256xf32, #tpu.memory_space<vmem>>, vector<2x128xf32>
    %c6_72 = arith.constant 6 : index
    %c128_73 = arith.constant 128 : index
    %255 = vector.load %arg7[%c6_72, %c128_73] : memref<16x256xf32, #tpu.memory_space<vmem>>, vector<2x128xf32>
    %256 = arith.truncf %223 : vector<2x32xf32> to vector<2x32xbf16>
    %cst_74 = arith.constant dense<0.000000e+00> : vector<2x128xf32>
    %257 = tpu.matmul %256, %8, %cst_74 {dimension_numbers = #tpu.dot_dimension_numbers<[1], [0], [0], [1], [0, 0, 1, 1], [], []>} : vector<2x32xbf16>, vector<32x128xbf16>, vector<2x128xf32> -> vector<2x128xf32>
    %258 = arith.addf %254, %257 : vector<2x128xf32>
    %259 = vector.extract_strided_slice %258 {offsets = [0, 0], sizes = [2, 32], strides = [1, 1]} : vector<2x128xf32> to vector<2x32xf32>
    %260 = arith.negf %259 : vector<2x32xf32>
    %261 = math.exp %260 : vector<2x32xf32>
    %cst_75 = arith.constant 1.000000e+00 : f32
    %262 = vector.broadcast %cst_75 : f32 to vector<2x32xf32>
    %263 = arith.addf %262, %261 : vector<2x32xf32>
    %264 = arith.divf %262, %263 : vector<2x32xf32>
    %265 = vector.extract_strided_slice %258 {offsets = [0, 32], sizes = [2, 32], strides = [1, 1]} : vector<2x128xf32> to vector<2x32xf32>
    %266 = arith.negf %265 : vector<2x32xf32>
    %267 = math.exp %266 : vector<2x32xf32>
    %cst_76 = arith.constant 1.000000e+00 : f32
    %268 = vector.broadcast %cst_76 : f32 to vector<2x32xf32>
    %269 = arith.addf %268, %267 : vector<2x32xf32>
    %270 = arith.divf %268, %269 : vector<2x32xf32>
    %271 = vector.extract_strided_slice %258 {offsets = [0, 64], sizes = [2, 32], strides = [1, 1]} : vector<2x128xf32> to vector<2x32xf32>
    %272 = math.tanh %271 : vector<2x32xf32>
    %273 = vector.extract_strided_slice %258 {offsets = [0, 96], sizes = [2, 32], strides = [1, 1]} : vector<2x128xf32> to vector<2x32xf32>
    %274 = arith.negf %273 : vector<2x32xf32>
    %275 = math.exp %274 : vector<2x32xf32>
    %cst_77 = arith.constant 1.000000e+00 : f32
    %276 = vector.broadcast %cst_77 : f32 to vector<2x32xf32>
    %277 = arith.addf %276, %275 : vector<2x32xf32>
    %278 = arith.divf %276, %277 : vector<2x32xf32>
    %279 = arith.mulf %270, %221 : vector<2x32xf32>
    %280 = arith.mulf %264, %272 : vector<2x32xf32>
    %281 = arith.addf %279, %280 : vector<2x32xf32>
    %282 = math.tanh %281 : vector<2x32xf32>
    %283 = arith.mulf %278, %282 : vector<2x32xf32>
    %284 = arith.truncf %251 : vector<2x32xf32> to vector<2x32xbf16>
    %cst_78 = arith.constant dense<0.000000e+00> : vector<2x128xf32>
    %285 = tpu.matmul %284, %9, %cst_78 {dimension_numbers = #tpu.dot_dimension_numbers<[1], [0], [0], [1], [0, 0, 1, 1], [], []>} : vector<2x32xbf16>, vector<32x128xbf16>, vector<2x128xf32> -> vector<2x128xf32>
    %286 = arith.addf %255, %285 : vector<2x128xf32>
    %287 = vector.extract_strided_slice %286 {offsets = [0, 0], sizes = [2, 32], strides = [1, 1]} : vector<2x128xf32> to vector<2x32xf32>
    %288 = arith.negf %287 : vector<2x32xf32>
    %289 = math.exp %288 : vector<2x32xf32>
    %cst_79 = arith.constant 1.000000e+00 : f32
    %290 = vector.broadcast %cst_79 : f32 to vector<2x32xf32>
    %291 = arith.addf %290, %289 : vector<2x32xf32>
    %292 = arith.divf %290, %291 : vector<2x32xf32>
    %293 = vector.extract_strided_slice %286 {offsets = [0, 32], sizes = [2, 32], strides = [1, 1]} : vector<2x128xf32> to vector<2x32xf32>
    %294 = arith.negf %293 : vector<2x32xf32>
    %295 = math.exp %294 : vector<2x32xf32>
    %cst_80 = arith.constant 1.000000e+00 : f32
    %296 = vector.broadcast %cst_80 : f32 to vector<2x32xf32>
    %297 = arith.addf %296, %295 : vector<2x32xf32>
    %298 = arith.divf %296, %297 : vector<2x32xf32>
    %299 = vector.extract_strided_slice %286 {offsets = [0, 64], sizes = [2, 32], strides = [1, 1]} : vector<2x128xf32> to vector<2x32xf32>
    %300 = math.tanh %299 : vector<2x32xf32>
    %301 = vector.extract_strided_slice %286 {offsets = [0, 96], sizes = [2, 32], strides = [1, 1]} : vector<2x128xf32> to vector<2x32xf32>
    %302 = arith.negf %301 : vector<2x32xf32>
    %303 = math.exp %302 : vector<2x32xf32>
    %cst_81 = arith.constant 1.000000e+00 : f32
    %304 = vector.broadcast %cst_81 : f32 to vector<2x32xf32>
    %305 = arith.addf %304, %303 : vector<2x32xf32>
    %306 = arith.divf %304, %305 : vector<2x32xf32>
    %307 = arith.mulf %298, %249 : vector<2x32xf32>
    %308 = arith.mulf %292, %300 : vector<2x32xf32>
    %309 = arith.addf %307, %308 : vector<2x32xf32>
    %310 = math.tanh %309 : vector<2x32xf32>
    %311 = arith.mulf %306, %310 : vector<2x32xf32>
    %c8_82 = arith.constant 8 : index
    %c0_83 = arith.constant 0 : index
    %312 = vector.load %arg6[%c8_82, %c0_83] : memref<16x64xf32, #tpu.memory_space<vmem>>, vector<2x32xf32>
    tpu.vector_store %arg6[%c8_82, %c0_83], %283 {strides = array<i32>} : memref<16x64xf32, #tpu.memory_space<vmem>>, vector<2x32xf32>,
    %c6_84 = arith.constant 6 : index
    %c32_85 = arith.constant 32 : index
    %313 = vector.load %arg6[%c6_84, %c32_85] : memref<16x64xf32, #tpu.memory_space<vmem>>, vector<2x32xf32>
    tpu.vector_store %arg6[%c6_84, %c32_85], %311 {strides = array<i32>} : memref<16x64xf32, #tpu.memory_space<vmem>>, vector<2x32xf32>,
    %c10_86 = arith.constant 10 : index
    %c0_87 = arith.constant 0 : index
    %314 = vector.load %arg7[%c10_86, %c0_87] : memref<16x256xf32, #tpu.memory_space<vmem>>, vector<2x128xf32>
    %c4_88 = arith.constant 4 : index
    %c128_89 = arith.constant 128 : index
    %315 = vector.load %arg7[%c4_88, %c128_89] : memref<16x256xf32, #tpu.memory_space<vmem>>, vector<2x128xf32>
    %316 = arith.truncf %283 : vector<2x32xf32> to vector<2x32xbf16>
    %cst_90 = arith.constant dense<0.000000e+00> : vector<2x128xf32>
    %317 = tpu.matmul %316, %8, %cst_90 {dimension_numbers = #tpu.dot_dimension_numbers<[1], [0], [0], [1], [0, 0, 1, 1], [], []>} : vector<2x32xbf16>, vector<32x128xbf16>, vector<2x128xf32> -> vector<2x128xf32>
    %318 = arith.addf %314, %317 : vector<2x128xf32>
    %319 = vector.extract_strided_slice %318 {offsets = [0, 0], sizes = [2, 32], strides = [1, 1]} : vector<2x128xf32> to vector<2x32xf32>
    %320 = arith.negf %319 : vector<2x32xf32>
    %321 = math.exp %320 : vector<2x32xf32>
    %cst_91 = arith.constant 1.000000e+00 : f32
    %322 = vector.broadcast %cst_91 : f32 to vector<2x32xf32>
    %323 = arith.addf %322, %321 : vector<2x32xf32>
    %324 = arith.divf %322, %323 : vector<2x32xf32>
    %325 = vector.extract_strided_slice %318 {offsets = [0, 32], sizes = [2, 32], strides = [1, 1]} : vector<2x128xf32> to vector<2x32xf32>
    %326 = arith.negf %325 : vector<2x32xf32>
    %327 = math.exp %326 : vector<2x32xf32>
    %cst_92 = arith.constant 1.000000e+00 : f32
    %328 = vector.broadcast %cst_92 : f32 to vector<2x32xf32>
    %329 = arith.addf %328, %327 : vector<2x32xf32>
    %330 = arith.divf %328, %329 : vector<2x32xf32>
    %331 = vector.extract_strided_slice %318 {offsets = [0, 64], sizes = [2, 32], strides = [1, 1]} : vector<2x128xf32> to vector<2x32xf32>
    %332 = math.tanh %331 : vector<2x32xf32>
    %333 = vector.extract_strided_slice %318 {offsets = [0, 96], sizes = [2, 32], strides = [1, 1]} : vector<2x128xf32> to vector<2x32xf32>
    %334 = arith.negf %333 : vector<2x32xf32>
    %335 = math.exp %334 : vector<2x32xf32>
    %cst_93 = arith.constant 1.000000e+00 : f32
    %336 = vector.broadcast %cst_93 : f32 to vector<2x32xf32>
    %337 = arith.addf %336, %335 : vector<2x32xf32>
    %338 = arith.divf %336, %337 : vector<2x32xf32>
    %339 = arith.mulf %330, %281 : vector<2x32xf32>
    %340 = arith.mulf %324, %332 : vector<2x32xf32>
    %341 = arith.addf %339, %340 : vector<2x32xf32>
    %342 = math.tanh %341 : vector<2x32xf32>
    %343 = arith.mulf %338, %342 : vector<2x32xf32>
    %344 = arith.truncf %311 : vector<2x32xf32> to vector<2x32xbf16>
    %cst_94 = arith.constant dense<0.000000e+00> : vector<2x128xf32>
    %345 = tpu.matmul %344, %9, %cst_94 {dimension_numbers = #tpu.dot_dimension_numbers<[1], [0], [0], [1], [0, 0, 1, 1], [], []>} : vector<2x32xbf16>, vector<32x128xbf16>, vector<2x128xf32> -> vector<2x128xf32>
    %346 = arith.addf %315, %345 : vector<2x128xf32>
    %347 = vector.extract_strided_slice %346 {offsets = [0, 0], sizes = [2, 32], strides = [1, 1]} : vector<2x128xf32> to vector<2x32xf32>
    %348 = arith.negf %347 : vector<2x32xf32>
    %349 = math.exp %348 : vector<2x32xf32>
    %cst_95 = arith.constant 1.000000e+00 : f32
    %350 = vector.broadcast %cst_95 : f32 to vector<2x32xf32>
    %351 = arith.addf %350, %349 : vector<2x32xf32>
    %352 = arith.divf %350, %351 : vector<2x32xf32>
    %353 = vector.extract_strided_slice %346 {offsets = [0, 32], sizes = [2, 32], strides = [1, 1]} : vector<2x128xf32> to vector<2x32xf32>
    %354 = arith.negf %353 : vector<2x32xf32>
    %355 = math.exp %354 : vector<2x32xf32>
    %cst_96 = arith.constant 1.000000e+00 : f32
    %356 = vector.broadcast %cst_96 : f32 to vector<2x32xf32>
    %357 = arith.addf %356, %355 : vector<2x32xf32>
    %358 = arith.divf %356, %357 : vector<2x32xf32>
    %359 = vector.extract_strided_slice %346 {offsets = [0, 64], sizes = [2, 32], strides = [1, 1]} : vector<2x128xf32> to vector<2x32xf32>
    %360 = math.tanh %359 : vector<2x32xf32>
    %361 = vector.extract_strided_slice %346 {offsets = [0, 96], sizes = [2, 32], strides = [1, 1]} : vector<2x128xf32> to vector<2x32xf32>
    %362 = arith.negf %361 : vector<2x32xf32>
    %363 = math.exp %362 : vector<2x32xf32>
    %cst_97 = arith.constant 1.000000e+00 : f32
    %364 = vector.broadcast %cst_97 : f32 to vector<2x32xf32>
    %365 = arith.addf %364, %363 : vector<2x32xf32>
    %366 = arith.divf %364, %365 : vector<2x32xf32>
    %367 = arith.mulf %358, %309 : vector<2x32xf32>
    %368 = arith.mulf %352, %360 : vector<2x32xf32>
    %369 = arith.addf %367, %368 : vector<2x32xf32>
    %370 = math.tanh %369 : vector<2x32xf32>
    %371 = arith.mulf %366, %370 : vector<2x32xf32>
    %c10_98 = arith.constant 10 : index
    %c0_99 = arith.constant 0 : index
    %372 = vector.load %arg6[%c10_98, %c0_99] : memref<16x64xf32, #tpu.memory_space<vmem>>, vector<2x32xf32>
    tpu.vector_store %arg6[%c10_98, %c0_99], %343 {strides = array<i32>} : memref<16x64xf32, #tpu.memory_space<vmem>>, vector<2x32xf32>,
    %c4_100 = arith.constant 4 : index
    %c32_101 = arith.constant 32 : index
    %373 = vector.load %arg6[%c4_100, %c32_101] : memref<16x64xf32, #tpu.memory_space<vmem>>, vector<2x32xf32>
    tpu.vector_store %arg6[%c4_100, %c32_101], %371 {strides = array<i32>} : memref<16x64xf32, #tpu.memory_space<vmem>>, vector<2x32xf32>,
    %c12_102 = arith.constant 12 : index
    %c0_103 = arith.constant 0 : index
    %374 = vector.load %arg7[%c12_102, %c0_103] : memref<16x256xf32, #tpu.memory_space<vmem>>, vector<2x128xf32>
    %c2_104 = arith.constant 2 : index
    %c128_105 = arith.constant 128 : index
    %375 = vector.load %arg7[%c2_104, %c128_105] : memref<16x256xf32, #tpu.memory_space<vmem>>, vector<2x128xf32>
    %376 = arith.truncf %343 : vector<2x32xf32> to vector<2x32xbf16>
    %cst_106 = arith.constant dense<0.000000e+00> : vector<2x128xf32>
    %377 = tpu.matmul %376, %8, %cst_106 {dimension_numbers = #tpu.dot_dimension_numbers<[1], [0], [0], [1], [0, 0, 1, 1], [], []>} : vector<2x32xbf16>, vector<32x128xbf16>, vector<2x128xf32> -> vector<2x128xf32>
    %378 = arith.addf %374, %377 : vector<2x128xf32>
    %379 = vector.extract_strided_slice %378 {offsets = [0, 0], sizes = [2, 32], strides = [1, 1]} : vector<2x128xf32> to vector<2x32xf32>
    %380 = arith.negf %379 : vector<2x32xf32>
    %381 = math.exp %380 : vector<2x32xf32>
    %cst_107 = arith.constant 1.000000e+00 : f32
    %382 = vector.broadcast %cst_107 : f32 to vector<2x32xf32>
    %383 = arith.addf %382, %381 : vector<2x32xf32>
    %384 = arith.divf %382, %383 : vector<2x32xf32>
    %385 = vector.extract_strided_slice %378 {offsets = [0, 32], sizes = [2, 32], strides = [1, 1]} : vector<2x128xf32> to vector<2x32xf32>
    %386 = arith.negf %385 : vector<2x32xf32>
    %387 = math.exp %386 : vector<2x32xf32>
    %cst_108 = arith.constant 1.000000e+00 : f32
    %388 = vector.broadcast %cst_108 : f32 to vector<2x32xf32>
    %389 = arith.addf %388, %387 : vector<2x32xf32>
    %390 = arith.divf %388, %389 : vector<2x32xf32>
    %391 = vector.extract_strided_slice %378 {offsets = [0, 64], sizes = [2, 32], strides = [1, 1]} : vector<2x128xf32> to vector<2x32xf32>
    %392 = math.tanh %391 : vector<2x32xf32>
    %393 = vector.extract_strided_slice %378 {offsets = [0, 96], sizes = [2, 32], strides = [1, 1]} : vector<2x128xf32> to vector<2x32xf32>
    %394 = arith.negf %393 : vector<2x32xf32>
    %395 = math.exp %394 : vector<2x32xf32>
    %cst_109 = arith.constant 1.000000e+00 : f32
    %396 = vector.broadcast %cst_109 : f32 to vector<2x32xf32>
    %397 = arith.addf %396, %395 : vector<2x32xf32>
    %398 = arith.divf %396, %397 : vector<2x32xf32>
    %399 = arith.mulf %390, %341 : vector<2x32xf32>
    %400 = arith.mulf %384, %392 : vector<2x32xf32>
    %401 = arith.addf %399, %400 : vector<2x32xf32>
    %402 = math.tanh %401 : vector<2x32xf32>
    %403 = arith.mulf %398, %402 : vector<2x32xf32>
    %404 = arith.truncf %371 : vector<2x32xf32> to vector<2x32xbf16>
    %cst_110 = arith.constant dense<0.000000e+00> : vector<2x128xf32>
    %405 = tpu.matmul %404, %9, %cst_110 {dimension_numbers = #tpu.dot_dimension_numbers<[1], [0], [0], [1], [0, 0, 1, 1], [], []>} : vector<2x32xbf16>, vector<32x128xbf16>, vector<2x128xf32> -> vector<2x128xf32>
    %406 = arith.addf %375, %405 : vector<2x128xf32>
    %407 = vector.extract_strided_slice %406 {offsets = [0, 0], sizes = [2, 32], strides = [1, 1]} : vector<2x128xf32> to vector<2x32xf32>
    %408 = arith.negf %407 : vector<2x32xf32>
    %409 = math.exp %408 : vector<2x32xf32>
    %cst_111 = arith.constant 1.000000e+00 : f32
    %410 = vector.broadcast %cst_111 : f32 to vector<2x32xf32>
    %411 = arith.addf %410, %409 : vector<2x32xf32>
    %412 = arith.divf %410, %411 : vector<2x32xf32>
    %413 = vector.extract_strided_slice %406 {offsets = [0, 32], sizes = [2, 32], strides = [1, 1]} : vector<2x128xf32> to vector<2x32xf32>
    %414 = arith.negf %413 : vector<2x32xf32>
    %415 = math.exp %414 : vector<2x32xf32>
    %cst_112 = arith.constant 1.000000e+00 : f32
    %416 = vector.broadcast %cst_112 : f32 to vector<2x32xf32>
    %417 = arith.addf %416, %415 : vector<2x32xf32>
    %418 = arith.divf %416, %417 : vector<2x32xf32>
    %419 = vector.extract_strided_slice %406 {offsets = [0, 64], sizes = [2, 32], strides = [1, 1]} : vector<2x128xf32> to vector<2x32xf32>
    %420 = math.tanh %419 : vector<2x32xf32>
    %421 = vector.extract_strided_slice %406 {offsets = [0, 96], sizes = [2, 32], strides = [1, 1]} : vector<2x128xf32> to vector<2x32xf32>
    %422 = arith.negf %421 : vector<2x32xf32>
    %423 = math.exp %422 : vector<2x32xf32>
    %cst_113 = arith.constant 1.000000e+00 : f32
    %424 = vector.broadcast %cst_113 : f32 to vector<2x32xf32>
    %425 = arith.addf %424, %423 : vector<2x32xf32>
    %426 = arith.divf %424, %425 : vector<2x32xf32>
    %427 = arith.mulf %418, %369 : vector<2x32xf32>
    %428 = arith.mulf %412, %420 : vector<2x32xf32>
    %429 = arith.addf %427, %428 : vector<2x32xf32>
    %430 = math.tanh %429 : vector<2x32xf32>
    %431 = arith.mulf %426, %430 : vector<2x32xf32>
    %c12_114 = arith.constant 12 : index
    %c0_115 = arith.constant 0 : index
    %432 = vector.load %arg6[%c12_114, %c0_115] : memref<16x64xf32, #tpu.memory_space<vmem>>, vector<2x32xf32>
    tpu.vector_store %arg6[%c12_114, %c0_115], %403 {strides = array<i32>} : memref<16x64xf32, #tpu.memory_space<vmem>>, vector<2x32xf32>,
    %c2_116 = arith.constant 2 : index
    %c32_117 = arith.constant 32 : index
    %433 = vector.load %arg6[%c2_116, %c32_117] : memref<16x64xf32, #tpu.memory_space<vmem>>, vector<2x32xf32>
    tpu.vector_store %arg6[%c2_116, %c32_117], %431 {strides = array<i32>} : memref<16x64xf32, #tpu.memory_space<vmem>>, vector<2x32xf32>,
    %c14_118 = arith.constant 14 : index
    %c0_119 = arith.constant 0 : index
    %434 = vector.load %arg7[%c14_118, %c0_119] : memref<16x256xf32, #tpu.memory_space<vmem>>, vector<2x128xf32>
    %c0_120 = arith.constant 0 : index
    %c128_121 = arith.constant 128 : index
    %435 = vector.load %arg7[%c0_120, %c128_121] : memref<16x256xf32, #tpu.memory_space<vmem>>, vector<2x128xf32>
    %436 = arith.truncf %403 : vector<2x32xf32> to vector<2x32xbf16>
    %cst_122 = arith.constant dense<0.000000e+00> : vector<2x128xf32>
    %437 = tpu.matmul %436, %8, %cst_122 {dimension_numbers = #tpu.dot_dimension_numbers<[1], [0], [0], [1], [0, 0, 1, 1], [], []>} : vector<2x32xbf16>, vector<32x128xbf16>, vector<2x128xf32> -> vector<2x128xf32>
    %438 = arith.addf %434, %437 : vector<2x128xf32>
    %439 = vector.extract_strided_slice %438 {offsets = [0, 0], sizes = [2, 32], strides = [1, 1]} : vector<2x128xf32> to vector<2x32xf32>
    %440 = arith.negf %439 : vector<2x32xf32>
    %441 = math.exp %440 : vector<2x32xf32>
    %cst_123 = arith.constant 1.000000e+00 : f32
    %442 = vector.broadcast %cst_123 : f32 to vector<2x32xf32>
    %443 = arith.addf %442, %441 : vector<2x32xf32>
    %444 = arith.divf %442, %443 : vector<2x32xf32>
    %445 = vector.extract_strided_slice %438 {offsets = [0, 32], sizes = [2, 32], strides = [1, 1]} : vector<2x128xf32> to vector<2x32xf32>
    %446 = arith.negf %445 : vector<2x32xf32>
    %447 = math.exp %446 : vector<2x32xf32>
    %cst_124 = arith.constant 1.000000e+00 : f32
    %448 = vector.broadcast %cst_124 : f32 to vector<2x32xf32>
    %449 = arith.addf %448, %447 : vector<2x32xf32>
    %450 = arith.divf %448, %449 : vector<2x32xf32>
    %451 = vector.extract_strided_slice %438 {offsets = [0, 64], sizes = [2, 32], strides = [1, 1]} : vector<2x128xf32> to vector<2x32xf32>
    %452 = math.tanh %451 : vector<2x32xf32>
    %453 = vector.extract_strided_slice %438 {offsets = [0, 96], sizes = [2, 32], strides = [1, 1]} : vector<2x128xf32> to vector<2x32xf32>
    %454 = arith.negf %453 : vector<2x32xf32>
    %455 = math.exp %454 : vector<2x32xf32>
    %cst_125 = arith.constant 1.000000e+00 : f32
    %456 = vector.broadcast %cst_125 : f32 to vector<2x32xf32>
    %457 = arith.addf %456, %455 : vector<2x32xf32>
    %458 = arith.divf %456, %457 : vector<2x32xf32>
    %459 = arith.mulf %450, %401 : vector<2x32xf32>
    %460 = arith.mulf %444, %452 : vector<2x32xf32>
    %461 = arith.addf %459, %460 : vector<2x32xf32>
    %462 = math.tanh %461 : vector<2x32xf32>
    %463 = arith.mulf %458, %462 : vector<2x32xf32>
    %464 = arith.truncf %431 : vector<2x32xf32> to vector<2x32xbf16>
    %cst_126 = arith.constant dense<0.000000e+00> : vector<2x128xf32>
    %465 = tpu.matmul %464, %9, %cst_126 {dimension_numbers = #tpu.dot_dimension_numbers<[1], [0], [0], [1], [0, 0, 1, 1], [], []>} : vector<2x32xbf16>, vector<32x128xbf16>, vector<2x128xf32> -> vector<2x128xf32>
    %466 = arith.addf %435, %465 : vector<2x128xf32>
    %467 = vector.extract_strided_slice %466 {offsets = [0, 0], sizes = [2, 32], strides = [1, 1]} : vector<2x128xf32> to vector<2x32xf32>
    %468 = arith.negf %467 : vector<2x32xf32>
    %469 = math.exp %468 : vector<2x32xf32>
    %cst_127 = arith.constant 1.000000e+00 : f32
    %470 = vector.broadcast %cst_127 : f32 to vector<2x32xf32>
    %471 = arith.addf %470, %469 : vector<2x32xf32>
    %472 = arith.divf %470, %471 : vector<2x32xf32>
    %473 = vector.extract_strided_slice %466 {offsets = [0, 32], sizes = [2, 32], strides = [1, 1]} : vector<2x128xf32> to vector<2x32xf32>
    %474 = arith.negf %473 : vector<2x32xf32>
    %475 = math.exp %474 : vector<2x32xf32>
    %cst_128 = arith.constant 1.000000e+00 : f32
    %476 = vector.broadcast %cst_128 : f32 to vector<2x32xf32>
    %477 = arith.addf %476, %475 : vector<2x32xf32>
    %478 = arith.divf %476, %477 : vector<2x32xf32>
    %479 = vector.extract_strided_slice %466 {offsets = [0, 64], sizes = [2, 32], strides = [1, 1]} : vector<2x128xf32> to vector<2x32xf32>
    %480 = math.tanh %479 : vector<2x32xf32>
    %481 = vector.extract_strided_slice %466 {offsets = [0, 96], sizes = [2, 32], strides = [1, 1]} : vector<2x128xf32> to vector<2x32xf32>
    %482 = arith.negf %481 : vector<2x32xf32>
    %483 = math.exp %482 : vector<2x32xf32>
    %cst_129 = arith.constant 1.000000e+00 : f32
    %484 = vector.broadcast %cst_129 : f32 to vector<2x32xf32>
    %485 = arith.addf %484, %483 : vector<2x32xf32>
    %486 = arith.divf %484, %485 : vector<2x32xf32>
    %487 = arith.mulf %478, %429 : vector<2x32xf32>
    %488 = arith.mulf %472, %480 : vector<2x32xf32>
    %489 = arith.addf %487, %488 : vector<2x32xf32>
    %490 = math.tanh %489 : vector<2x32xf32>
    %491 = arith.mulf %486, %490 : vector<2x32xf32>
    %c14_130 = arith.constant 14 : index
    %c0_131 = arith.constant 0 : index
    %492 = vector.load %arg6[%c14_130, %c0_131] : memref<16x64xf32, #tpu.memory_space<vmem>>, vector<2x32xf32>
    tpu.vector_store %arg6[%c14_130, %c0_131], %463 {strides = array<i32>} : memref<16x64xf32, #tpu.memory_space<vmem>>, vector<2x32xf32>,
    %c0_132 = arith.constant 0 : index
    %c32_133 = arith.constant 32 : index
    %493 = vector.load %arg6[%c0_132, %c32_133] : memref<16x64xf32, #tpu.memory_space<vmem>>, vector<2x32xf32>
    tpu.vector_store %arg6[%c0_132, %c32_133], %491 {strides = array<i32>} : memref<16x64xf32, #tpu.memory_space<vmem>>, vector<2x32xf32>,
    return
  }
  func.func @transform_0(%arg0: i32) -> (i32, i32) {
    %c0_i32 = arith.constant 0 : i32
    %c0_i32_0 = arith.constant 0 : i32
    %c0_i32_1 = arith.constant 0 : i32
    return %c0_i32, %c0_i32_0 : i32, i32
  }
  func.func @transform_1(%arg0: i32) -> (i32, i32) {
    %c0_i32 = arith.constant 0 : i32
    %c0_i32_0 = arith.constant 0 : i32
    %c0_i32_1 = arith.constant 0 : i32
    return %c0_i32, %c0_i32_0 : i32, i32
  }
  func.func @transform_2(%arg0: i32) -> (i32, i32) {
    %c0_i32 = arith.constant 0 : i32
    %c0_i32_0 = arith.constant 0 : i32
    %c0_i32_1 = arith.constant 0 : i32
    return %c0_i32, %c0_i32_0 : i32, i32
  }
  func.func @transform_3(%arg0: i32) -> (i32, i32) {
    %c0_i32 = arith.constant 0 : i32
    %c0_i32_0 = arith.constant 0 : i32
    %c0_i32_1 = arith.constant 0 : i32
    return %c0_i32, %c0_i32_0 : i32, i32
  }
  func.func @transform_4(%arg0: i32) -> (i32, i32) {
    %c0_i32 = arith.constant 0 : i32
    %c0_i32_0 = arith.constant 0 : i32
    %c0_i32_1 = arith.constant 0 : i32
    return %c0_i32, %c0_i32_0 : i32, i32
  }
  func.func @transform_5(%arg0: i32) -> (i32, i32) {
    %c0_i32 = arith.constant 0 : i32
    %c0_i32_0 = arith.constant 0 : i32
    %c0_i32_1 = arith.constant 0 : i32
    return %c0_i32, %c0_i32_0 : i32, i32
  }
}

module attributes {stable_mosaic.version = 11 : i64} {
  func.func @_linear_kernel(%arg0: i32, %arg1: memref<16x64xf32, #tpu.memory_space<vmem>>, %arg2: memref<64x128xbf16, #tpu.memory_space<vmem>>, %arg3: memref<1x128xf32, #tpu.memory_space<vmem>>, %arg4: memref<16x128xf32, #tpu.memory_space<vmem>>) attributes {dimension_semantics = [#tpu.dimension_semantics<arbitrary>], iteration_bounds = array<i64: 1>, scalar_prefetch = 0 : i64, scratch_operands = 0 : i64, tpu.core_type = #tpu.core_type<tc>, window_params = [{pipeline_mode = #tpu.pipeline_mode<synchronous>, transform_indices = @transform_0, window_bounds = array<i64: 16, 64>}, {pipeline_mode = #tpu.pipeline_mode<synchronous>, transform_indices = @transform_1, window_bounds = array<i64: 64, 128>}, {pipeline_mode = #tpu.pipeline_mode<synchronous>, transform_indices = @transform_2, window_bounds = array<i64: 1, 128>}, {pipeline_mode = #tpu.pipeline_mode<synchronous>, transform_indices = @transform_3, window_bounds = array<i64: 16, 128>}]} {
    %c0 = arith.constant 0 : index
    %c0_0 = arith.constant 0 : index
    %0 = vector.load %arg1[%c0, %c0_0] : memref<16x64xf32, #tpu.memory_space<vmem>>, vector<16x64xf32>
    %1 = arith.truncf %0 : vector<16x64xf32> to vector<16x64xbf16>
    %c0_1 = arith.constant 0 : index
    %c0_2 = arith.constant 0 : index
    %2 = vector.load %arg2[%c0_1, %c0_2] : memref<64x128xbf16, #tpu.memory_space<vmem>>, vector<64x128xbf16>
    %cst = arith.constant dense<0.000000e+00> : vector<16x128xf32>
    %3 = tpu.matmul %1, %2, %cst {dimension_numbers = #tpu.dot_dimension_numbers<[1], [0], [0], [1], [0, 0, 1, 1], [], []>} : vector<16x64xbf16>, vector<64x128xbf16>, vector<16x128xf32> -> vector<16x128xf32>
    %c0_3 = arith.constant 0 : index
    %c0_4 = arith.constant 0 : index
    %4 = vector.load %arg3[%c0_3, %c0_4] : memref<1x128xf32, #tpu.memory_space<vmem>>, vector<1x128xf32>
    %5 = vector.broadcast %4 : vector<1x128xf32> to vector<16x128xf32>
    %6 = arith.addf %3, %5 : vector<16x128xf32>
    %c0_5 = arith.constant 0 : index
    %c0_6 = arith.constant 0 : index
    %7 = vector.load %arg4[%c0_5, %c0_6] : memref<16x128xf32, #tpu.memory_space<vmem>>, vector<16x128xf32>
    tpu.vector_store %arg4[%c0_5, %c0_6], %6 {strides = array<i32>} : memref<16x128xf32, #tpu.memory_space<vmem>>, vector<16x128xf32>,
    return
  }
  func.func @transform_0(%arg0: i32) -> (i32, i32) {
    %c0_i32 = arith.constant 0 : i32
    %c0_i32_0 = arith.constant 0 : i32
    %c0_i32_1 = arith.constant 0 : i32
    return %c0_i32, %c0_i32_0 : i32, i32
  }
  func.func @transform_1(%arg0: i32) -> (i32, i32) {
    %c0_i32 = arith.constant 0 : i32
    %c0_i32_0 = arith.constant 0 : i32
    %c0_i32_1 = arith.constant 0 : i32
    return %c0_i32, %c0_i32_0 : i32, i32
  }
  func.func @transform_2(%arg0: i32) -> (i32, i32) {
    %c0_i32 = arith.constant 0 : i32
    %c0_i32_0 = arith.constant 0 : i32
    %c0_i32_1 = arith.constant 0 : i32
    return %c0_i32, %c0_i32_0 : i32, i32
  }
  func.func @transform_3(%arg0: i32) -> (i32, i32) {
    %c0_i32 = arith.constant 0 : i32
    %c0_i32_0 = arith.constant 0 : i32
    %c0_i32_1 = arith.constant 0 : i32
    return %c0_i32, %c0_i32_0 : i32, i32
  }
}

</mosaic_0001>

<bundles_post_ra>
// kernel: rnn_model_forward.9
= control target key start
LH: loop header
LB: loop body
LE: loop exit
PB: predicated region body
PF: predicated region fallthrough
CT: control target
= control target key end

     0   :  { %v137_v0 = vmov 0.0   ;;  %vm138_vm0 = vmmov 0   ;;  %vm57_vm1 = vcmask 523264   ;;  %s186_s1 = inlined_call_operand.vmem [shape: bf16[64,128], index: 1, kind: input, shape index: {}]   ;;  %s187_s0 = inlined_call_operand.vmem [shape: f32[16,64], index: 0, kind: input, shape index: {}]   ;;  %s188_s2 = inlined_call_operand.vmem [shape: f32[1,128], index: 2, kind: input, shape index: {}]   ;;  %s189_s3 = inlined_call_operand.vmem [shape: f32[16,128], index: 3, kind: output, shape index: {}]  }
   0x1   :  { %119 = vmatprep.subr.bf16.mxu0 %v137_v0  ;;  %v133_v1 = vld [vmem:[%s186_s1 + $0x18] sm:$0xff]   ;;  %127 = vmatprep.mubr.msk.bf16.mxu0 %vm138_vm0, %v137_v0  ;;  %v134_v2 = vld [vmem:[%s186_s1 + $0x10] sm:$0xff]   ;;  %v135_v3 = vld [vmem:[%s186_s1 + $0x8] sm:$0xff]  }
   0x2   :  { %120 = vmatpush3.bf16.msra.mxu0 %v133_v1  ;;  %v136_v4 = vld [vmem:[%s186_s1] sm:$0xff]   ;;  %v16_v6 = vld [vmem:[%s187_s0 + $0x8] sm:$0xff] }
   0x3   :  { %121 = vmatprep.subr.bf16.mxu0 %v137_v0  ;;  %v15_v5 = vld [vmem:[%s187_s0] sm:$0xff] }
   0x4   :  { %v17_v7 = vpack.c.bf16 %v16_v6, %v15_v5  ;;  %v108_v8 = vld [vmem:[%s188_s2] ss:$0 sm:$0xff] }
   0x6   :  { %122 = vmatpush3.bf16.msra.mxu0 %v134_v2 }
   0x7   :  { %123 = vmatprep.subr.bf16.mxu0 %v137_v0 }
   0xa   :  { %124 = vmatpush3.bf16.msra.mxu0 %v135_v3 }
   0xb   :  { %125 = vmatprep.subr.bf16.mxu0 %v137_v0 }
   0xe   :  { %126 = vmatpush3.bf16.msra.mxu0 %v136_v4 }
  0x11   :  { %128 = vmatmul.mubr.msk.bf16.vlgmr.msra.gmra.mxu0 %vm57_vm1, %v17_v7 }
  0xd1   :  { %v95_v9 = vpop.f32.mrf.mxu0 }
  0xd2   :  { %v96_v10 = vadd.f32 %v108_v8, %v95_v9 }
  0xd3   :  { %v129_v11 = vpop.f32.mrf.mxu0 }
  0xd4   :  { %102 = vst [vmem:[%s189_s3] sm:$0xff] %v96_v10 }
  0xd5   :  { %v98_v12 = vpop.f32.mrf.mxu0 }
  0xd6   :  { %v99_v13 = vadd.f32 %v108_v8, %v98_v12 }
  0xd7   :  { %v130_v14 = vpop.f32.mrf.mxu0 }
  0xd8   :  { %103 = vst [vmem:[%s189_s3 + $0x8] sm:$0xff] %v99_v13 }

// kernel: rnn_model_forward.5
= control target key start
LH: loop header
LB: loop body
LE: loop exit
PB: predicated region body
PF: predicated region fallthrough
CT: control target
= control target key end

     0   :  { %v1823_v1 = vmov 0.0   ;;  %v1824_v2 = vmov 0   ;;  %vm1825_vm0 = vmmov 0   ;;  %vm48_vm1 = vcmask 130048   ;;  %s1827_s7 = smov 32   ;;  %s2271_s1 = inlined_call_operand.vmem [shape: bf16[16,256], index: 1, kind: input, shape index: {}]   ;;  %s2272_s2 = inlined_call_operand.vmem [shape: bf16[32,128], index: 2, kind: input, shape index: {}]   ;;  %s2273_s0 = inlined_call_operand.vmem [shape: f32[16,16], index: 0, kind: input, shape index: {}]   ;;  %s2274_s3 = inlined_call_operand.vmem [shape: bf16[32,128], index: 3, kind: input, shape index: {}]   ;;  %s2275_s4 = inlined_call_operand.vmem [shape: f32[1,256], index: 4, kind: input, shape index: {}]   ;;  %s2276_s5 = inlined_call_operand.vmem [shape: f32[16,64], index: 5, kind: output, shape index: {}]  }
   0x1   :  { %v1688_v0 = vld [vmem:[%s2271_s1 + $0x4] ss:$8 sps:$4 sm:$0xff]   ;;  %1555 = vmatprep.subr.bf16.mxu1 %v1823_v1  ;;  %84 = vmatprep.mubr.bf16.mxu0 %v1824_v2  ;;  %v1690_v3 = vld [vmem:[%s2271_s1] ss:$8 sps:$4 sm:$0xff]   ;;  %v28_v11 = vlaneseq  ;;  %vm121_vm2 = vcmask 261120   ;;  %vm274_vm3 = vcmask 254976  }
   0x2   :  { %1559 = vmatprep.mubr.msk.bf16.mxu1 %vm1825_vm0, %v1823_v1  ;;  %66 = vmatprep.subr.bf16.mxu0 %v1688_v0  ;;  %v1870_v4 = vld [vmem:[%s2272_s2 + $0x8] sm:$0xff]   ;;  %v21_v5 = vld [vmem:[%s2273_s0] sm:$0xff]  ;;  %vm445_vm4 = vcmask 257026   ;;  %vm280_vm5 = vcmask 523526   ;;  %vm617_vm6 = vcmask 259076   ;;  %vm451_vm7 = vcmask 521476  }
   0x3   :  { %v22_v6 = vld [vmem:[%s2273_s0 + $0x8] sm:$0xff]  ;;  %67 = vmatpush1.bf16.msra.mxu0 %v1690_v3  ;;  %1556 = vmatpush3.bf16.msra.mxu1 %v1870_v4  ;;  %v1888_v9 = vld [vmem:[%s2272_s2] sm:$0xff]   ;;  %v29_v12 = vshrl.u32 %v28_v11, 7  ;;  %vm786_vm8 = vcmask 261126   ;;  %vm623_vm9 = vcmask 519426   ;;  %vm792_vm10 = vcmask 517376  }
   0x4   :  { %v23_v7 = vpack.c.bf16 %v22_v6, %v21_v5  ;;  %v1881_v8 = vld [vmem:[%s2274_s3 + $0x8] sm:$0xff]   ;;  %1563 = vmatprep.subr.bf16.mxu0 %v1823_v1  ;;  %1557 = vmatprep.subr.bf16.mxu1 %v1823_v1  ;;  %v1895_v10 = vld [vmem:[%s2274_s3] sm:$0xff]  }
   0x5   :  { %v30_v13 = vsub.s32 0, %v29_v12  ;;  %v26_v14 = vld [vmem:[%s2275_s4] sm:$0x3]  ;;  %v34_v15 = vsub.s32 1, %v29_v12  ;;  %s1826_s4 = smov 64  }
   0x6   :  { %1472 = vmatmul.mubr.msk.bf16.vlgmr.msra.gmra.mxu0 %vm48_vm1, %v23_v7 }
   0x7   :  { %1564 = vmatpush3.bf16.msra.mxu0 %v1881_v8  ;;  %1567 = vmatprep.mubr.msk.bf16.mxu0 %vm1825_vm0, %v1823_v1  ;;  %v31_v16 = vrot.slane %v26_v14, %v30_v13  ;;  %v35_v17 = vrot.slane %v26_v14, %v34_v15 }
   0x8   :  { %1558 = vmatpush3.bf16.msra.mxu1 %v1888_v9  ;;  %1565 = vmatprep.subr.bf16.mxu0 %v1823_v1 }
   0x9   :  { %1571 = vmatprep.subr.bf16.mxu1 %v1823_v1 }
   0xb   :  { %1566 = vmatpush3.bf16.msra.mxu0 %v1895_v10  ;;  %1560 = vmatmul.mubr.bf16.vlgmr.msra.gmra.mxu1 %v1824_v2 }
   0xc   :  { %1572 = vmatpush3.bf16.msra.mxu1 %v1870_v4  ;;  %1575 = vmatprep.mubr.msk.bf16.mxu1 %vm1825_vm0, %v1823_v1 }
   0xd   :  { %1573 = vmatprep.subr.bf16.mxu1 %v1823_v1  ;;  %1579 = vmatprep.subr.bf16.mxu0 %v1823_v1 }
   0xe   :  { %1568 = vmatmul.mubr.bf16.vlgmr.msra.gmra.mxu0 %v1824_v2 }
   0xf   :  { %1580 = vmatpush3.bf16.msra.mxu0 %v1881_v8  ;;  %1583 = vmatprep.mubr.msk.bf16.mxu0 %vm1825_vm0, %v1823_v1 }
  0x10   :  { %1574 = vmatpush3.bf16.msra.mxu1 %v1888_v9  ;;  %1581 = vmatprep.subr.bf16.mxu0 %v1823_v1 }
  0x11   :  { %1587 = vmatprep.subr.bf16.mxu1 %v1823_v1 }
  0x13   :  { %1582 = vmatpush3.bf16.msra.mxu0 %v1895_v10 }
  0x14   :  { %1595 = vmatprep.subr.bf16.mxu0 %v1823_v1 }
  0xc6   :  { %v86_v18 = vpop.f32.mrf.mxu0 }
  0xc7   :  { %v87_v19 = vadd.f32 %v86_v18, %v31_v16 }
  0xc8   :  { %v88_v20 = vpop.f32.mrf.mxu0 }
  0xc9   :  { %95 = vst [vmem:[#allocation2 + $0x10] sm:$0xff] %v87_v19  ;;  %v89_v21 = vadd.f32 %v88_v20, %v35_v17 }
  0xca   :  { %v90_v22 = vpop.f32.mrf.mxu0 }
  0xcb   :  { %96 = vst [vmem:[#allocation2] sm:$0xff] %v89_v21  ;;  %v91_v23 = vadd.f32 %v90_v22, %v31_v16  ;;  %v159_v24 = vpop.f32.mrf.mxu1 }
  0xcc   :  { %v92_v25 = vpop.f32.mrf.mxu0 }
  0xcd   :  { %97 = vst [vmem:[#allocation2 + $0x18] sm:$0xff] %v91_v23  ;;  %v93_v26 = vadd.f32 %v92_v25, %v35_v17  ;;  %v1561_v27 = vpop.f32.mrf.mxu1 }
  0xce   :  { %v236_v28 = vpop.f32.mrf.mxu0 }
  0xcf   :  { %98 = vst [vmem:[#allocation2 + $0x8] sm:$0xff] %v93_v26  ;;  %v162_v29 = vpop.f32.mrf.mxu1  ;;  %v243_v35 = vrot.slane %v236_v28, 2 }
  0xd0   :  { %v107_v30 = vld [vmem:[#allocation2 + $0x10] sm:$0x3]  ;;  %v1569_v31 = vpop.f32.mrf.mxu0  ;;  %v282_v13 = vld [vmem:[#allocation2 + $0x10] sm:$0xc] }
  0xd1   :  { %v165_v32 = vadd.f32 %v159_v24, %v107_v30  ;;  %v1562_v33 = vpop.f32.mrf.mxu1 }
  0xd2   :  { %v239_v34 = vpop.f32.mrf.mxu0 }
  0xd3   :  { %1695 = vtanh.f32 %v165_v32  ;;  %v1475_v41 = vmul.f32 -1.442695, %v165_v32 }
  0xd4   :  { %v1570_v36 = vpop.f32.mrf.mxu0 }
  0xd6   :  { %v108_v37 = vld [vmem:[#allocation2 + $0x8] sm:$0xc0]  ;;  %v283_v20 = vld [vmem:[#allocation2 + $0x8] sm:$0x30] }
  0xd7   :  { %v245_v38 = vadd.f32 %v243_v35, %v108_v37 }
  0xd9   :  { %1697 = vtanh.f32 %v245_v38  ;;  %v1478_v42 = vmul.f32 -1.442695, %v245_v38 }
  0xda   :  { %1699 = vpow2.f32 %v1475_v41 }
  0xdb   :  { %1701 = vpow2.f32 %v1478_v42 }
  0xe0   :  { %v1696_v39 = vpop.eup %1695 }
  0xe1   :  { %175 = vrot.lane.b32.xlu0 %v1696_v39, %s1826_s4 }
  0xe6   :  { %v1698_v40 = vpop.eup %1697 }
  0xe7   :  { %255 = vrot.lane.b32.xlu0 %v1698_v40, %s1826_s4  ;;  %v1700_v43 = vpop.eup %1699 }
  0xe8   :  { %v169_v44 = vadd.f32 1.0, %v1700_v43  ;;  %v1702_v45 = vpop.eup %1701 }
  0xe9   :  { %v249_v46 = vadd.f32 1.0, %v1702_v45 }
  0xea   :  { %1703 = vrcp.f32 %v169_v44 }
  0xeb   :  { %1705 = vrcp.f32 %v249_v46 }
  0xf7   :  { %v1704_v47 = vpop.eup %1703 }
  0xf8   :  { %v1706_v50 = vpop.eup %1705  ;;  %v173_v53 = vmul.f32 0.0, %v1704_v47 }
  0xf9   :  { %v253_v56 = vmul.f32 0.0, %v1706_v50 }
 0x153   :  { %v176_v48 = vpop.permute.xlu0 %175 }
 0x154   :  { %v178_v49 = vmul.f32 %v1704_v47, %v176_v48 }
 0x156   :  { %180 = vrot.lane.b32.xlu1 %v178_v49, %s1827_s7 }
 0x159   :  { %v256_v51 = vpop.permute.xlu0 %255 }
 0x15a   :  { %v258_v52 = vmul.f32 %v1706_v50, %v256_v51 }
 0x15c   :  { %260 = vrot.lane.b32.xlu1 %v258_v52, %s1827_s7 }
 0x1c8   :  { %v181_v54 = vpop.permute.xlu1 %180 }
 0x1c9   :  { %v1923_v55 = vadd.f32 %v181_v54, %v173_v53 }
 0x1cb   :  { %1707 = vtanh.f32 %v1923_v55  ;;  %v343_v39 = vrot.slane %v1923_v55, 6 }
 0x1ce   :  { %v261_v57 = vpop.permute.xlu1 %260 }
 0x1cf   :  { %v1926_v58 = vadd.f32 %v261_v57, %v253_v56 }
 0x1d1   :  { %1709 = vtanh.f32 %v1926_v58  ;;  %v422_v43 = vrot.slane %v1926_v58, 2 }
 0x1d8   :  { %v1708_v59 = vpop.eup %1707 }
 0x1d9   :  { %186 = vrot.lane.b32.xlu0 %v1708_v59, %s1826_s4 }
 0x1de   :  { %v1710_v60 = vpop.eup %1709 }
 0x1df   :  { %266 = vrot.lane.b32.xlu1 %v1710_v60, %s1826_s4 }
 0x24b   :  { %v187_v61 = vpop.permute.xlu0 %186 }
 0x24c   :  { %v1931_v62 = vmul.f32 %v1704_v47, %v187_v61  ;;  %v453_v61 = vld [vmem:[#allocation2 + $0x10] sm:$0x30] }
 0x24e   :  { %v284_v63 = vpack.c.bf16 %v1931_v62, %v1931_v62 }
 0x250   :  { %286 = vrot.lane.b32.xlu0 %v284_v63, %s1827_s7 }
 0x251   :  { %v267_v0 = vpop.permute.xlu1 %266 }
 0x252   :  { %v1936_v2 = vmul.f32 %v1706_v50, %v267_v0 }
 0x254   :  { %v362_v3 = vpack.c.bf16 %v1936_v2, %v1936_v2 }
 0x256   :  { %v364_v5 = vrot.slane %v362_v3, 3 }
 0x258   :  { %365 = vrot.lane.b32.xlu1 %v364_v5, %s1827_s7 }
 0x2c2   :  { %v287_v6 = vpop.permute.xlu0 %286 }
 0x2c3   :  { %1576 = vmatmul.mubr.msk.bf16.vlgmr.msra.gmra.mxu1 %vm121_vm2, %v287_v6 }
 0x2c4   :  { %1588 = vmatpush3.bf16.msra.mxu1 %v1870_v4  ;;  %1591 = vmatprep.mubr.msk.bf16.mxu1 %vm1825_vm0, %v1823_v1 }
 0x2c5   :  { %1589 = vmatprep.subr.bf16.mxu1 %v1823_v1 }
 0x2c8   :  { %1590 = vmatpush3.bf16.msra.mxu1 %v1888_v9 }
 0x2c9   :  { %1603 = vmatprep.subr.bf16.mxu1 %v1823_v1 }
 0x2ca   :  { %v366_v7 = vpop.permute.xlu1 %365 }
 0x2cb   :  { %1584 = vmatmul.mubr.msk.bf16.vlgmr.msra.gmra.mxu0 %vm121_vm2, %v366_v7 }
 0x2cc   :  { %1596 = vmatpush3.bf16.msra.mxu0 %v1881_v8  ;;  %1599 = vmatprep.mubr.msk.bf16.mxu0 %vm1825_vm0, %v1823_v1 }
 0x2cd   :  { %1597 = vmatprep.subr.bf16.mxu0 %v1823_v1 }
 0x2d0   :  { %1598 = vmatpush3.bf16.msra.mxu0 %v1895_v10 }
 0x2d1   :  { %1611 = vmatprep.subr.bf16.mxu0 %v1823_v1 }
 0x383   :  { %v325_v11 = vpop.f32.mrf.mxu1 }
 0x384   :  { %v332_v12 = vrot.slane %v325_v11, 6  ;;  %v454_v11 = vld [vmem:[#allocation2 + $0x8] sm:$0xc] }
 0x385   :  { %v1577_v14 = vpop.f32.mrf.mxu1 }
 0x386   :  { %v334_v15 = vadd.f32 %v332_v12, %v282_v13 }
 0x387   :  { %v328_v16 = vpop.f32.mrf.mxu1 }
 0x388   :  { %1711 = vtanh.f32 %v334_v15  ;;  %v1480_v27 = vmul.f32 -1.442695, %v334_v15 }
 0x389   :  { %v1578_v17 = vpop.f32.mrf.mxu1 }
 0x38b   :  { %v404_v18 = vpop.f32.mrf.mxu0 }
 0x38c   :  { %v411_v19 = vrot.slane %v404_v18, 4 }
 0x38d   :  { %v1585_v21 = vpop.f32.mrf.mxu0 }
 0x38e   :  { %v413_v22 = vadd.f32 %v411_v19, %v283_v20 }
 0x38f   :  { %v407_v23 = vpop.f32.mrf.mxu0 }
 0x390   :  { %1713 = vtanh.f32 %v413_v22  ;;  %v1482_v28 = vmul.f32 -1.442695, %v413_v22 }
 0x391   :  { %v1586_v24 = vpop.f32.mrf.mxu0  ;;  %1715 = vpow2.f32 %v1480_v27 }
 0x392   :  { %1717 = vpow2.f32 %v1482_v28 }
 0x395   :  { %v1712_v25 = vpop.eup %1711 }
 0x396   :  { %347 = vrot.lane.b32.xlu0 %v1712_v25, %s1826_s4 }
 0x39d   :  { %v1714_v26 = vpop.eup %1713 }
 0x39e   :  { %426 = vrot.lane.b32.xlu1 %v1714_v26, %s1826_s4  ;;  %v1716_v29 = vpop.eup %1715 }
 0x39f   :  { %v338_v30 = vadd.f32 1.0, %v1716_v29  ;;  %v1718_v31 = vpop.eup %1717 }
 0x3a0   :  { %v417_v32 = vadd.f32 1.0, %v1718_v31 }
 0x3a1   :  { %1719 = vrcp.f32 %v338_v30 }
 0x3a2   :  { %1721 = vrcp.f32 %v417_v32 }
 0x3ae   :  { %v1720_v33 = vpop.eup %1719 }
 0x3af   :  { %v1722_v36 = vpop.eup %1721  ;;  %v345_v40 = vmul.f32 %v1720_v33, %v343_v39 }
 0x3b0   :  { %v424_v44 = vmul.f32 %v1722_v36, %v422_v43 }
 0x408   :  { %v348_v34 = vpop.permute.xlu0 %347 }
 0x409   :  { %v350_v35 = vmul.f32 %v1720_v33, %v348_v34 }
 0x40b   :  { %352 = vrot.lane.b32.xlu0 %v350_v35, %s1827_s7 }
 0x410   :  { %v427_v37 = vpop.permute.xlu1 %426 }
 0x411   :  { %v429_v38 = vmul.f32 %v1722_v36, %v427_v37 }
 0x413   :  { %431 = vrot.lane.b32.xlu1 %v429_v38, %s1827_s7 }
 0x47d   :  { %v353_v41 = vpop.permute.xlu0 %352 }
 0x47e   :  { %v1960_v42 = vadd.f32 %v353_v41, %v345_v40 }
 0x480   :  { %1723 = vtanh.f32 %v1960_v42  ;;  %v515_v30 = vrot.slane %v1960_v42, 6 }
 0x485   :  { %v432_v45 = vpop.permute.xlu1 %431 }
 0x486   :  { %v1964_v46 = vadd.f32 %v432_v45, %v424_v44 }
 0x488   :  { %1725 = vtanh.f32 %v1964_v46  ;;  %v594_v34 = vrot.slane %v1964_v46, 2 }
 0x48d   :  { %v1724_v47 = vpop.eup %1723 }
 0x48e   :  { %358 = vrot.lane.b32.xlu0 %v1724_v47, %s1826_s4 }
 0x495   :  { %v1726_v48 = vpop.eup %1725 }
 0x496   :  { %437 = vrot.lane.b32.xlu1 %v1726_v48, %s1826_s4 }
 0x500   :  { %v359_v49 = vpop.permute.xlu0 %358 }
 0x501   :  { %v1969_v50 = vmul.f32 %v1720_v33, %v359_v49 }
 0x503   :  { %v455_v51 = vpack.c.bf16 %v1969_v50, %v1969_v50 }
 0x505   :  { %v457_v52 = vrot.slane %v455_v51, 1 }
 0x507   :  { %458 = vrot.lane.b32.xlu0 %v457_v52, %s1827_s7 }
 0x508   :  { %v438_v53 = vpop.permute.xlu1 %437 }
 0x509   :  { %v1974_v54 = vmul.f32 %v1722_v36, %v438_v53  ;;  %v625_v53 = vld [vmem:[#allocation2 + $0x10] sm:$0xc0] }
 0x50b   :  { %v534_v55 = vpack.c.bf16 %v1974_v54, %v1974_v54 }
 0x50d   :  { %v536_v56 = vrot.slane %v534_v55, 2 }
 0x50f   :  { %537 = vrot.lane.b32.xlu1 %v536_v56, %s1827_s7 }
 0x579   :  { %v459_v57 = vpop.permute.xlu0 %458 }
 0x57a   :  { %1592 = vmatmul.mubr.msk.bf16.vlgmr.msra.gmra.mxu1 %vm121_vm2, %v459_v57 }
 0x57b   :  { %1604 = vmatpush3.bf16.msra.mxu1 %v1870_v4  ;;  %1607 = vmatprep.mubr.msk.bf16.mxu1 %vm1825_vm0, %v1823_v1 }
 0x57c   :  { %1605 = vmatprep.subr.bf16.mxu1 %v1823_v1 }
 0x57f   :  { %1606 = vmatpush3.bf16.msra.mxu1 %v1888_v9 }
 0x580   :  { %1619 = vmatprep.subr.bf16.mxu1 %v1823_v1 }
 0x581   :  { %v538_v58 = vpop.permute.xlu1 %537 }
 0x582   :  { %1600 = vmatmul.mubr.msk.bf16.vlgmr.msra.gmra.mxu0 %vm121_vm2, %v538_v58 }
 0x583   :  { %1612 = vmatpush3.bf16.msra.mxu0 %v1881_v8  ;;  %1615 = vmatprep.mubr.msk.bf16.mxu0 %vm1825_vm0, %v1823_v1 }
 0x584   :  { %1613 = vmatprep.subr.bf16.mxu0 %v1823_v1 }
 0x587   :  { %1614 = vmatpush3.bf16.msra.mxu0 %v1895_v10 }
 0x588   :  { %1627 = vmatprep.subr.bf16.mxu0 %v1823_v1 }
 0x63a   :  { %v497_v59 = vpop.f32.mrf.mxu1 }
 0x63b   :  { %v504_v60 = vrot.slane %v497_v59, 4  ;;  %v626_v59 = vld [vmem:[#allocation2 + $0x8] sm:$0x3] }
 0x63c   :  { %v1593_v63 = vpop.f32.mrf.mxu1 }
 0x63d   :  { %v506_v0 = vadd.f32 %v504_v60, %v453_v61 }
 0x63e   :  { %v500_v3 = vpop.f32.mrf.mxu1 }
 0x63f   :  { %1727 = vtanh.f32 %v506_v0  ;;  %v1484_v18 = vmul.f32 -1.442695, %v506_v0 }
 0x640   :  { %v1594_v5 = vpop.f32.mrf.mxu1 }
 0x642   :  { %v576_v6 = vpop.f32.mrf.mxu0 }
 0x643   :  { %v583_v7 = vrot.slane %v576_v6, 6 }
 0x644   :  { %v1601_v12 = vpop.f32.mrf.mxu0 }
 0x645   :  { %v585_v13 = vadd.f32 %v583_v7, %v454_v11 }
 0x646   :  { %v579_v14 = vpop.f32.mrf.mxu0 }
 0x647   :  { %1729 = vtanh.f32 %v585_v13  ;;  %v1486_v19 = vmul.f32 -1.442695, %v585_v13 }
 0x648   :  { %v1602_v15 = vpop.f32.mrf.mxu0  ;;  %1731 = vpow2.f32 %v1484_v18 }
 0x649   :  { %1733 = vpow2.f32 %v1486_v19 }
 0x64c   :  { %v1728_v16 = vpop.eup %1727 }
 0x64d   :  { %519 = vrot.lane.b32.xlu0 %v1728_v16, %s1826_s4 }
 0x654   :  { %v1730_v17 = vpop.eup %1729 }
 0x655   :  { %598 = vrot.lane.b32.xlu1 %v1730_v17, %s1826_s4  ;;  %v1732_v20 = vpop.eup %1731 }
 0x656   :  { %v510_v21 = vadd.f32 1.0, %v1732_v20  ;;  %v1734_v22 = vpop.eup %1733 }
 0x657   :  { %v589_v23 = vadd.f32 1.0, %v1734_v22 }
 0x658   :  { %1735 = vrcp.f32 %v510_v21 }
 0x659   :  { %1737 = vrcp.f32 %v589_v23 }
 0x665   :  { %v1736_v24 = vpop.eup %1735 }
 0x666   :  { %v1738_v27 = vpop.eup %1737  ;;  %v517_v31 = vmul.f32 %v1736_v24, %v515_v30 }
 0x667   :  { %v596_v35 = vmul.f32 %v1738_v27, %v594_v34 }
 0x6bf   :  { %v520_v25 = vpop.permute.xlu0 %519 }
 0x6c0   :  { %v522_v26 = vmul.f32 %v1736_v24, %v520_v25 }
 0x6c2   :  { %524 = vrot.lane.b32.xlu0 %v522_v26, %s1827_s7 }
 0x6c7   :  { %v599_v28 = vpop.permute.xlu1 %598 }
 0x6c8   :  { %v601_v29 = vmul.f32 %v1738_v27, %v599_v28 }
 0x6ca   :  { %603 = vrot.lane.b32.xlu1 %v601_v29, %s1827_s7 }
 0x734   :  { %v525_v32 = vpop.permute.xlu0 %524 }
 0x735   :  { %v1998_v33 = vadd.f32 %v525_v32, %v517_v31 }
 0x737   :  { %1739 = vtanh.f32 %v1998_v33  ;;  %v687_v22 = vrot.slane %v1998_v33, 6 }
 0x73c   :  { %v604_v36 = vpop.permute.xlu1 %603 }
 0x73d   :  { %v2002_v37 = vadd.f32 %v604_v36, %v596_v35 }
 0x73f   :  { %1741 = vtanh.f32 %v2002_v37  ;;  %v763_v26 = vrot.slane %v2002_v37, 2 }
 0x744   :  { %v1740_v38 = vpop.eup %1739 }
 0x745   :  { %530 = vrot.lane.b32.xlu0 %v1740_v38, %s1826_s4 }
 0x74c   :  { %v1742_v39 = vpop.eup %1741 }
 0x74d   :  { %609 = vrot.lane.b32.xlu1 %v1742_v39, %s1826_s4 }
 0x7b7   :  { %v531_v40 = vpop.permute.xlu0 %530 }
 0x7b8   :  { %v2007_v41 = vmul.f32 %v1736_v24, %v531_v40 }
 0x7ba   :  { %v627_v42 = vpack.c.bf16 %v2007_v41, %v2007_v41 }
 0x7bc   :  { %v629_v43 = vrot.slane %v627_v42, 2  ;;  %v794_v42 = vld [vmem:[#allocation2 + $0x18] sm:$0x3] }
 0x7be   :  { %630 = vrot.lane.b32.xlu0 %v629_v43, %s1827_s7 }
 0x7bf   :  { %v610_v44 = vpop.permute.xlu1 %609 }
 0x7c0   :  { %v2012_v45 = vmul.f32 %v1738_v27, %v610_v44 }
 0x7c2   :  { %v706_v46 = vpack.c.bf16 %v2012_v45, %v2012_v45 }
 0x7c4   :  { %v708_v47 = vrot.slane %v706_v46, 1 }
 0x7c6   :  { %709 = vrot.lane.b32.xlu1 %v708_v47, %s1827_s7 }
 0x830   :  { %v631_v48 = vpop.permute.xlu0 %630 }
 0x831   :  { %1608 = vmatmul.mubr.msk.bf16.vlgmr.msra.gmra.mxu1 %vm121_vm2, %v631_v48 }
 0x832   :  { %1620 = vmatpush3.bf16.msra.mxu1 %v1870_v4  ;;  %1623 = vmatprep.mubr.msk.bf16.mxu1 %vm1825_vm0, %v1823_v1 }
 0x833   :  { %1621 = vmatprep.subr.bf16.mxu1 %v1823_v1 }
 0x836   :  { %1622 = vmatpush3.bf16.msra.mxu1 %v1888_v9 }
 0x837   :  { %1635 = vmatprep.subr.bf16.mxu1 %v1823_v1 }
 0x838   :  { %v710_v49 = vpop.permute.xlu1 %709 }
 0x839   :  { %1616 = vmatmul.mubr.msk.bf16.vlgmr.msra.gmra.mxu0 %vm121_vm2, %v710_v49 }
 0x83a   :  { %1628 = vmatpush3.bf16.msra.mxu0 %v1881_v8  ;;  %1631 = vmatprep.mubr.msk.bf16.mxu0 %vm1825_vm0, %v1823_v1 }
 0x83b   :  { %1629 = vmatprep.subr.bf16.mxu0 %v1823_v1 }
 0x83e   :  { %1630 = vmatpush3.bf16.msra.mxu0 %v1895_v10 }
 0x83f   :  { %1643 = vmatprep.subr.bf16.mxu0 %v1823_v1 }
 0x8f1   :  { %v669_v51 = vpop.f32.mrf.mxu1 }
 0x8f2   :  { %v676_v52 = vrot.slane %v669_v51, 2  ;;  %v795_v51 = vld [vmem:[#allocation2] sm:$0xc0] }
 0x8f3   :  { %v1609_v55 = vpop.f32.mrf.mxu1 }
 0x8f4   :  { %v678_v56 = vadd.f32 %v676_v52, %v625_v53 }
 0x8f5   :  { %v672_v57 = vpop.f32.mrf.mxu1 }
 0x8f6   :  { %1743 = vtanh.f32 %v678_v56  ;;  %v1488_v7 = vmul.f32 -1.442695, %v678_v56 }
 0x8f7   :  { %v1610_v58 = vpop.f32.mrf.mxu1 }
 0x8f9   :  { %v748_v60 = vpop.f32.mrf.mxu0 }
 0x8fa   :  { %v754_v61 = vadd.f32 %v748_v60, %v626_v59 }
 0x8fb   :  { %v1617_v63 = vpop.f32.mrf.mxu0 }
 0x8fc   :  { %1745 = vtanh.f32 %v754_v61  ;;  %v1490_v11 = vmul.f32 -1.442695, %v754_v61 }
 0x8fd   :  { %v751_v0 = vpop.f32.mrf.mxu0  ;;  %1747 = vpow2.f32 %v1488_v7 }
 0x8fe   :  { %1749 = vpow2.f32 %v1490_v11 }
 0x8ff   :  { %v1618_v3 = vpop.f32.mrf.mxu0 }
 0x903   :  { %v1744_v5 = vpop.eup %1743 }
 0x904   :  { %691 = vrot.lane.b32.xlu0 %v1744_v5, %s1826_s4 }
 0x909   :  { %v1746_v6 = vpop.eup %1745 }
 0x90a   :  { %767 = vrot.lane.b32.xlu1 %v1746_v6, %s1826_s4  ;;  %v1748_v12 = vpop.eup %1747 }
 0x90b   :  { %v682_v13 = vadd.f32 1.0, %v1748_v12  ;;  %v1750_v14 = vpop.eup %1749 }
 0x90c   :  { %v758_v15 = vadd.f32 1.0, %v1750_v14 }
 0x90d   :  { %1751 = vrcp.f32 %v682_v13 }
 0x90e   :  { %1753 = vrcp.f32 %v758_v15 }
 0x91a   :  { %v1752_v16 = vpop.eup %1751 }
 0x91b   :  { %v1754_v19 = vpop.eup %1753  ;;  %v689_v23 = vmul.f32 %v1752_v16, %v687_v22 }
 0x91c   :  { %v765_v27 = vmul.f32 %v1754_v19, %v763_v26 }
 0x976   :  { %v692_v17 = vpop.permute.xlu0 %691 }
 0x977   :  { %v694_v18 = vmul.f32 %v1752_v16, %v692_v17 }
 0x979   :  { %696 = vrot.lane.b32.xlu0 %v694_v18, %s1827_s7 }
 0x97c   :  { %v768_v20 = vpop.permute.xlu1 %767 }
 0x97d   :  { %v770_v21 = vmul.f32 %v1754_v19, %v768_v20 }
 0x97f   :  { %772 = vrot.lane.b32.xlu1 %v770_v21, %s1827_s7 }
 0x9eb   :  { %v697_v24 = vpop.permute.xlu0 %696 }
 0x9ec   :  { %v2036_v25 = vadd.f32 %v697_v24, %v689_v23 }
 0x9ee   :  { %1755 = vtanh.f32 %v2036_v25  ;;  %v853_v15 = vrot.slane %v2036_v25, 6 }
 0x9f1   :  { %v773_v28 = vpop.permute.xlu1 %772 }
 0x9f2   :  { %v2040_v29 = vadd.f32 %v773_v28, %v765_v27 }
 0x9f4   :  { %1757 = vtanh.f32 %v2040_v29 }
 0x9fb   :  { %v1756_v30 = vpop.eup %1755 }
 0x9fc   :  { %702 = vrot.lane.b32.xlu0 %v1756_v30, %s1826_s4 }
 0xa01   :  { %v1758_v31 = vpop.eup %1757 }
 0xa02   :  { %778 = vrot.lane.b32.xlu1 %v1758_v31, %s1826_s4 }
 0xa6e   :  { %v703_v32 = vpop.permute.xlu0 %702 }
 0xa6f   :  { %v2045_v33 = vmul.f32 %v1752_v16, %v703_v32 }
 0xa71   :  { %v796_v34 = vpack.c.bf16 %v2045_v33, %v2045_v33 }
 0xa73   :  { %v798_v35 = vrot.slane %v796_v34, 3 }
 0xa74   :  { %v779_v36 = vpop.permute.xlu1 %778 }
 0xa75   :  { %v2049_v37 = vmul.f32 %v1754_v19, %v779_v36  ;;  %799 = vrot.lane.b32.xlu1 %v798_v35, %s1827_s7  ;;  %v931_v19 = vrot.slane %v2040_v29, 2 }
 0xa77   :  { %v872_v38 = vpack.c.bf16 %v2049_v37, %v2049_v37 }
 0xa79   :  { %874 = vrot.lane.b32.xlu0 %v872_v38, %s1827_s7  ;;  %v960_v38 = vld [vmem:[#allocation2 + $0x18] sm:$0xc] }
 0xae7   :  { %v800_v39 = vpop.permute.xlu1 %799 }
 0xae8   :  { %1624 = vmatmul.mubr.msk.bf16.vlgmr.msra.gmra.mxu1 %vm121_vm2, %v800_v39 }
 0xae9   :  { %1636 = vmatpush3.bf16.msra.mxu1 %v1870_v4  ;;  %1639 = vmatprep.mubr.msk.bf16.mxu1 %vm1825_vm0, %v1823_v1 }
 0xaea   :  { %1637 = vmatprep.subr.bf16.mxu1 %v1823_v1 }
 0xaeb   :  { %v875_v40 = vpop.permute.xlu0 %874 }
 0xaec   :  { %1632 = vmatmul.mubr.msk.bf16.vlgmr.msra.gmra.mxu0 %vm121_vm2, %v875_v40 }
 0xaed   :  { %1638 = vmatpush3.bf16.msra.mxu1 %v1888_v9  ;;  %1644 = vmatpush3.bf16.msra.mxu0 %v1881_v8 }
 0xaee   :  { %1645 = vmatprep.subr.bf16.mxu0 %v1823_v1  ;;  %1647 = vmatprep.mubr.msk.bf16.mxu0 %vm1825_vm0, %v1823_v1 }
 0xaef   :  { %1651 = vmatprep.subr.bf16.mxu1 %v1823_v1 }
 0xaf1   :  { %1646 = vmatpush3.bf16.msra.mxu0 %v1895_v10 }
 0xaf2   :  { %1659 = vmatprep.subr.bf16.mxu0 %v1823_v1 }
 0xba8   :  { %v838_v43 = vpop.f32.mrf.mxu1 }
 0xba9   :  { %v844_v44 = vadd.f32 %v838_v43, %v794_v42 }
 0xbaa   :  { %v1625_v46 = vpop.f32.mrf.mxu1 }
 0xbab   :  { %1759 = vtanh.f32 %v844_v44  ;;  %v1492_v60 = vmul.f32 -1.442695, %v844_v44 }
 0xbac   :  { %v841_v47 = vpop.f32.mrf.mxu1  ;;  %v913_v48 = vpop.f32.mrf.mxu0 }
 0xbad   :  { %v920_v49 = vrot.slane %v913_v48, 2  ;;  %v961_v47 = vld [vmem:[#allocation2] sm:$0x30] }
 0xbae   :  { %v1626_v52 = vpop.f32.mrf.mxu1  ;;  %v1633_v53 = vpop.f32.mrf.mxu0 }
 0xbaf   :  { %v922_v55 = vadd.f32 %v920_v49, %v795_v51 }
 0xbb0   :  { %v916_v56 = vpop.f32.mrf.mxu0 }
 0xbb1   :  { %1761 = vtanh.f32 %v922_v55  ;;  %v1494_v61 = vmul.f32 -1.442695, %v922_v55 }
 0xbb2   :  { %v1634_v57 = vpop.f32.mrf.mxu0  ;;  %1763 = vpow2.f32 %v1492_v60 }
 0xbb3   :  { %1765 = vpow2.f32 %v1494_v61 }
 0xbb8   :  { %v1760_v58 = vpop.eup %1759 }
 0xbb9   :  { %857 = vrot.lane.b32.xlu0 %v1760_v58, %s1826_s4 }
 0xbbe   :  { %v1762_v59 = vpop.eup %1761 }
 0xbbf   :  { %935 = vrot.lane.b32.xlu1 %v1762_v59, %s1826_s4  ;;  %v1764_v63 = vpop.eup %1763 }
 0xbc0   :  { %v848_v0 = vadd.f32 1.0, %v1764_v63  ;;  %v1766_v3 = vpop.eup %1765 }
 0xbc1   :  { %v926_v5 = vadd.f32 1.0, %v1766_v3 }
 0xbc2   :  { %1767 = vrcp.f32 %v848_v0 }
 0xbc3   :  { %1769 = vrcp.f32 %v926_v5 }
 0xbcf   :  { %v1768_v6 = vpop.eup %1767 }
 0xbd0   :  { %v1770_v12 = vpop.eup %1769  ;;  %v855_v16 = vmul.f32 %v1768_v6, %v853_v15 }
 0xbd1   :  { %v933_v20 = vmul.f32 %v1770_v12, %v931_v19 }
 0xc2b   :  { %v858_v7 = vpop.permute.xlu0 %857 }
 0xc2c   :  { %v860_v11 = vmul.f32 %v1768_v6, %v858_v7 }
 0xc2e   :  { %862 = vrot.lane.b32.xlu0 %v860_v11, %s1827_s7 }
 0xc31   :  { %v936_v13 = vpop.permute.xlu1 %935 }
 0xc32   :  { %v938_v14 = vmul.f32 %v1770_v12, %v936_v13 }
 0xc34   :  { %940 = vrot.lane.b32.xlu1 %v938_v14, %s1827_s7 }
 0xca0   :  { %v863_v17 = vpop.permute.xlu0 %862 }
 0xca1   :  { %v2074_v18 = vadd.f32 %v863_v17, %v855_v16 }
 0xca3   :  { %1771 = vtanh.f32 %v2074_v18  ;;  %v1021_v11 = vrot.slane %v2074_v18, 6 }
 0xca6   :  { %v941_v21 = vpop.permute.xlu1 %940 }
 0xca7   :  { %v2078_v22 = vadd.f32 %v941_v21, %v933_v20 }
 0xca9   :  { %1773 = vtanh.f32 %v2078_v22  ;;  %v1100_v15 = vrot.slane %v2078_v22, 2 }
 0xcb0   :  { %v1772_v23 = vpop.eup %1771 }
 0xcb1   :  { %868 = vrot.lane.b32.xlu0 %v1772_v23, %s1826_s4 }
 0xcb6   :  { %v1774_v24 = vpop.eup %1773 }
 0xcb7   :  { %946 = vrot.lane.b32.xlu1 %v1774_v24, %s1826_s4 }
 0xd23   :  { %v869_v25 = vpop.permute.xlu0 %868 }
 0xd24   :  { %v2083_v26 = vmul.f32 %v1768_v6, %v869_v25 }
 0xd26   :  { %v962_v27 = vpack.c.bf16 %v2083_v26, %v2083_v26 }
 0xd28   :  { %964 = vrot.lane.b32.xlu0 %v962_v27, %s1827_s7 }
 0xd29   :  { %v947_v28 = vpop.permute.xlu1 %946 }
 0xd2a   :  { %v2088_v29 = vmul.f32 %v1770_v12, %v947_v28 }
 0xd2c   :  { %v1040_v30 = vpack.c.bf16 %v2088_v29, %v2088_v29 }
 0xd2e   :  { %v1042_v31 = vrot.slane %v1040_v30, 3 }
 0xd30   :  { %1043 = vrot.lane.b32.xlu1 %v1042_v31, %s1827_s7 }
 0xd9a   :  { %v965_v32 = vpop.permute.xlu0 %964 }
 0xd9b   :  { %1640 = vmatmul.mubr.msk.bf16.vlgmr.msra.gmra.mxu1 %vm121_vm2, %v965_v32 }
 0xd9c   :  { %1652 = vmatpush3.bf16.msra.mxu1 %v1870_v4  ;;  %1655 = vmatprep.mubr.msk.bf16.mxu1 %vm1825_vm0, %v1823_v1 }
 0xd9d   :  { %1653 = vmatprep.subr.bf16.mxu1 %v1823_v1 }
 0xda0   :  { %1654 = vmatpush3.bf16.msra.mxu1 %v1888_v9 }
 0xda1   :  { %1667 = vmatprep.subr.bf16.mxu1 %v1823_v1 }
 0xda2   :  { %v1044_v34 = vpop.permute.xlu1 %1043 }
 0xda3   :  { %1648 = vmatmul.mubr.msk.bf16.vlgmr.msra.gmra.mxu0 %vm121_vm2, %v1044_v34 }
 0xda4   :  { %1660 = vmatpush3.bf16.msra.mxu0 %v1881_v8  ;;  %1663 = vmatprep.mubr.msk.bf16.mxu0 %vm1825_vm0, %v1823_v1 }
 0xda5   :  { %1661 = vmatprep.subr.bf16.mxu0 %v1823_v1 }
 0xda8   :  { %1662 = vmatpush3.bf16.msra.mxu0 %v1895_v10 }
 0xda9   :  { %1675 = vmatprep.subr.bf16.mxu0 %v1823_v1 }
 0xe5b   :  { %v1003_v35 = vpop.f32.mrf.mxu1 }
 0xe5c   :  { %v1010_v36 = vrot.slane %v1003_v35, 6  ;;  %v1129_v35 = vld [vmem:[#allocation2 + $0x18] sm:$0x30] }
 0xe5d   :  { %v1641_v39 = vpop.f32.mrf.mxu1 }
 0xe5e   :  { %v1012_v40 = vadd.f32 %v1010_v36, %v960_v38 }
 0xe5f   :  { %v1006_v42 = vpop.f32.mrf.mxu1 }
 0xe60   :  { %1775 = vtanh.f32 %v1012_v40  ;;  %v1496_v56 = vmul.f32 -1.442695, %v1012_v40 }
 0xe61   :  { %v1642_v43 = vpop.f32.mrf.mxu1 }
 0xe62   :  { %v1130_v43 = vld [vmem:[#allocation2] sm:$0xc] }
 0xe63   :  { %v1082_v44 = vpop.f32.mrf.mxu0 }
 0xe64   :  { %v1089_v46 = vrot.slane %v1082_v44, 4 }
 0xe65   :  { %v1649_v48 = vpop.f32.mrf.mxu0 }
 0xe66   :  { %v1091_v49 = vadd.f32 %v1089_v46, %v961_v47 }
 0xe67   :  { %v1085_v51 = vpop.f32.mrf.mxu0 }
 0xe68   :  { %1777 = vtanh.f32 %v1091_v49  ;;  %v1498_v57 = vmul.f32 -1.442695, %v1091_v49 }
 0xe69   :  { %v1650_v52 = vpop.f32.mrf.mxu0  ;;  %1779 = vpow2.f32 %v1496_v56 }
 0xe6a   :  { %1781 = vpow2.f32 %v1498_v57 }
 0xe6d   :  { %v1776_v53 = vpop.eup %1775 }
 0xe6e   :  { %1025 = vrot.lane.b32.xlu0 %v1776_v53, %s1826_s4 }
 0xe75   :  { %v1778_v55 = vpop.eup %1777 }
 0xe76   :  { %1104 = vrot.lane.b32.xlu1 %v1778_v55, %s1826_s4  ;;  %v1780_v58 = vpop.eup %1779 }
 0xe77   :  { %v1016_v59 = vadd.f32 1.0, %v1780_v58  ;;  %v1782_v60 = vpop.eup %1781 }
 0xe78   :  { %v1095_v61 = vadd.f32 1.0, %v1782_v60 }
 0xe79   :  { %1783 = vrcp.f32 %v1016_v59 }
 0xe7a   :  { %1785 = vrcp.f32 %v1095_v61 }
 0xe86   :  { %v1784_v63 = vpop.eup %1783 }
 0xe87   :  { %v1786_v5 = vpop.eup %1785  ;;  %v1023_v12 = vmul.f32 %v1784_v63, %v1021_v11 }
 0xe88   :  { %v1102_v16 = vmul.f32 %v1786_v5, %v1100_v15 }
 0xee0   :  { %v1026_v0 = vpop.permute.xlu0 %1025 }
 0xee1   :  { %v1028_v3 = vmul.f32 %v1784_v63, %v1026_v0 }
 0xee3   :  { %1030 = vrot.lane.b32.xlu0 %v1028_v3, %s1827_s7 }
 0xee8   :  { %v1105_v6 = vpop.permute.xlu1 %1104 }
 0xee9   :  { %v1107_v7 = vmul.f32 %v1786_v5, %v1105_v6 }
 0xeeb   :  { %1109 = vrot.lane.b32.xlu1 %v1107_v7, %s1827_s7 }
 0xf55   :  { %v1031_v13 = vpop.permute.xlu0 %1030 }
 0xf56   :  { %v2112_v14 = vadd.f32 %v1031_v13, %v1023_v12 }
 0xf58   :  { %1787 = vtanh.f32 %v2112_v14 }
 0xf5d   :  { %v1110_v17 = vpop.permute.xlu1 %1109 }
 0xf5e   :  { %v2116_v19 = vadd.f32 %v1110_v17, %v1102_v16 }
 0xf60   :  { %1789 = vtanh.f32 %v2116_v19  ;;  %v1270_v6 = vrot.slane %v2116_v19, 2 }
 0xf65   :  { %v1788_v20 = vpop.eup %1787 }
 0xf66   :  { %1036 = vrot.lane.b32.xlu0 %v1788_v20, %s1826_s4 }
 0xf6d   :  { %v1790_v21 = vpop.eup %1789 }
 0xf6e   :  { %1115 = vrot.lane.b32.xlu1 %v1790_v21, %s1826_s4 }
 0xfd8   :  { %v1037_v18 = vpop.permute.xlu0 %1036 }
 0xfd9   :  { %v2121_v23 = vmul.f32 %v1784_v63, %v1037_v18  ;;  %v1191_v63 = vrot.slane %v2112_v14, 6 }
 0xfdb   :  { %v1131_v24 = vpack.c.bf16 %v2121_v23, %v2121_v23 }
 0xfdd   :  { %v1133_v25 = vrot.slane %v1131_v24, 1 }
 0xfdf   :  { %1134 = vrot.lane.b32.xlu0 %v1133_v25, %s1827_s7 }
 0xfe0   :  { %v1116_v22 = vpop.permute.xlu1 %1115 }
 0xfe1   :  { %v2126_v27 = vmul.f32 %v1786_v5, %v1116_v22 }
 0xfe3   :  { %v1210_v28 = vpack.c.bf16 %v2126_v27, %v2126_v27 }
 0xfe5   :  { %v1212_v30 = vrot.slane %v1210_v28, 2 }
 0xfe7   :  { %1213 = vrot.lane.b32.xlu1 %v1212_v30, %s1827_s7 }
0x1051   :  { %v1135_v31 = vpop.permute.xlu0 %1134 }
0x1052   :  { %1656 = vmatmul.mubr.msk.bf16.vlgmr.msra.gmra.mxu1 %vm121_vm2, %v1135_v31  ;;  %v1299_v31 = vld [vmem:[#allocation2 + $0x18] sm:$0xc0] }
0x1053   :  { %1668 = vmatpush3.bf16.msra.mxu1 %v1870_v4  ;;  %1671 = vmatprep.mubr.msk.bf16.mxu1 %vm1825_vm0, %v1823_v1 }
0x1054   :  { %1669 = vmatprep.subr.bf16.mxu1 %v1823_v1 }
0x1057   :  { %1670 = vmatpush3.bf16.msra.mxu1 %v1888_v9 }
0x1059   :  { %v1214_v32 = vpop.permute.xlu1 %1213 }
0x105a   :  { %1664 = vmatmul.mubr.msk.bf16.vlgmr.msra.gmra.mxu0 %vm121_vm2, %v1214_v32 }
0x105b   :  { %1676 = vmatpush3.bf16.msra.mxu0 %v1881_v8  ;;  %1679 = vmatprep.mubr.msk.bf16.mxu0 %vm1825_vm0, %v1823_v1 }
0x105c   :  { %1677 = vmatprep.subr.bf16.mxu0 %v1823_v1 }
0x105f   :  { %1678 = vmatpush3.bf16.msra.mxu0 %v1895_v10 }
0x1112   :  { %v1173_v4 = vpop.f32.mrf.mxu1 }
0x1113   :  { %v1180_v34 = vrot.slane %v1173_v4, 4 }
0x1114   :  { %v1657_v36 = vpop.f32.mrf.mxu1 }
0x1115   :  { %v1182_v38 = vadd.f32 %v1180_v34, %v1129_v35  ;;  %v1300_v36 = vld [vmem:[#allocation2] sm:$0x3] }
0x1116   :  { %v1176_v39 = vpop.f32.mrf.mxu1 }
0x1117   :  { %1791 = vtanh.f32 %v1182_v38  ;;  %v1500_v10 = vmul.f32 -1.442695, %v1182_v38 }
0x1118   :  { %v1658_v9 = vpop.f32.mrf.mxu1 }
0x111a   :  { %v1252_v40 = vpop.f32.mrf.mxu0 }
0x111b   :  { %v1259_v42 = vrot.slane %v1252_v40, 6 }
0x111c   :  { %v1665_v44 = vpop.f32.mrf.mxu0 }
0x111d   :  { %v1261_v8 = vadd.f32 %v1259_v42, %v1130_v43 }
0x111e   :  { %v1255_v46 = vpop.f32.mrf.mxu0 }
0x111f   :  { %1793 = vtanh.f32 %v1261_v8  ;;  %v1502_v49 = vmul.f32 -1.442695, %v1261_v8 }
0x1120   :  { %v1666_v47 = vpop.f32.mrf.mxu0  ;;  %1795 = vpow2.f32 %v1500_v10 }
0x1121   :  { %1797 = vpow2.f32 %v1502_v49 }
0x1124   :  { %v1792_v48 = vpop.eup %1791 }
0x1125   :  { %1195 = vrot.lane.b32.xlu0 %v1792_v48, %s1826_s4 }
0x112c   :  { %v1794_v1 = vpop.eup %1793 }
0x112d   :  { %1274 = vrot.lane.b32.xlu1 %v1794_v1, %s1826_s4  ;;  %v1796_v51 = vpop.eup %1795 }
0x112e   :  { %v1186_v52 = vadd.f32 1.0, %v1796_v51  ;;  %v1798_v53 = vpop.eup %1797 }
0x112f   :  { %v1265_v55 = vadd.f32 1.0, %v1798_v53 }
0x1130   :  { %1799 = vrcp.f32 %v1186_v52 }
0x1131   :  { %1801 = vrcp.f32 %v1265_v55 }
0x113d   :  { %v1800_v56 = vpop.eup %1799 }
0x113e   :  { %v1802_v59 = vpop.eup %1801  ;;  %v1193_v0 = vmul.f32 %v1800_v56, %v1191_v63 }
0x113f   :  { %v1272_v7 = vmul.f32 %v1802_v59, %v1270_v6 }
0x1197   :  { %v1196_v57 = vpop.permute.xlu0 %1195 }
0x1198   :  { %v1198_v58 = vmul.f32 %v1800_v56, %v1196_v57 }
0x119a   :  { %1200 = vrot.lane.b32.xlu0 %v1198_v58, %s1827_s7 }
0x119f   :  { %v1275_v60 = vpop.permute.xlu1 %1274 }
0x11a0   :  { %v1277_v61 = vmul.f32 %v1802_v59, %v1275_v60 }
0x11a2   :  { %1279 = vrot.lane.b32.xlu1 %v1277_v61, %s1827_s7 }
0x120c   :  { %v1201_v3 = vpop.permute.xlu0 %1200 }
0x120d   :  { %v2148_v5 = vadd.f32 %v1201_v3, %v1193_v0 }
0x120f   :  { %1803 = vtanh.f32 %v2148_v5  ;;  %v1361_v57 = vrot.slane %v2148_v5, 6 }
0x1214   :  { %v1280_v11 = vpop.permute.xlu1 %1279 }
0x1215   :  { %v2152_v12 = vadd.f32 %v1280_v11, %v1272_v7 }
0x1217   :  { %1805 = vtanh.f32 %v2152_v12  ;;  %v1437_v61 = vrot.slane %v2152_v12, 2 }
0x121c   :  { %v1804_v13 = vpop.eup %1803 }
0x121d   :  { %1206 = vrot.lane.b32.xlu0 %v1804_v13, %s1826_s4 }
0x1224   :  { %v1806_v15 = vpop.eup %1805 }
0x1225   :  { %1285 = vrot.lane.b32.xlu1 %v1806_v15, %s1826_s4 }
0x128f   :  { %v1207_v14 = vpop.permute.xlu0 %1206 }
0x1290   :  { %v2157_v16 = vmul.f32 %v1800_v56, %v1207_v14 }
0x1292   :  { %v1301_v17 = vpack.c.bf16 %v2157_v16, %v2157_v16 }
0x1294   :  { %v1303_v20 = vrot.slane %v1301_v17, 2 }
0x1296   :  { %1304 = vrot.lane.b32.xlu0 %v1303_v20, %s1827_s7 }
0x1297   :  { %v1286_v19 = vpop.permute.xlu1 %1285 }
0x1298   :  { %v2162_v21 = vmul.f32 %v1802_v59, %v1286_v19 }
0x129a   :  { %v1380_v18 = vpack.c.bf16 %v2162_v21, %v2162_v21 }
0x129c   :  { %v1382_v24 = vrot.slane %v1380_v18, 1 }
0x129e   :  { %1383 = vrot.lane.b32.xlu1 %v1382_v24, %s1827_s7 }
0x1308   :  { %v1305_v25 = vpop.permute.xlu0 %1304 }
0x1309   :  { %1672 = vmatmul.mubr.msk.bf16.vlgmr.msra.gmra.mxu1 %vm121_vm2, %v1305_v25 }
0x1310   :  { %v1384_v22 = vpop.permute.xlu1 %1383 }
0x1311   :  { %1680 = vmatmul.mubr.msk.bf16.vlgmr.msra.gmra.mxu0 %vm121_vm2, %v1384_v22 }
0x13c9   :  { %v1343_v28 = vpop.f32.mrf.mxu1 }
0x13ca   :  { %v1350_v30 = vrot.slane %v1343_v28, 2 }
0x13cb   :  { %v1673_v32 = vpop.f32.mrf.mxu1 }
0x13cc   :  { %v1352_v4 = vadd.f32 %v1350_v30, %v1299_v31 }
0x13cd   :  { %v1346_v34 = vpop.f32.mrf.mxu1 }
0x13ce   :  { %1807 = vtanh.f32 %v1352_v4  ;;  %v1504_v8 = vmul.f32 -1.442695, %v1352_v4 }
0x13cf   :  { %v1674_v35 = vpop.f32.mrf.mxu1 }
0x13d1   :  { %v1422_v38 = vpop.f32.mrf.mxu0 }
0x13d2   :  { %v1428_v39 = vadd.f32 %v1422_v38, %v1300_v36 }
0x13d3   :  { %v1681_v9 = vpop.f32.mrf.mxu0 }
0x13d4   :  { %1809 = vtanh.f32 %v1428_v39  ;;  %v1506_v46 = vmul.f32 -1.442695, %v1428_v39 }
0x13d5   :  { %v1425_v40 = vpop.f32.mrf.mxu0  ;;  %1811 = vpow2.f32 %v1504_v8 }
0x13d6   :  { %1813 = vpow2.f32 %v1506_v46 }
0x13d7   :  { %v1682_v42 = vpop.f32.mrf.mxu0 }
0x13db   :  { %v1808_v43 = vpop.eup %1807 }
0x13dc   :  { %1365 = vrot.lane.b32.xlu0 %v1808_v43, %s1826_s4 }
0x13e1   :  { %v1810_v44 = vpop.eup %1809 }
0x13e2   :  { %1441 = vrot.lane.b32.xlu1 %v1810_v44, %s1826_s4  ;;  %v1812_v47 = vpop.eup %1811 }
0x13e3   :  { %v1356_v48 = vadd.f32 1.0, %v1812_v47  ;;  %v1814_v1 = vpop.eup %1813 }
0x13e4   :  { %v1432_v10 = vadd.f32 1.0, %v1814_v1 }
0x13e5   :  { %1815 = vrcp.f32 %v1356_v48 }
0x13e6   :  { %1817 = vrcp.f32 %v1432_v10 }
0x13f2   :  { %v1816_v49 = vpop.eup %1815 }
0x13f3   :  { %v1818_v53 = vpop.eup %1817  ;;  %v1363_v58 = vmul.f32 %v1816_v49, %v1361_v57 }
0x13f4   :  { %v1439_v63 = vmul.f32 %v1818_v53, %v1437_v61 }
0x144e   :  { %v1366_v51 = vpop.permute.xlu0 %1365 }
0x144f   :  { %v1368_v52 = vmul.f32 %v1816_v49, %v1366_v51 }
0x1451   :  { %1370 = vrot.lane.b32.xlu0 %v1368_v52, %s1827_s7 }
0x1454   :  { %v1442_v55 = vpop.permute.xlu1 %1441 }
0x1455   :  { %v1444_v56 = vmul.f32 %v1818_v53, %v1442_v55 }
0x1457   :  { %1446 = vrot.lane.b32.xlu1 %v1444_v56, %s1827_s7 }
0x14c3   :  { %v1371_v59 = vpop.permute.xlu0 %1370 }
0x14c4   :  { %v1373_v60 = vadd.f32 %v1371_v59, %v1363_v58 }
0x14c6   :  { %1819 = vtanh.f32 %v1373_v60 }
0x14c9   :  { %v1447_v0 = vpop.permute.xlu1 %1446 }
0x14ca   :  { %v1449_v3 = vadd.f32 %v1447_v0, %v1439_v63 }
0x14cc   :  { %1821 = vtanh.f32 %v1449_v3 }
0x14d3   :  { %v1820_v6 = vpop.eup %1819 }
0x14d4   :  { %1376 = vrot.lane.b32.xlu0 %v1820_v6, %s1826_s4 }
0x14d8   :  { %271 = vrot.lane.b32.xlu0 %v1931_v62, %s1827_s7 }
0x14d9   :  { %v1822_v7 = vpop.eup %1821 }
0x14da   :  { %1452 = vrot.lane.b32.xlu1 %v1822_v7, %s1826_s4 }
0x14dc   :  { %442 = vrot.lane.b32.xlu0 %v1969_v50, %s1827_s7 }
0x14de   :  { %277 = vrot.lane.b32.xlu1 %v1936_v2, %s1826_s4 }
0x14e0   :  { %614 = vrot.lane.b32.xlu0 %v2007_v41, %s1827_s7 }
0x14e2   :  { %448 = vrot.lane.b32.xlu1 %v1974_v54, %s1826_s4 }
0x14e4   :  { %783 = vrot.lane.b32.xlu0 %v2045_v33, %s1827_s7 }
0x14e6   :  { %620 = vrot.lane.b32.xlu1 %v2012_v45, %s1826_s4 }
0x14e8   :  { %951 = vrot.lane.b32.xlu0 %v2083_v26, %s1827_s7 }
0x14ea   :  { %789 = vrot.lane.b32.xlu1 %v2049_v37, %s1826_s4 }
0x14ec   :  { %1120 = vrot.lane.b32.xlu0 %v2121_v23, %s1827_s7 }
0x14ee   :  { %956 = vrot.lane.b32.xlu1 %v2088_v29, %s1826_s4 }
0x14f0   :  { %1290 = vrot.lane.b32.xlu0 %v2157_v16, %s1827_s7 }
0x14f2   :  { %1125 = vrot.lane.b32.xlu1 %v2126_v27, %s1826_s4 }
0x14f6   :  { %1295 = vrot.lane.b32.xlu1 %v2162_v21, %s1826_s4 }
0x1546   :  { %v1377_v62 = vpop.permute.xlu0 %1376 }
0x1547   :  { %v1379_v2 = vmul.f32 %v1816_v49, %v1377_v62 }
0x1549   :  { %1457 = vrot.lane.b32.xlu0 %v1379_v2, %s1827_s7 }
0x154a   :  { %v272_v50 = vpop.permute.xlu0 %271 }
0x154b   :  { %275 = vst.msk [vmem:[%s2276_s5] sm:$0x3] %vm274_vm3, %v272_v50 }
0x154c   :  { %v1453_v54 = vpop.permute.xlu1 %1452 }
0x154d   :  { %v1455_v41 = vmul.f32 %v1818_v53, %v1453_v54 }
0x154e   :  { %v443_v45 = vpop.permute.xlu0 %442 }
0x154f   :  { %446 = vst.msk [vmem:[%s2276_s5] sm:$0xc] %vm445_vm4, %v443_v45  ;;  %1462 = vrot.lane.b32.xlu1 %v1455_v41, %s1826_s4 }
0x1550   :  { %v278_v33 = vpop.permute.xlu1 %277 }
0x1551   :  { %281 = vst.msk [vmem:[%s2276_s5 + $0x8] sm:$0xc0] %vm280_vm5, %v278_v33 }
0x1552   :  { %v615_v37 = vpop.permute.xlu0 %614 }
0x1553   :  { %618 = vst.msk [vmem:[%s2276_s5] sm:$0x30] %vm617_vm6, %v615_v37 }
0x1554   :  { %v449_v26 = vpop.permute.xlu1 %448 }
0x1555   :  { %452 = vst.msk [vmem:[%s2276_s5 + $0x8] sm:$0x30] %vm451_vm7, %v449_v26 }
0x1556   :  { %v784_v29 = vpop.permute.xlu0 %783 }
0x1557   :  { %787 = vst.msk [vmem:[%s2276_s5] sm:$0xc0] %vm786_vm8, %v784_v29 }
0x1558   :  { %v621_v23 = vpop.permute.xlu1 %620 }
0x1559   :  { %624 = vst.msk [vmem:[%s2276_s5 + $0x8] sm:$0xc] %vm623_vm9, %v621_v23 }
0x155a   :  { %v952_v27 = vpop.permute.xlu0 %951 }
0x155c   :  { %v790_v5 = vpop.permute.xlu1 %789 }
0x155d   :  { %793 = vst.msk [vmem:[%s2276_s5 + $0x8] sm:$0x3] %vm792_vm10, %v790_v5 }
0x155e   :  { %954 = vst.msk [vmem:[%s2276_s5 + $0x8] sm:$0x3] %vm274_vm3, %v952_v27  ;;  %v1121_v11 = vpop.permute.xlu0 %1120 }
0x155f   :  { %1123 = vst.msk [vmem:[%s2276_s5 + $0x8] sm:$0xc] %vm445_vm4, %v1121_v11 }
0x1560   :  { %v957_v12 = vpop.permute.xlu1 %956 }
0x1561   :  { %959 = vst.msk [vmem:[%s2276_s5] sm:$0xc0] %vm280_vm5, %v957_v12 }
0x1562   :  { %v1291_v13 = vpop.permute.xlu0 %1290 }
0x1563   :  { %1293 = vst.msk [vmem:[%s2276_s5 + $0x8] sm:$0x30] %vm617_vm6, %v1291_v13 }
0x1564   :  { %v1126_v15 = vpop.permute.xlu1 %1125 }
0x1565   :  { %1128 = vst.msk [vmem:[%s2276_s5] sm:$0x30] %vm451_vm7, %v1126_v15 }
0x1568   :  { %v1296_v14 = vpop.permute.xlu1 %1295 }
0x1569   :  { %1298 = vst.msk [vmem:[%s2276_s5] sm:$0xc] %vm623_vm9, %v1296_v14 }
0x15bb   :  { %v1458_v16 = vpop.permute.xlu0 %1457 }
0x15bc   :  { %1460 = vst.msk [vmem:[%s2276_s5 + $0x8] sm:$0xc0] %vm786_vm8, %v1458_v16 }
0x15c1   :  { %v1463_v17 = vpop.permute.xlu1 %1462 }
0x15c2   :  { %1465 = vst.msk [vmem:[%s2276_s5] sm:$0x3] %vm792_vm10, %v1463_v17 }

// kernel: rnn_model_forward.7
= control target key start
LH: loop header
LB: loop body
LE: loop exit
PB: predicated region body
PF: predicated region fallthrough
CT: control target
= control target key end

     0   :  { %v1874_v1 = vmov 0.0   ;;  %v1875_v2 = vmov 0   ;;  %vm1876_vm0 = vmmov 0   ;;  %vm84_vm1 = vcmask 523264   ;;  %s2340_s1 = inlined_call_operand.vmem [shape: bf16[64,256], index: 1, kind: input, shape index: {}]   ;;  %s2341_s2 = inlined_call_operand.vmem [shape: bf16[32,128], index: 2, kind: input, shape index: {}]   ;;  %s2342_s3 = inlined_call_operand.vmem [shape: bf16[32,128], index: 3, kind: input, shape index: {}]   ;;  %s2343_s0 = inlined_call_operand.vmem [shape: f32[16,64], index: 0, kind: input, shape index: {}]   ;;  %s2344_s4 = inlined_call_operand.vmem [shape: f32[1,256], index: 4, kind: input, shape index: {}]   ;;  %s2345_s5 = inlined_call_operand.vmem [shape: f32[16,64], index: 5, kind: output, shape index: {}]  }
   0x1   :  { %v1730_v0 = vld [vmem:[%s2340_s1 + $0x34] ss:$8 sps:$4 sm:$0xff]   ;;  %1597 = vmatprep.subr.bf16.mxu1 %v1874_v1  ;;  %120 = vmatprep.mubr.bf16.mxu0 %v1875_v2  ;;  %v1732_v3 = vld [vmem:[%s2340_s1 + $0x30] ss:$8 sps:$4 sm:$0xff]   ;;  %v1733_v4 = vld [vmem:[%s2340_s1 + $0x24] ss:$8 sps:$4 sm:$0xff]   ;;  %v34_v17 = vlaneseq }
   0x2   :  { %1601 = vmatprep.mubr.msk.bf16.mxu1 %vm1876_vm0, %v1874_v1  ;;  %96 = vmatprep.subr.bf16.mxu0 %v1730_v0  ;;  %v1735_v5 = vld [vmem:[%s2340_s1 + $0x20] ss:$8 sps:$4 sm:$0xff]   ;;  %v1736_v6 = vld [vmem:[%s2340_s1 + $0x14] ss:$8 sps:$4 sm:$0xff]   ;;  %v1738_v8 = vld [vmem:[%s2340_s1 + $0x10] ss:$8 sps:$4 sm:$0xff]  }
   0x3   :  { %97 = vmatpush1.bf16.msra.mxu0 %v1732_v3  ;;  %v1930_v7 = vld [vmem:[%s2341_s2 + $0x8] sm:$0xff]   ;;  %v1940_v9 = vld [vmem:[%s2341_s2] sm:$0xff]   ;;  %v35_v18 = vshrl.u32 %v34_v17, 7  ;;  %vm157_vm2 = vcmask 261120   ;;  %vm310_vm3 = vcmask 254976   ;;  %vm481_vm4 = vcmask 257026  }
   0x4   :  { %98 = vmatprep.subr.bf16.mxu0 %v1733_v4  ;;  %1598 = vmatpush3.bf16.msra.mxu1 %v1930_v7  ;;  %v1740_v10 = vld [vmem:[%s2340_s1 + $0x4] ss:$8 sps:$4 sm:$0xff]   ;;  %v1742_v12 = vld [vmem:[%s2340_s1] ss:$8 sps:$4 sm:$0xff]   ;;  %vm316_vm5 = vcmask 523526   ;;  %vm653_vm6 = vcmask 259076  }
   0x5   :  { %1599 = vmatprep.subr.bf16.mxu1 %v1874_v1  ;;  %v1949_v11 = vld [vmem:[%s2342_s3 + $0x8] sm:$0xff]   ;;  %v21_v13 = vld [vmem:[%s2343_s0] sm:$0xff]  ;;  %v36_v19 = vsub.s32 0, %v35_v18  ;;  %v40_v22 = vsub.s32 1, %v35_v18  ;;  %vm487_vm7 = vcmask 521476   ;;  %vm822_vm8 = vcmask 261126  }
   0x6   :  { %v22_v14 = vld [vmem:[%s2343_s0 + $0x8] sm:$0xff]  ;;  %v1965_v16 = vld [vmem:[%s2342_s3] sm:$0xff]   ;;  %s1877_s3 = smov 64   ;;  %vm659_vm9 = vcmask 519426   ;;  %vm828_vm10 = vcmask 517376  }
   0x7   :  { %99 = vmatpush1.bf16.msra.mxu0 %v1735_v5  ;;  %v23_v15 = vpack.c.bf16 %v22_v14, %v21_v13  ;;  %v32_v20 = vld [vmem:[%s2344_s4] sm:$0x3]  ;;  %s1878_s4 = smov 32  }
   0x8   :  { %100 = vmatprep.subr.bf16.mxu0 %v1736_v6  ;;  %1600 = vmatpush3.bf16.msra.mxu1 %v1940_v9  ;;  %v37_v23 = vrot.slane %v32_v20, %v36_v19  ;;  %v41_v25 = vrot.slane %v32_v20, %v40_v22 }
   0x9   :  { %1605 = vmatprep.subr.bf16.mxu1 %v1874_v1 }
   0xb   :  { %101 = vmatpush1.bf16.msra.mxu0 %v1738_v8  ;;  %1602 = vmatmul.mubr.bf16.vlgmr.msra.gmra.mxu1 %v1875_v2 }
   0xc   :  { %102 = vmatprep.subr.bf16.mxu0 %v1740_v10  ;;  %1606 = vmatpush3.bf16.msra.mxu1 %v1949_v11 }
   0xd   :  { %1609 = vmatprep.mubr.msk.bf16.mxu1 %vm1876_vm0, %v1874_v1  ;;  %1607 = vmatprep.subr.bf16.mxu1 %v1874_v1 }
   0xf   :  { %103 = vmatpush1.bf16.msra.mxu0 %v1742_v12 }
  0x10   :  { %1613 = vmatprep.subr.bf16.mxu0 %v1874_v1  ;;  %1608 = vmatpush3.bf16.msra.mxu1 %v1965_v16 }
  0x11   :  { %1621 = vmatprep.subr.bf16.mxu1 %v1874_v1 }
  0x12   :  { %1514 = vmatmul.mubr.msk.bf16.vlgmr.msra.gmra.mxu0 %vm84_vm1, %v23_v15 }
  0x13   :  { %1614 = vmatpush3.bf16.msra.mxu0 %v1930_v7  ;;  %1617 = vmatprep.mubr.msk.bf16.mxu0 %vm1876_vm0, %v1874_v1 }
  0x14   :  { %1615 = vmatprep.subr.bf16.mxu0 %v1874_v1  ;;  %1610 = vmatmul.mubr.bf16.vlgmr.msra.gmra.mxu1 %v1875_v2 }
  0x15   :  { %1622 = vmatpush3.bf16.msra.mxu1 %v1949_v11  ;;  %1625 = vmatprep.mubr.msk.bf16.mxu1 %vm1876_vm0, %v1874_v1 }
  0x16   :  { %1623 = vmatprep.subr.bf16.mxu1 %v1874_v1 }
  0x17   :  { %1616 = vmatpush3.bf16.msra.mxu0 %v1940_v9 }
  0x18   :  { %1629 = vmatprep.subr.bf16.mxu0 %v1874_v1 }
  0x19   :  { %1624 = vmatpush3.bf16.msra.mxu1 %v1965_v16 }
  0x1a   :  { %1637 = vmatprep.subr.bf16.mxu1 %v1874_v1 }
  0xcb   :  { %v195_v21 = vpop.f32.mrf.mxu1 }
  0xcd   :  { %v1603_v24 = vpop.f32.mrf.mxu1 }
  0xcf   :  { %v198_v26 = vpop.f32.mrf.mxu1 }
  0xd1   :  { %v1604_v29 = vpop.f32.mrf.mxu1 }
  0xd2   :  { %v122_v27 = vpop.f32.mrf.mxu0 }
  0xd3   :  { %v123_v28 = vadd.f32 %v122_v27, %v37_v23 }
  0xd4   :  { %v124_v30 = vpop.f32.mrf.mxu0  ;;  %v272_v32 = vpop.f32.mrf.mxu1 }
  0xd5   :  { %131 = vst [vmem:[#allocation2 + $0x10] sm:$0xff] %v123_v28  ;;  %v125_v31 = vadd.f32 %v124_v30, %v41_v25  ;;  %v279_v42 = vrot.slane %v272_v32, 2 }
  0xd6   :  { %v126_v33 = vpop.f32.mrf.mxu0  ;;  %v1611_v35 = vpop.f32.mrf.mxu1 }
  0xd7   :  { %132 = vst [vmem:[#allocation2] sm:$0xff] %v125_v31  ;;  %v127_v34 = vadd.f32 %v126_v33, %v37_v23 }
  0xd8   :  { %v128_v36 = vpop.f32.mrf.mxu0  ;;  %v275_v38 = vpop.f32.mrf.mxu1 }
  0xd9   :  { %133 = vst [vmem:[#allocation2 + $0x18] sm:$0xff] %v127_v34  ;;  %v129_v37 = vadd.f32 %v128_v36, %v41_v25 }
  0xda   :  { %v1612_v39 = vpop.f32.mrf.mxu1 }
  0xdb   :  { %134 = vst [vmem:[#allocation2 + $0x8] sm:$0xff] %v129_v37 }
  0xdc   :  { %v143_v40 = vld [vmem:[#allocation2 + $0x10] sm:$0x3]  ;;  %v318_v19 = vld [vmem:[#allocation2 + $0x10] sm:$0xc] }
  0xdd   :  { %v201_v41 = vadd.f32 %v195_v21, %v143_v40 }
  0xdf   :  { %1746 = vtanh.f32 %v201_v41  ;;  %v1517_v47 = vmul.f32 -1.442695, %v201_v41 }
  0xe2   :  { %v144_v43 = vld [vmem:[#allocation2 + $0x8] sm:$0xc0]  ;;  %v319_v26 = vld [vmem:[#allocation2 + $0x8] sm:$0x30] }
  0xe3   :  { %v281_v44 = vadd.f32 %v279_v42, %v144_v43 }
  0xe5   :  { %1748 = vtanh.f32 %v281_v44  ;;  %v1520_v48 = vmul.f32 -1.442695, %v281_v44 }
  0xe6   :  { %1750 = vpow2.f32 %v1517_v47 }
  0xe7   :  { %1752 = vpow2.f32 %v1520_v48 }
  0xec   :  { %v1747_v45 = vpop.eup %1746 }
  0xed   :  { %211 = vrot.lane.b32.xlu0 %v1747_v45, %s1877_s3 }
  0xf2   :  { %v1749_v46 = vpop.eup %1748 }
  0xf3   :  { %291 = vrot.lane.b32.xlu0 %v1749_v46, %s1877_s3  ;;  %v1751_v49 = vpop.eup %1750 }
  0xf4   :  { %v205_v50 = vadd.f32 1.0, %v1751_v49  ;;  %v1753_v51 = vpop.eup %1752 }
  0xf5   :  { %v285_v52 = vadd.f32 1.0, %v1753_v51 }
  0xf6   :  { %1754 = vrcp.f32 %v205_v50 }
  0xf7   :  { %1756 = vrcp.f32 %v285_v52 }
 0x103   :  { %v1755_v53 = vpop.eup %1754 }
 0x104   :  { %v1757_v56 = vpop.eup %1756  ;;  %v209_v59 = vmul.f32 0.0, %v1755_v53 }
 0x105   :  { %v289_v62 = vmul.f32 0.0, %v1757_v56 }
 0x15f   :  { %v212_v54 = vpop.permute.xlu0 %211 }
 0x160   :  { %v214_v55 = vmul.f32 %v1755_v53, %v212_v54 }
 0x162   :  { %216 = vrot.lane.b32.xlu1 %v214_v55, %s1878_s4 }
 0x165   :  { %v292_v57 = vpop.permute.xlu0 %291 }
 0x166   :  { %v294_v58 = vmul.f32 %v1757_v56, %v292_v57 }
 0x168   :  { %296 = vrot.lane.b32.xlu1 %v294_v58, %s1878_s4 }
 0x1d4   :  { %v217_v60 = vpop.permute.xlu1 %216 }
 0x1d5   :  { %v1992_v61 = vadd.f32 %v217_v60, %v209_v59 }
 0x1d7   :  { %1758 = vtanh.f32 %v1992_v61  ;;  %v379_v45 = vrot.slane %v1992_v61, 6 }
 0x1da   :  { %v297_v63 = vpop.permute.xlu1 %296 }
 0x1db   :  { %v1995_v0 = vadd.f32 %v297_v63, %v289_v62 }
 0x1dd   :  { %1760 = vtanh.f32 %v1995_v0  ;;  %v458_v49 = vrot.slane %v1995_v0, 2 }
 0x1e4   :  { %v1759_v2 = vpop.eup %1758 }
 0x1e5   :  { %222 = vrot.lane.b32.xlu0 %v1759_v2, %s1877_s3 }
 0x1ea   :  { %v1761_v3 = vpop.eup %1760 }
 0x1eb   :  { %302 = vrot.lane.b32.xlu1 %v1761_v3, %s1877_s3 }
 0x257   :  { %v223_v4 = vpop.permute.xlu0 %222 }
 0x258   :  { %v2000_v5 = vmul.f32 %v1755_v53, %v223_v4  ;;  %v489_v4 = vld [vmem:[#allocation2 + $0x10] sm:$0x30] }
 0x25a   :  { %v320_v6 = vpack.c.bf16 %v2000_v5, %v2000_v5 }
 0x25c   :  { %322 = vrot.lane.b32.xlu0 %v320_v6, %s1878_s4 }
 0x25d   :  { %v303_v8 = vpop.permute.xlu1 %302 }
 0x25e   :  { %v2005_v10 = vmul.f32 %v1757_v56, %v303_v8 }
 0x260   :  { %v398_v12 = vpack.c.bf16 %v2005_v10, %v2005_v10 }
 0x262   :  { %v400_v13 = vrot.slane %v398_v12, 3 }
 0x264   :  { %401 = vrot.lane.b32.xlu1 %v400_v13, %s1878_s4 }
 0x2ce   :  { %v323_v14 = vpop.permute.xlu0 %322 }
 0x2cf   :  { %1618 = vmatmul.mubr.msk.bf16.vlgmr.msra.gmra.mxu0 %vm157_vm2, %v323_v14 }
 0x2d0   :  { %1630 = vmatpush3.bf16.msra.mxu0 %v1930_v7  ;;  %1633 = vmatprep.mubr.msk.bf16.mxu0 %vm1876_vm0, %v1874_v1 }
 0x2d1   :  { %1631 = vmatprep.subr.bf16.mxu0 %v1874_v1 }
 0x2d4   :  { %1632 = vmatpush3.bf16.msra.mxu0 %v1940_v9 }
 0x2d5   :  { %1645 = vmatprep.subr.bf16.mxu0 %v1874_v1 }
 0x2d6   :  { %v402_v15 = vpop.permute.xlu1 %401 }
 0x2d7   :  { %1626 = vmatmul.mubr.msk.bf16.vlgmr.msra.gmra.mxu1 %vm157_vm2, %v402_v15 }
 0x2d8   :  { %1638 = vmatpush3.bf16.msra.mxu1 %v1949_v11  ;;  %1641 = vmatprep.mubr.msk.bf16.mxu1 %vm1876_vm0, %v1874_v1 }
 0x2d9   :  { %1639 = vmatprep.subr.bf16.mxu1 %v1874_v1 }
 0x2dc   :  { %1640 = vmatpush3.bf16.msra.mxu1 %v1965_v16 }
 0x2dd   :  { %1653 = vmatprep.subr.bf16.mxu1 %v1874_v1 }
 0x38f   :  { %v361_v17 = vpop.f32.mrf.mxu0 }
 0x390   :  { %v368_v18 = vrot.slane %v361_v17, 6  ;;  %v490_v17 = vld [vmem:[#allocation2 + $0x8] sm:$0xc] }
 0x391   :  { %v1619_v20 = vpop.f32.mrf.mxu0 }
 0x392   :  { %v370_v21 = vadd.f32 %v368_v18, %v318_v19 }
 0x393   :  { %v364_v22 = vpop.f32.mrf.mxu0 }
 0x394   :  { %1762 = vtanh.f32 %v370_v21  ;;  %v1522_v33 = vmul.f32 -1.442695, %v370_v21 }
 0x395   :  { %v1620_v23 = vpop.f32.mrf.mxu0 }
 0x397   :  { %v440_v24 = vpop.f32.mrf.mxu1 }
 0x398   :  { %v447_v25 = vrot.slane %v440_v24, 4 }
 0x399   :  { %v1627_v27 = vpop.f32.mrf.mxu1 }
 0x39a   :  { %v449_v28 = vadd.f32 %v447_v25, %v319_v26 }
 0x39b   :  { %v443_v29 = vpop.f32.mrf.mxu1 }
 0x39c   :  { %1764 = vtanh.f32 %v449_v28  ;;  %v1524_v34 = vmul.f32 -1.442695, %v449_v28 }
 0x39d   :  { %v1628_v30 = vpop.f32.mrf.mxu1  ;;  %1766 = vpow2.f32 %v1522_v33 }
 0x39e   :  { %1768 = vpow2.f32 %v1524_v34 }
 0x3a1   :  { %v1763_v31 = vpop.eup %1762 }
 0x3a2   :  { %383 = vrot.lane.b32.xlu0 %v1763_v31, %s1877_s3 }
 0x3a9   :  { %v1765_v32 = vpop.eup %1764 }
 0x3aa   :  { %462 = vrot.lane.b32.xlu1 %v1765_v32, %s1877_s3  ;;  %v1767_v35 = vpop.eup %1766 }
 0x3ab   :  { %v374_v36 = vadd.f32 1.0, %v1767_v35  ;;  %v1769_v37 = vpop.eup %1768 }
 0x3ac   :  { %v453_v38 = vadd.f32 1.0, %v1769_v37 }
 0x3ad   :  { %1770 = vrcp.f32 %v374_v36 }
 0x3ae   :  { %1772 = vrcp.f32 %v453_v38 }
 0x3ba   :  { %v1771_v39 = vpop.eup %1770 }
 0x3bb   :  { %v1773_v42 = vpop.eup %1772  ;;  %v381_v46 = vmul.f32 %v1771_v39, %v379_v45 }
 0x3bc   :  { %v460_v50 = vmul.f32 %v1773_v42, %v458_v49 }
 0x414   :  { %v384_v40 = vpop.permute.xlu0 %383 }
 0x415   :  { %v386_v41 = vmul.f32 %v1771_v39, %v384_v40 }
 0x417   :  { %388 = vrot.lane.b32.xlu0 %v386_v41, %s1878_s4 }
 0x41c   :  { %v463_v43 = vpop.permute.xlu1 %462 }
 0x41d   :  { %v465_v44 = vmul.f32 %v1773_v42, %v463_v43 }
 0x41f   :  { %467 = vrot.lane.b32.xlu1 %v465_v44, %s1878_s4 }
 0x489   :  { %v389_v47 = vpop.permute.xlu0 %388 }
 0x48a   :  { %v2029_v48 = vadd.f32 %v389_v47, %v381_v46 }
 0x48c   :  { %1774 = vtanh.f32 %v2029_v48  ;;  %v551_v36 = vrot.slane %v2029_v48, 6 }
 0x491   :  { %v468_v51 = vpop.permute.xlu1 %467 }
 0x492   :  { %v2033_v52 = vadd.f32 %v468_v51, %v460_v50 }
 0x494   :  { %1776 = vtanh.f32 %v2033_v52  ;;  %v630_v40 = vrot.slane %v2033_v52, 2 }
 0x499   :  { %v1775_v53 = vpop.eup %1774 }
 0x49a   :  { %394 = vrot.lane.b32.xlu0 %v1775_v53, %s1877_s3 }
 0x4a1   :  { %v1777_v54 = vpop.eup %1776 }
 0x4a2   :  { %473 = vrot.lane.b32.xlu1 %v1777_v54, %s1877_s3 }
 0x50c   :  { %v395_v55 = vpop.permute.xlu0 %394 }
 0x50d   :  { %v2038_v56 = vmul.f32 %v1771_v39, %v395_v55 }
 0x50f   :  { %v491_v57 = vpack.c.bf16 %v2038_v56, %v2038_v56 }
 0x511   :  { %v493_v58 = vrot.slane %v491_v57, 1 }
 0x513   :  { %494 = vrot.lane.b32.xlu0 %v493_v58, %s1878_s4 }
 0x514   :  { %v474_v59 = vpop.permute.xlu1 %473 }
 0x515   :  { %v2043_v60 = vmul.f32 %v1773_v42, %v474_v59  ;;  %v661_v59 = vld [vmem:[#allocation2 + $0x10] sm:$0xc0] }
 0x517   :  { %v570_v61 = vpack.c.bf16 %v2043_v60, %v2043_v60 }
 0x519   :  { %v572_v62 = vrot.slane %v570_v61, 2 }
 0x51b   :  { %573 = vrot.lane.b32.xlu1 %v572_v62, %s1878_s4 }
 0x585   :  { %v495_v63 = vpop.permute.xlu0 %494 }
 0x586   :  { %1634 = vmatmul.mubr.msk.bf16.vlgmr.msra.gmra.mxu0 %vm157_vm2, %v495_v63 }
 0x587   :  { %1646 = vmatpush3.bf16.msra.mxu0 %v1930_v7  ;;  %1649 = vmatprep.mubr.msk.bf16.mxu0 %vm1876_vm0, %v1874_v1 }
 0x588   :  { %1647 = vmatprep.subr.bf16.mxu0 %v1874_v1 }
 0x58b   :  { %1648 = vmatpush3.bf16.msra.mxu0 %v1940_v9 }
 0x58c   :  { %1661 = vmatprep.subr.bf16.mxu0 %v1874_v1 }
 0x58d   :  { %v574_v0 = vpop.permute.xlu1 %573 }
 0x58e   :  { %1642 = vmatmul.mubr.msk.bf16.vlgmr.msra.gmra.mxu1 %vm157_vm2, %v574_v0 }
 0x58f   :  { %1654 = vmatpush3.bf16.msra.mxu1 %v1949_v11  ;;  %1657 = vmatprep.mubr.msk.bf16.mxu1 %vm1876_vm0, %v1874_v1 }
 0x590   :  { %1655 = vmatprep.subr.bf16.mxu1 %v1874_v1 }
 0x593   :  { %1656 = vmatpush3.bf16.msra.mxu1 %v1965_v16 }
 0x594   :  { %1669 = vmatprep.subr.bf16.mxu1 %v1874_v1 }
 0x646   :  { %v533_v2 = vpop.f32.mrf.mxu0 }
 0x647   :  { %v540_v3 = vrot.slane %v533_v2, 4  ;;  %v662_v2 = vld [vmem:[#allocation2 + $0x8] sm:$0x3] }
 0x648   :  { %v1635_v6 = vpop.f32.mrf.mxu0 }
 0x649   :  { %v542_v8 = vadd.f32 %v540_v3, %v489_v4 }
 0x64a   :  { %v536_v12 = vpop.f32.mrf.mxu0 }
 0x64b   :  { %1778 = vtanh.f32 %v542_v8  ;;  %v1526_v24 = vmul.f32 -1.442695, %v542_v8 }
 0x64c   :  { %v1636_v13 = vpop.f32.mrf.mxu0 }
 0x64e   :  { %v612_v14 = vpop.f32.mrf.mxu1 }
 0x64f   :  { %v619_v15 = vrot.slane %v612_v14, 6 }
 0x650   :  { %v1643_v18 = vpop.f32.mrf.mxu1 }
 0x651   :  { %v621_v19 = vadd.f32 %v619_v15, %v490_v17 }
 0x652   :  { %v615_v20 = vpop.f32.mrf.mxu1 }
 0x653   :  { %1780 = vtanh.f32 %v621_v19  ;;  %v1528_v25 = vmul.f32 -1.442695, %v621_v19 }
 0x654   :  { %v1644_v21 = vpop.f32.mrf.mxu1  ;;  %1782 = vpow2.f32 %v1526_v24 }
 0x655   :  { %1784 = vpow2.f32 %v1528_v25 }
 0x658   :  { %v1779_v22 = vpop.eup %1778 }
 0x659   :  { %555 = vrot.lane.b32.xlu0 %v1779_v22, %s1877_s3 }
 0x660   :  { %v1781_v23 = vpop.eup %1780 }
 0x661   :  { %634 = vrot.lane.b32.xlu1 %v1781_v23, %s1877_s3  ;;  %v1783_v26 = vpop.eup %1782 }
 0x662   :  { %v546_v27 = vadd.f32 1.0, %v1783_v26  ;;  %v1785_v28 = vpop.eup %1784 }
 0x663   :  { %v625_v29 = vadd.f32 1.0, %v1785_v28 }
 0x664   :  { %1786 = vrcp.f32 %v546_v27 }
 0x665   :  { %1788 = vrcp.f32 %v625_v29 }
 0x671   :  { %v1787_v30 = vpop.eup %1786 }
 0x672   :  { %v1789_v33 = vpop.eup %1788  ;;  %v553_v37 = vmul.f32 %v1787_v30, %v551_v36 }
 0x673   :  { %v632_v41 = vmul.f32 %v1789_v33, %v630_v40 }
 0x6cb   :  { %v556_v31 = vpop.permute.xlu0 %555 }
 0x6cc   :  { %v558_v32 = vmul.f32 %v1787_v30, %v556_v31 }
 0x6ce   :  { %560 = vrot.lane.b32.xlu0 %v558_v32, %s1878_s4 }
 0x6d3   :  { %v635_v34 = vpop.permute.xlu1 %634 }
 0x6d4   :  { %v637_v35 = vmul.f32 %v1789_v33, %v635_v34 }
 0x6d6   :  { %639 = vrot.lane.b32.xlu1 %v637_v35, %s1878_s4 }
 0x740   :  { %v561_v38 = vpop.permute.xlu0 %560 }
 0x741   :  { %v2067_v39 = vadd.f32 %v561_v38, %v553_v37 }
 0x743   :  { %1790 = vtanh.f32 %v2067_v39  ;;  %v723_v28 = vrot.slane %v2067_v39, 6 }
 0x748   :  { %v640_v42 = vpop.permute.xlu1 %639 }
 0x749   :  { %v2071_v43 = vadd.f32 %v640_v42, %v632_v41 }
 0x74b   :  { %1792 = vtanh.f32 %v2071_v43  ;;  %v799_v32 = vrot.slane %v2071_v43, 2 }
 0x750   :  { %v1791_v44 = vpop.eup %1790 }
 0x751   :  { %566 = vrot.lane.b32.xlu0 %v1791_v44, %s1877_s3 }
 0x758   :  { %v1793_v45 = vpop.eup %1792 }
 0x759   :  { %645 = vrot.lane.b32.xlu1 %v1793_v45, %s1877_s3 }
 0x7c3   :  { %v567_v46 = vpop.permute.xlu0 %566 }
 0x7c4   :  { %v2076_v47 = vmul.f32 %v1787_v30, %v567_v46 }
 0x7c6   :  { %v663_v48 = vpack.c.bf16 %v2076_v47, %v2076_v47 }
 0x7c8   :  { %v665_v49 = vrot.slane %v663_v48, 2  ;;  %v830_v48 = vld [vmem:[#allocation2 + $0x18] sm:$0x3] }
 0x7ca   :  { %666 = vrot.lane.b32.xlu0 %v665_v49, %s1878_s4 }
 0x7cb   :  { %v646_v50 = vpop.permute.xlu1 %645 }
 0x7cc   :  { %v2081_v51 = vmul.f32 %v1789_v33, %v646_v50 }
 0x7ce   :  { %v742_v52 = vpack.c.bf16 %v2081_v51, %v2081_v51 }
 0x7d0   :  { %v744_v53 = vrot.slane %v742_v52, 1 }
 0x7d2   :  { %745 = vrot.lane.b32.xlu1 %v744_v53, %s1878_s4 }
 0x83c   :  { %v667_v54 = vpop.permute.xlu0 %666 }
 0x83d   :  { %1650 = vmatmul.mubr.msk.bf16.vlgmr.msra.gmra.mxu0 %vm157_vm2, %v667_v54 }
 0x83e   :  { %1662 = vmatpush3.bf16.msra.mxu0 %v1930_v7  ;;  %1665 = vmatprep.mubr.msk.bf16.mxu0 %vm1876_vm0, %v1874_v1 }
 0x83f   :  { %1663 = vmatprep.subr.bf16.mxu0 %v1874_v1 }
 0x842   :  { %1664 = vmatpush3.bf16.msra.mxu0 %v1940_v9 }
 0x843   :  { %1677 = vmatprep.subr.bf16.mxu0 %v1874_v1 }
 0x844   :  { %v746_v55 = vpop.permute.xlu1 %745 }
 0x845   :  { %1658 = vmatmul.mubr.msk.bf16.vlgmr.msra.gmra.mxu1 %vm157_vm2, %v746_v55 }
 0x846   :  { %1670 = vmatpush3.bf16.msra.mxu1 %v1949_v11  ;;  %1673 = vmatprep.mubr.msk.bf16.mxu1 %vm1876_vm0, %v1874_v1 }
 0x847   :  { %1671 = vmatprep.subr.bf16.mxu1 %v1874_v1 }
 0x84a   :  { %1672 = vmatpush3.bf16.msra.mxu1 %v1965_v16 }
 0x84b   :  { %1685 = vmatprep.subr.bf16.mxu1 %v1874_v1 }
 0x8fd   :  { %v705_v57 = vpop.f32.mrf.mxu0 }
 0x8fe   :  { %v712_v58 = vrot.slane %v705_v57, 2  ;;  %v831_v57 = vld [vmem:[#allocation2] sm:$0xc0] }
 0x8ff   :  { %v1651_v61 = vpop.f32.mrf.mxu0 }
 0x900   :  { %v714_v62 = vadd.f32 %v712_v58, %v661_v59 }
 0x901   :  { %v708_v63 = vpop.f32.mrf.mxu0 }
 0x902   :  { %1794 = vtanh.f32 %v714_v62  ;;  %v1530_v15 = vmul.f32 -1.442695, %v714_v62 }
 0x903   :  { %v1652_v0 = vpop.f32.mrf.mxu0 }
 0x905   :  { %v784_v3 = vpop.f32.mrf.mxu1 }
 0x906   :  { %v790_v4 = vadd.f32 %v784_v3, %v662_v2 }
 0x907   :  { %v1659_v6 = vpop.f32.mrf.mxu1 }
 0x908   :  { %1796 = vtanh.f32 %v790_v4  ;;  %v1532_v17 = vmul.f32 -1.442695, %v790_v4 }
 0x909   :  { %v787_v8 = vpop.f32.mrf.mxu1  ;;  %1798 = vpow2.f32 %v1530_v15 }
 0x90a   :  { %1800 = vpow2.f32 %v1532_v17 }
 0x90b   :  { %v1660_v12 = vpop.f32.mrf.mxu1 }
 0x90f   :  { %v1795_v13 = vpop.eup %1794 }
 0x910   :  { %727 = vrot.lane.b32.xlu0 %v1795_v13, %s1877_s3 }
 0x915   :  { %v1797_v14 = vpop.eup %1796 }
 0x916   :  { %803 = vrot.lane.b32.xlu1 %v1797_v14, %s1877_s3  ;;  %v1799_v18 = vpop.eup %1798 }
 0x917   :  { %v718_v19 = vadd.f32 1.0, %v1799_v18  ;;  %v1801_v20 = vpop.eup %1800 }
 0x918   :  { %v794_v21 = vadd.f32 1.0, %v1801_v20 }
 0x919   :  { %1802 = vrcp.f32 %v718_v19 }
 0x91a   :  { %1804 = vrcp.f32 %v794_v21 }
 0x926   :  { %v1803_v22 = vpop.eup %1802 }
 0x927   :  { %v1805_v25 = vpop.eup %1804  ;;  %v725_v29 = vmul.f32 %v1803_v22, %v723_v28 }
 0x928   :  { %v801_v33 = vmul.f32 %v1805_v25, %v799_v32 }
 0x982   :  { %v728_v23 = vpop.permute.xlu0 %727 }
 0x983   :  { %v730_v24 = vmul.f32 %v1803_v22, %v728_v23 }
 0x985   :  { %732 = vrot.lane.b32.xlu0 %v730_v24, %s1878_s4 }
 0x988   :  { %v804_v26 = vpop.permute.xlu1 %803 }
 0x989   :  { %v806_v27 = vmul.f32 %v1805_v25, %v804_v26 }
 0x98b   :  { %808 = vrot.lane.b32.xlu1 %v806_v27, %s1878_s4 }
 0x9f7   :  { %v733_v30 = vpop.permute.xlu0 %732 }
 0x9f8   :  { %v2105_v31 = vadd.f32 %v733_v30, %v725_v29 }
 0x9fa   :  { %1806 = vtanh.f32 %v2105_v31  ;;  %v889_v21 = vrot.slane %v2105_v31, 6 }
 0x9fd   :  { %v809_v34 = vpop.permute.xlu1 %808 }
 0x9fe   :  { %v2109_v35 = vadd.f32 %v809_v34, %v801_v33 }
 0xa00   :  { %1808 = vtanh.f32 %v2109_v35 }
 0xa07   :  { %v1807_v36 = vpop.eup %1806 }
 0xa08   :  { %738 = vrot.lane.b32.xlu0 %v1807_v36, %s1877_s3 }
 0xa0d   :  { %v1809_v37 = vpop.eup %1808 }
 0xa0e   :  { %814 = vrot.lane.b32.xlu1 %v1809_v37, %s1877_s3 }
 0xa7a   :  { %v739_v38 = vpop.permute.xlu0 %738 }
 0xa7b   :  { %v2114_v39 = vmul.f32 %v1803_v22, %v739_v38 }
 0xa7d   :  { %v832_v40 = vpack.c.bf16 %v2114_v39, %v2114_v39 }
 0xa7f   :  { %v834_v41 = vrot.slane %v832_v40, 3 }
 0xa80   :  { %v815_v42 = vpop.permute.xlu1 %814 }
 0xa81   :  { %v2118_v43 = vmul.f32 %v1805_v25, %v815_v42  ;;  %835 = vrot.lane.b32.xlu1 %v834_v41, %s1878_s4  ;;  %v967_v25 = vrot.slane %v2109_v35, 2 }
 0xa83   :  { %v908_v44 = vpack.c.bf16 %v2118_v43, %v2118_v43 }
 0xa85   :  { %910 = vrot.lane.b32.xlu0 %v908_v44, %s1878_s4  ;;  %v996_v44 = vld [vmem:[#allocation2 + $0x18] sm:$0xc] }
 0xaf3   :  { %v836_v45 = vpop.permute.xlu1 %835 }
 0xaf4   :  { %1666 = vmatmul.mubr.msk.bf16.vlgmr.msra.gmra.mxu0 %vm157_vm2, %v836_v45 }
 0xaf5   :  { %1678 = vmatpush3.bf16.msra.mxu0 %v1930_v7  ;;  %1681 = vmatprep.mubr.msk.bf16.mxu0 %vm1876_vm0, %v1874_v1 }
 0xaf6   :  { %1679 = vmatprep.subr.bf16.mxu0 %v1874_v1 }
 0xaf7   :  { %v911_v46 = vpop.permute.xlu0 %910 }
 0xaf8   :  { %1674 = vmatmul.mubr.msk.bf16.vlgmr.msra.gmra.mxu1 %vm157_vm2, %v911_v46 }
 0xaf9   :  { %1680 = vmatpush3.bf16.msra.mxu0 %v1940_v9  ;;  %1686 = vmatpush3.bf16.msra.mxu1 %v1949_v11 }
 0xafa   :  { %1687 = vmatprep.subr.bf16.mxu1 %v1874_v1  ;;  %1689 = vmatprep.mubr.msk.bf16.mxu1 %vm1876_vm0, %v1874_v1 }
 0xafb   :  { %1693 = vmatprep.subr.bf16.mxu0 %v1874_v1 }
 0xafd   :  { %1688 = vmatpush3.bf16.msra.mxu1 %v1965_v16 }
 0xafe   :  { %1701 = vmatprep.subr.bf16.mxu1 %v1874_v1 }
 0xbb4   :  { %v874_v49 = vpop.f32.mrf.mxu0 }
 0xbb5   :  { %v880_v50 = vadd.f32 %v874_v49, %v830_v48 }
 0xbb6   :  { %v1667_v52 = vpop.f32.mrf.mxu0 }
 0xbb7   :  { %1810 = vtanh.f32 %v880_v50  ;;  %v1534_v3 = vmul.f32 -1.442695, %v880_v50 }
 0xbb8   :  { %v877_v53 = vpop.f32.mrf.mxu0  ;;  %v949_v54 = vpop.f32.mrf.mxu1 }
 0xbb9   :  { %v956_v55 = vrot.slane %v949_v54, 2  ;;  %v997_v53 = vld [vmem:[#allocation2] sm:$0x30] }
 0xbba   :  { %v1668_v58 = vpop.f32.mrf.mxu0  ;;  %v1675_v59 = vpop.f32.mrf.mxu1 }
 0xbbb   :  { %v958_v61 = vadd.f32 %v956_v55, %v831_v57 }
 0xbbc   :  { %v952_v62 = vpop.f32.mrf.mxu1 }
 0xbbd   :  { %1812 = vtanh.f32 %v958_v61  ;;  %v1536_v4 = vmul.f32 -1.442695, %v958_v61 }
 0xbbe   :  { %v1676_v63 = vpop.f32.mrf.mxu1  ;;  %1814 = vpow2.f32 %v1534_v3 }
 0xbbf   :  { %1816 = vpow2.f32 %v1536_v4 }
 0xbc4   :  { %v1811_v0 = vpop.eup %1810 }
 0xbc5   :  { %893 = vrot.lane.b32.xlu0 %v1811_v0, %s1877_s3 }
 0xbca   :  { %v1813_v2 = vpop.eup %1812 }
 0xbcb   :  { %971 = vrot.lane.b32.xlu1 %v1813_v2, %s1877_s3  ;;  %v1815_v6 = vpop.eup %1814 }
 0xbcc   :  { %v884_v8 = vadd.f32 1.0, %v1815_v6  ;;  %v1817_v12 = vpop.eup %1816 }
 0xbcd   :  { %v962_v13 = vadd.f32 1.0, %v1817_v12 }
 0xbce   :  { %1818 = vrcp.f32 %v884_v8 }
 0xbcf   :  { %1820 = vrcp.f32 %v962_v13 }
 0xbdb   :  { %v1819_v14 = vpop.eup %1818 }
 0xbdc   :  { %v1821_v18 = vpop.eup %1820  ;;  %v891_v22 = vmul.f32 %v1819_v14, %v889_v21 }
 0xbdd   :  { %v969_v26 = vmul.f32 %v1821_v18, %v967_v25 }
 0xc37   :  { %v894_v15 = vpop.permute.xlu0 %893 }
 0xc38   :  { %v896_v17 = vmul.f32 %v1819_v14, %v894_v15 }
 0xc3a   :  { %898 = vrot.lane.b32.xlu0 %v896_v17, %s1878_s4 }
 0xc3d   :  { %v972_v19 = vpop.permute.xlu1 %971 }
 0xc3e   :  { %v974_v20 = vmul.f32 %v1821_v18, %v972_v19 }
 0xc40   :  { %976 = vrot.lane.b32.xlu1 %v974_v20, %s1878_s4 }
 0xcac   :  { %v899_v23 = vpop.permute.xlu0 %898 }
 0xcad   :  { %v2143_v24 = vadd.f32 %v899_v23, %v891_v22 }
 0xcaf   :  { %1822 = vtanh.f32 %v2143_v24  ;;  %v1057_v17 = vrot.slane %v2143_v24, 6 }
 0xcb2   :  { %v977_v27 = vpop.permute.xlu1 %976 }
 0xcb3   :  { %v2147_v28 = vadd.f32 %v977_v27, %v969_v26 }
 0xcb5   :  { %1824 = vtanh.f32 %v2147_v28  ;;  %v1136_v21 = vrot.slane %v2147_v28, 2 }
 0xcbc   :  { %v1823_v29 = vpop.eup %1822 }
 0xcbd   :  { %904 = vrot.lane.b32.xlu0 %v1823_v29, %s1877_s3 }
 0xcc2   :  { %v1825_v30 = vpop.eup %1824 }
 0xcc3   :  { %982 = vrot.lane.b32.xlu1 %v1825_v30, %s1877_s3 }
 0xd2f   :  { %v905_v31 = vpop.permute.xlu0 %904 }
 0xd30   :  { %v2152_v32 = vmul.f32 %v1819_v14, %v905_v31 }
 0xd32   :  { %v998_v33 = vpack.c.bf16 %v2152_v32, %v2152_v32 }
 0xd34   :  { %1000 = vrot.lane.b32.xlu0 %v998_v33, %s1878_s4 }
 0xd35   :  { %v983_v34 = vpop.permute.xlu1 %982 }
 0xd36   :  { %v2157_v35 = vmul.f32 %v1821_v18, %v983_v34 }
 0xd38   :  { %v1076_v36 = vpack.c.bf16 %v2157_v35, %v2157_v35 }
 0xd3a   :  { %v1078_v37 = vrot.slane %v1076_v36, 3 }
 0xd3c   :  { %1079 = vrot.lane.b32.xlu1 %v1078_v37, %s1878_s4 }
 0xda6   :  { %v1001_v38 = vpop.permute.xlu0 %1000 }
 0xda7   :  { %1682 = vmatmul.mubr.msk.bf16.vlgmr.msra.gmra.mxu0 %vm157_vm2, %v1001_v38 }
 0xda8   :  { %1694 = vmatpush3.bf16.msra.mxu0 %v1930_v7  ;;  %1697 = vmatprep.mubr.msk.bf16.mxu0 %vm1876_vm0, %v1874_v1 }
 0xda9   :  { %1695 = vmatprep.subr.bf16.mxu0 %v1874_v1 }
 0xdac   :  { %1696 = vmatpush3.bf16.msra.mxu0 %v1940_v9 }
 0xdad   :  { %1709 = vmatprep.subr.bf16.mxu0 %v1874_v1 }
 0xdae   :  { %v1080_v40 = vpop.permute.xlu1 %1079 }
 0xdaf   :  { %1690 = vmatmul.mubr.msk.bf16.vlgmr.msra.gmra.mxu1 %vm157_vm2, %v1080_v40 }
 0xdb0   :  { %1702 = vmatpush3.bf16.msra.mxu1 %v1949_v11  ;;  %1705 = vmatprep.mubr.msk.bf16.mxu1 %vm1876_vm0, %v1874_v1 }
 0xdb1   :  { %1703 = vmatprep.subr.bf16.mxu1 %v1874_v1 }
 0xdb4   :  { %1704 = vmatpush3.bf16.msra.mxu1 %v1965_v16 }
 0xdb5   :  { %1717 = vmatprep.subr.bf16.mxu1 %v1874_v1 }
 0xe67   :  { %v1039_v41 = vpop.f32.mrf.mxu0 }
 0xe68   :  { %v1046_v42 = vrot.slane %v1039_v41, 6  ;;  %v1165_v41 = vld [vmem:[#allocation2 + $0x18] sm:$0x30] }
 0xe69   :  { %v1683_v45 = vpop.f32.mrf.mxu0 }
 0xe6a   :  { %v1048_v46 = vadd.f32 %v1046_v42, %v996_v44 }
 0xe6b   :  { %v1042_v48 = vpop.f32.mrf.mxu0 }
 0xe6c   :  { %1826 = vtanh.f32 %v1048_v46  ;;  %v1538_v62 = vmul.f32 -1.442695, %v1048_v46 }
 0xe6d   :  { %v1684_v49 = vpop.f32.mrf.mxu0 }
 0xe6e   :  { %v1166_v49 = vld [vmem:[#allocation2] sm:$0xc] }
 0xe6f   :  { %v1118_v50 = vpop.f32.mrf.mxu1 }
 0xe70   :  { %v1125_v52 = vrot.slane %v1118_v50, 4 }
 0xe71   :  { %v1691_v54 = vpop.f32.mrf.mxu1 }
 0xe72   :  { %v1127_v55 = vadd.f32 %v1125_v52, %v997_v53 }
 0xe73   :  { %v1121_v57 = vpop.f32.mrf.mxu1 }
 0xe74   :  { %1828 = vtanh.f32 %v1127_v55  ;;  %v1540_v63 = vmul.f32 -1.442695, %v1127_v55 }
 0xe75   :  { %v1692_v58 = vpop.f32.mrf.mxu1  ;;  %1830 = vpow2.f32 %v1538_v62 }
 0xe76   :  { %1832 = vpow2.f32 %v1540_v63 }
 0xe79   :  { %v1827_v59 = vpop.eup %1826 }
 0xe7a   :  { %1061 = vrot.lane.b32.xlu0 %v1827_v59, %s1877_s3 }
 0xe81   :  { %v1829_v61 = vpop.eup %1828 }
 0xe82   :  { %1140 = vrot.lane.b32.xlu1 %v1829_v61, %s1877_s3  ;;  %v1831_v0 = vpop.eup %1830 }
 0xe83   :  { %v1052_v2 = vadd.f32 1.0, %v1831_v0  ;;  %v1833_v3 = vpop.eup %1832 }
 0xe84   :  { %v1131_v4 = vadd.f32 1.0, %v1833_v3 }
 0xe85   :  { %1834 = vrcp.f32 %v1052_v2 }
 0xe86   :  { %1836 = vrcp.f32 %v1131_v4 }
 0xe92   :  { %v1835_v6 = vpop.eup %1834 }
 0xe93   :  { %v1837_v13 = vpop.eup %1836  ;;  %v1059_v18 = vmul.f32 %v1835_v6, %v1057_v17 }
 0xe94   :  { %v1138_v22 = vmul.f32 %v1837_v13, %v1136_v21 }
 0xeec   :  { %v1062_v8 = vpop.permute.xlu0 %1061 }
 0xeed   :  { %v1064_v12 = vmul.f32 %v1835_v6, %v1062_v8 }
 0xeef   :  { %1066 = vrot.lane.b32.xlu0 %v1064_v12, %s1878_s4 }
 0xef4   :  { %v1141_v14 = vpop.permute.xlu1 %1140 }
 0xef5   :  { %v1143_v15 = vmul.f32 %v1837_v13, %v1141_v14 }
 0xef7   :  { %1145 = vrot.lane.b32.xlu1 %v1143_v15, %s1878_s4 }
 0xf61   :  { %v1067_v19 = vpop.permute.xlu0 %1066 }
 0xf62   :  { %v2181_v20 = vadd.f32 %v1067_v19, %v1059_v18 }
 0xf64   :  { %1838 = vtanh.f32 %v2181_v20 }
 0xf69   :  { %v1146_v23 = vpop.permute.xlu1 %1145 }
 0xf6a   :  { %v2185_v25 = vadd.f32 %v1146_v23, %v1138_v22 }
 0xf6c   :  { %1840 = vtanh.f32 %v2185_v25  ;;  %v1306_v14 = vrot.slane %v2185_v25, 2 }
 0xf71   :  { %v1839_v26 = vpop.eup %1838 }
 0xf72   :  { %1072 = vrot.lane.b32.xlu0 %v1839_v26, %s1877_s3 }
 0xf79   :  { %v1841_v27 = vpop.eup %1840 }
 0xf7a   :  { %1151 = vrot.lane.b32.xlu1 %v1841_v27, %s1877_s3 }
 0xfe4   :  { %v1073_v24 = vpop.permute.xlu0 %1072 }
 0xfe5   :  { %v2190_v29 = vmul.f32 %v1835_v6, %v1073_v24  ;;  %v1227_v6 = vrot.slane %v2181_v20, 6 }
 0xfe7   :  { %v1167_v30 = vpack.c.bf16 %v2190_v29, %v2190_v29 }
 0xfe9   :  { %v1169_v31 = vrot.slane %v1167_v30, 1 }
 0xfeb   :  { %1170 = vrot.lane.b32.xlu0 %v1169_v31, %s1878_s4 }
 0xfec   :  { %v1152_v28 = vpop.permute.xlu1 %1151 }
 0xfed   :  { %v2195_v33 = vmul.f32 %v1837_v13, %v1152_v28 }
 0xfef   :  { %v1246_v34 = vpack.c.bf16 %v2195_v33, %v2195_v33 }
 0xff1   :  { %v1248_v36 = vrot.slane %v1246_v34, 2 }
 0xff3   :  { %1249 = vrot.lane.b32.xlu1 %v1248_v36, %s1878_s4 }
0x105d   :  { %v1171_v37 = vpop.permute.xlu0 %1170 }
0x105e   :  { %1698 = vmatmul.mubr.msk.bf16.vlgmr.msra.gmra.mxu0 %vm157_vm2, %v1171_v37  ;;  %v1335_v37 = vld [vmem:[#allocation2 + $0x18] sm:$0xc0] }
0x105f   :  { %1710 = vmatpush3.bf16.msra.mxu0 %v1930_v7  ;;  %1713 = vmatprep.mubr.msk.bf16.mxu0 %vm1876_vm0, %v1874_v1 }
0x1060   :  { %1711 = vmatprep.subr.bf16.mxu0 %v1874_v1 }
0x1063   :  { %1712 = vmatpush3.bf16.msra.mxu0 %v1940_v9 }
0x1065   :  { %v1250_v38 = vpop.permute.xlu1 %1249 }
0x1066   :  { %1706 = vmatmul.mubr.msk.bf16.vlgmr.msra.gmra.mxu1 %vm157_vm2, %v1250_v38 }
0x1067   :  { %1718 = vmatpush3.bf16.msra.mxu1 %v1949_v11  ;;  %1721 = vmatprep.mubr.msk.bf16.mxu1 %vm1876_vm0, %v1874_v1 }
0x1068   :  { %1719 = vmatprep.subr.bf16.mxu1 %v1874_v1 }
0x106b   :  { %1720 = vmatpush3.bf16.msra.mxu1 %v1965_v16 }
0x111e   :  { %v1209_v7 = vpop.f32.mrf.mxu0 }
0x111f   :  { %v1216_v40 = vrot.slane %v1209_v7, 4 }
0x1120   :  { %v1699_v42 = vpop.f32.mrf.mxu0 }
0x1121   :  { %v1218_v44 = vadd.f32 %v1216_v40, %v1165_v41  ;;  %v1336_v42 = vld [vmem:[#allocation2] sm:$0x3] }
0x1122   :  { %v1212_v45 = vpop.f32.mrf.mxu0 }
0x1123   :  { %1842 = vtanh.f32 %v1218_v44  ;;  %v1542_v16 = vmul.f32 -1.442695, %v1218_v44 }
0x1124   :  { %v1700_v9 = vpop.f32.mrf.mxu0 }
0x1126   :  { %v1288_v46 = vpop.f32.mrf.mxu1 }
0x1127   :  { %v1295_v48 = vrot.slane %v1288_v46, 6 }
0x1128   :  { %v1707_v50 = vpop.f32.mrf.mxu1 }
0x1129   :  { %v1297_v11 = vadd.f32 %v1295_v48, %v1166_v49 }
0x112a   :  { %v1291_v52 = vpop.f32.mrf.mxu1 }
0x112b   :  { %1844 = vtanh.f32 %v1297_v11  ;;  %v1544_v55 = vmul.f32 -1.442695, %v1297_v11 }
0x112c   :  { %v1708_v53 = vpop.f32.mrf.mxu1  ;;  %1846 = vpow2.f32 %v1542_v16 }
0x112d   :  { %1848 = vpow2.f32 %v1544_v55 }
0x1130   :  { %v1843_v54 = vpop.eup %1842 }
0x1131   :  { %1231 = vrot.lane.b32.xlu0 %v1843_v54, %s1877_s3 }
0x1138   :  { %v1845_v1 = vpop.eup %1844 }
0x1139   :  { %1310 = vrot.lane.b32.xlu1 %v1845_v1, %s1877_s3  ;;  %v1847_v57 = vpop.eup %1846 }
0x113a   :  { %v1222_v58 = vadd.f32 1.0, %v1847_v57  ;;  %v1849_v59 = vpop.eup %1848 }
0x113b   :  { %v1301_v61 = vadd.f32 1.0, %v1849_v59 }
0x113c   :  { %1850 = vrcp.f32 %v1222_v58 }
0x113d   :  { %1852 = vrcp.f32 %v1301_v61 }
0x1149   :  { %v1851_v62 = vpop.eup %1850 }
0x114a   :  { %v1853_v2 = vpop.eup %1852  ;;  %v1229_v8 = vmul.f32 %v1851_v62, %v1227_v6 }
0x114b   :  { %v1308_v15 = vmul.f32 %v1853_v2, %v1306_v14 }
0x11a3   :  { %v1232_v63 = vpop.permute.xlu0 %1231 }
0x11a4   :  { %v1234_v0 = vmul.f32 %v1851_v62, %v1232_v63 }
0x11a6   :  { %1236 = vrot.lane.b32.xlu0 %v1234_v0, %s1878_s4 }
0x11ab   :  { %v1311_v3 = vpop.permute.xlu1 %1310 }
0x11ac   :  { %v1313_v4 = vmul.f32 %v1853_v2, %v1311_v3 }
0x11ae   :  { %1315 = vrot.lane.b32.xlu1 %v1313_v4, %s1878_s4 }
0x1218   :  { %v1237_v12 = vpop.permute.xlu0 %1236 }
0x1219   :  { %v2217_v13 = vadd.f32 %v1237_v12, %v1229_v8 }
0x121b   :  { %1854 = vtanh.f32 %v2217_v13  ;;  %v1397_v63 = vrot.slane %v2217_v13, 6 }
0x1220   :  { %v1316_v17 = vpop.permute.xlu1 %1315 }
0x1221   :  { %v2221_v18 = vadd.f32 %v1316_v17, %v1308_v15 }
0x1223   :  { %1856 = vtanh.f32 %v2221_v18  ;;  %v1473_v4 = vrot.slane %v2221_v18, 2 }
0x1228   :  { %v1855_v19 = vpop.eup %1854 }
0x1229   :  { %1242 = vrot.lane.b32.xlu0 %v1855_v19, %s1877_s3 }
0x1230   :  { %v1857_v21 = vpop.eup %1856 }
0x1231   :  { %1321 = vrot.lane.b32.xlu1 %v1857_v21, %s1877_s3 }
0x129b   :  { %v1243_v20 = vpop.permute.xlu0 %1242 }
0x129c   :  { %v2226_v22 = vmul.f32 %v1851_v62, %v1243_v20 }
0x129e   :  { %v1337_v23 = vpack.c.bf16 %v2226_v22, %v2226_v22 }
0x12a0   :  { %v1339_v26 = vrot.slane %v1337_v23, 2 }
0x12a2   :  { %1340 = vrot.lane.b32.xlu0 %v1339_v26, %s1878_s4 }
0x12a3   :  { %v1322_v25 = vpop.permute.xlu1 %1321 }
0x12a4   :  { %v2231_v27 = vmul.f32 %v1853_v2, %v1322_v25 }
0x12a6   :  { %v1416_v24 = vpack.c.bf16 %v2231_v27, %v2231_v27 }
0x12a8   :  { %v1418_v30 = vrot.slane %v1416_v24, 1 }
0x12aa   :  { %1419 = vrot.lane.b32.xlu1 %v1418_v30, %s1878_s4 }
0x1314   :  { %v1341_v31 = vpop.permute.xlu0 %1340 }
0x1315   :  { %1714 = vmatmul.mubr.msk.bf16.vlgmr.msra.gmra.mxu0 %vm157_vm2, %v1341_v31 }
0x131c   :  { %v1420_v28 = vpop.permute.xlu1 %1419 }
0x131d   :  { %1722 = vmatmul.mubr.msk.bf16.vlgmr.msra.gmra.mxu1 %vm157_vm2, %v1420_v28 }
0x13d5   :  { %v1379_v34 = vpop.f32.mrf.mxu0 }
0x13d6   :  { %v1386_v36 = vrot.slane %v1379_v34, 2 }
0x13d7   :  { %v1715_v38 = vpop.f32.mrf.mxu0 }
0x13d8   :  { %v1388_v7 = vadd.f32 %v1386_v36, %v1335_v37 }
0x13d9   :  { %v1382_v40 = vpop.f32.mrf.mxu0 }
0x13da   :  { %1858 = vtanh.f32 %v1388_v7  ;;  %v1546_v11 = vmul.f32 -1.442695, %v1388_v7 }
0x13db   :  { %v1716_v41 = vpop.f32.mrf.mxu0 }
0x13dd   :  { %v1458_v44 = vpop.f32.mrf.mxu1 }
0x13de   :  { %v1464_v45 = vadd.f32 %v1458_v44, %v1336_v42 }
0x13df   :  { %v1723_v9 = vpop.f32.mrf.mxu1 }
0x13e0   :  { %1860 = vtanh.f32 %v1464_v45  ;;  %v1548_v52 = vmul.f32 -1.442695, %v1464_v45 }
0x13e1   :  { %v1461_v46 = vpop.f32.mrf.mxu1  ;;  %1862 = vpow2.f32 %v1546_v11 }
0x13e2   :  { %1864 = vpow2.f32 %v1548_v52 }
0x13e3   :  { %v1724_v48 = vpop.f32.mrf.mxu1 }
0x13e7   :  { %v1859_v49 = vpop.eup %1858 }
0x13e8   :  { %1401 = vrot.lane.b32.xlu0 %v1859_v49, %s1877_s3 }
0x13ed   :  { %v1861_v50 = vpop.eup %1860 }
0x13ee   :  { %1477 = vrot.lane.b32.xlu1 %v1861_v50, %s1877_s3  ;;  %v1863_v53 = vpop.eup %1862 }
0x13ef   :  { %v1392_v54 = vadd.f32 1.0, %v1863_v53  ;;  %v1865_v1 = vpop.eup %1864 }
0x13f0   :  { %v1468_v16 = vadd.f32 1.0, %v1865_v1 }
0x13f1   :  { %1866 = vrcp.f32 %v1392_v54 }
0x13f2   :  { %1868 = vrcp.f32 %v1468_v16 }
0x13fe   :  { %v1867_v55 = vpop.eup %1866 }
0x13ff   :  { %v1869_v59 = vpop.eup %1868  ;;  %v1399_v0 = vmul.f32 %v1867_v55, %v1397_v63 }
0x1400   :  { %v1475_v6 = vmul.f32 %v1869_v59, %v1473_v4 }
0x145a   :  { %v1402_v57 = vpop.permute.xlu0 %1401 }
0x145b   :  { %v1404_v58 = vmul.f32 %v1867_v55, %v1402_v57 }
0x145d   :  { %1406 = vrot.lane.b32.xlu0 %v1404_v58, %s1878_s4 }
0x1460   :  { %v1478_v61 = vpop.permute.xlu1 %1477 }
0x1461   :  { %v1480_v62 = vmul.f32 %v1869_v59, %v1478_v61 }
0x1463   :  { %1482 = vrot.lane.b32.xlu1 %v1480_v62, %s1878_s4 }
0x14cf   :  { %v1407_v2 = vpop.permute.xlu0 %1406 }
0x14d0   :  { %v1409_v3 = vadd.f32 %v1407_v2, %v1399_v0 }
0x14d2   :  { %1870 = vtanh.f32 %v1409_v3 }
0x14d5   :  { %v1483_v8 = vpop.permute.xlu1 %1482 }
0x14d6   :  { %v1485_v12 = vadd.f32 %v1483_v8, %v1475_v6 }
0x14d8   :  { %1872 = vtanh.f32 %v1485_v12 }
0x14df   :  { %v1871_v14 = vpop.eup %1870 }
0x14e0   :  { %1412 = vrot.lane.b32.xlu0 %v1871_v14, %s1877_s3 }
0x14e4   :  { %307 = vrot.lane.b32.xlu0 %v2000_v5, %s1878_s4 }
0x14e5   :  { %v1873_v15 = vpop.eup %1872 }
0x14e6   :  { %1488 = vrot.lane.b32.xlu1 %v1873_v15, %s1877_s3 }
0x14e8   :  { %478 = vrot.lane.b32.xlu0 %v2038_v56, %s1878_s4 }
0x14ea   :  { %313 = vrot.lane.b32.xlu1 %v2005_v10, %s1877_s3 }
0x14ec   :  { %650 = vrot.lane.b32.xlu0 %v2076_v47, %s1878_s4 }
0x14ee   :  { %484 = vrot.lane.b32.xlu1 %v2043_v60, %s1877_s3 }
0x14f0   :  { %819 = vrot.lane.b32.xlu0 %v2114_v39, %s1878_s4 }
0x14f2   :  { %656 = vrot.lane.b32.xlu1 %v2081_v51, %s1877_s3 }
0x14f4   :  { %987 = vrot.lane.b32.xlu0 %v2152_v32, %s1878_s4 }
0x14f6   :  { %825 = vrot.lane.b32.xlu1 %v2118_v43, %s1877_s3 }
0x14f8   :  { %1156 = vrot.lane.b32.xlu0 %v2190_v29, %s1878_s4 }
0x14fa   :  { %992 = vrot.lane.b32.xlu1 %v2157_v35, %s1877_s3 }
0x14fc   :  { %1326 = vrot.lane.b32.xlu0 %v2226_v22, %s1878_s4 }
0x14fe   :  { %1161 = vrot.lane.b32.xlu1 %v2195_v33, %s1877_s3 }
0x1502   :  { %1331 = vrot.lane.b32.xlu1 %v2231_v27, %s1877_s3 }
0x1552   :  { %v1413_v5 = vpop.permute.xlu0 %1412 }
0x1553   :  { %v1415_v10 = vmul.f32 %v1867_v55, %v1413_v5 }
0x1555   :  { %1493 = vrot.lane.b32.xlu0 %v1415_v10, %s1878_s4 }
0x1556   :  { %v308_v56 = vpop.permute.xlu0 %307 }
0x1557   :  { %311 = vst.msk [vmem:[%s2345_s5] sm:$0x3] %vm310_vm3, %v308_v56 }
0x1558   :  { %v1489_v60 = vpop.permute.xlu1 %1488 }
0x1559   :  { %v1491_v47 = vmul.f32 %v1869_v59, %v1489_v60 }
0x155a   :  { %v479_v51 = vpop.permute.xlu0 %478 }
0x155b   :  { %482 = vst.msk [vmem:[%s2345_s5] sm:$0xc] %vm481_vm4, %v479_v51  ;;  %1498 = vrot.lane.b32.xlu1 %v1491_v47, %s1877_s3 }
0x155c   :  { %v314_v39 = vpop.permute.xlu1 %313 }
0x155d   :  { %317 = vst.msk [vmem:[%s2345_s5 + $0x8] sm:$0xc0] %vm316_vm5, %v314_v39 }
0x155e   :  { %v651_v43 = vpop.permute.xlu0 %650 }
0x155f   :  { %654 = vst.msk [vmem:[%s2345_s5] sm:$0x30] %vm653_vm6, %v651_v43 }
0x1560   :  { %v485_v32 = vpop.permute.xlu1 %484 }
0x1561   :  { %488 = vst.msk [vmem:[%s2345_s5 + $0x8] sm:$0x30] %vm487_vm7, %v485_v32 }
0x1562   :  { %v820_v35 = vpop.permute.xlu0 %819 }
0x1563   :  { %823 = vst.msk [vmem:[%s2345_s5] sm:$0xc0] %vm822_vm8, %v820_v35 }
0x1564   :  { %v657_v29 = vpop.permute.xlu1 %656 }
0x1565   :  { %660 = vst.msk [vmem:[%s2345_s5 + $0x8] sm:$0xc] %vm659_vm9, %v657_v29 }
0x1566   :  { %v988_v33 = vpop.permute.xlu0 %987 }
0x1568   :  { %v826_v13 = vpop.permute.xlu1 %825 }
0x1569   :  { %829 = vst.msk [vmem:[%s2345_s5 + $0x8] sm:$0x3] %vm828_vm10, %v826_v13 }
0x156a   :  { %990 = vst.msk [vmem:[%s2345_s5 + $0x8] sm:$0x3] %vm310_vm3, %v988_v33  ;;  %v1157_v17 = vpop.permute.xlu0 %1156 }
0x156b   :  { %1159 = vst.msk [vmem:[%s2345_s5 + $0x8] sm:$0xc] %vm481_vm4, %v1157_v17 }
0x156c   :  { %v993_v18 = vpop.permute.xlu1 %992 }
0x156d   :  { %995 = vst.msk [vmem:[%s2345_s5] sm:$0xc0] %vm316_vm5, %v993_v18 }
0x156e   :  { %v1327_v19 = vpop.permute.xlu0 %1326 }
0x156f   :  { %1329 = vst.msk [vmem:[%s2345_s5 + $0x8] sm:$0x30] %vm653_vm6, %v1327_v19 }
0x1570   :  { %v1162_v21 = vpop.permute.xlu1 %1161 }
0x1571   :  { %1164 = vst.msk [vmem:[%s2345_s5] sm:$0x30] %vm487_vm7, %v1162_v21 }
0x1574   :  { %v1332_v20 = vpop.permute.xlu1 %1331 }
0x1575   :  { %1334 = vst.msk [vmem:[%s2345_s5] sm:$0xc] %vm659_vm9, %v1332_v20 }
0x15c7   :  { %v1494_v22 = vpop.permute.xlu0 %1493 }
0x15c8   :  { %1496 = vst.msk [vmem:[%s2345_s5 + $0x8] sm:$0xc0] %vm822_vm8, %v1494_v22 }
0x15cd   :  { %v1499_v23 = vpop.permute.xlu1 %1498 }
0x15ce   :  { %1501 = vst.msk [vmem:[%s2345_s5] sm:$0x3] %vm828_vm10, %v1499_v23 }

// kernel: rnn_model_forward.6
= control target key start
LH: loop header
LB: loop body
LE: loop exit
PB: predicated region body
PF: predicated region fallthrough
CT: control target
= control target key end

     0   :  { %10 = vsyncpa [#allocation4], 0  ;;  %s1913_s18 = smov [#allocation3]   ;;  %s2380_s0 = inlined_call_operand.vmem [shape: f32[16,64], index: 0, kind: input, shape index: {}]   ;;  %s2381_s1 = inlined_call_operand.vmem [shape: bf16[64,256], index: 1, kind: input, shape index: {}]   ;;  %s2382_s2 = inlined_call_operand.hbm [shape: bf16[32,128], index: 2, kind: input, shape index: {}]   ;;  %s2383_s3 = inlined_call_operand.vmem [shape: bf16[32,128], index: 3, kind: input, shape index: {}]   ;;  %s2384_s4 = inlined_call_operand.vmem [shape: f32[1,256], index: 4, kind: input, shape index: {}]   ;;  %s2385_s5 = inlined_call_operand.vmem [shape: f32[16,64], index: 5, kind: output, shape index: {}]  }
   0x1   :  { %s20_s19 = sshll.u32 %s1913_s18, 4  ;;  %s21_s19 = int_to_ptr.vmem [resolvable:$true] %s20_s19 }
   0x2   :  { %s1899_s20 = scalar_lea.vmem %s21_s19, 256  ;;  %p1904_p1 = scmp.lt.s32.totalorder %s21_s19, %s21_s19 }
   0x3   :  { %p1900_p0 = scmp.ne.s32.totalorder %s21_s19, %s1899_s20  ;;  %p1905_p2 = scmp.lt.s32.totalorder %s1899_s20, %s1899_s20 }
   0x5   :  { %p1906_p3 = por %p1905_p2, %p1904_p1 }
   0x7   :  { %p1907_p4 = pnand %p1906_p3, %p1900_p0 }
   0x9   :  { %1910 = shalt.err (!%p1907_p4)
}
   0xa   :  { %s1914_s21 = smov 64   ;;  %s1915_s22 = smov 4  }
   0xb   :  { %26 = dma.hbm_to_vmem [thread:$0]  %s2382_s2, 256, %s21_s19, [#allocation4], %s1914_s21, %s1914_s21, %s1915_s22  }
   0xc   :  { %1911 = dma.done.wait [#allocation4], 256  }
   0xd   :  { %1912 = vsyncadd [#allocation4], 4294967040  ;;  %v1916_v0 = vmov 0.0   ;;  %v1917_v1 = vmov 0   ;;  %vm1918_vm0 = vmmov 0   ;;  %v1973_v7 = vld [vmem:[#allocation3 + $0x8] sm:$0xff]   ;;  %v48_v17 = vlaneseq }
   0xe   :  { %1612 = vmatprep.subr.bf16.mxu1 %v1916_v0  ;;  %134 = vmatprep.mubr.bf16.mxu0 %v1917_v1  ;;  %v1747_v2 = vld [vmem:[%s2381_s1 + $0x34] ss:$8 sps:$4 sm:$0xff]   ;;  %v1749_v3 = vld [vmem:[%s2381_s1 + $0x30] ss:$8 sps:$4 sm:$0xff]   ;;  %v1750_v4 = vld [vmem:[%s2381_s1 + $0x24] ss:$8 sps:$4 sm:$0xff]  }
   0xf   :  { %1616 = vmatprep.mubr.msk.bf16.mxu1 %vm1918_vm0, %v1916_v0  ;;  %110 = vmatprep.subr.bf16.mxu0 %v1747_v2  ;;  %v1752_v5 = vld [vmem:[%s2381_s1 + $0x20] ss:$8 sps:$4 sm:$0xff]   ;;  %v1753_v6 = vld [vmem:[%s2381_s1 + $0x14] ss:$8 sps:$4 sm:$0xff]   ;;  %v1755_v8 = vld [vmem:[%s2381_s1 + $0x10] ss:$8 sps:$4 sm:$0xff]  }
  0x10   :  { %111 = vmatpush1.bf16.msra.mxu0 %v1749_v3  ;;  %1613 = vmatpush3.bf16.msra.mxu1 %v1973_v7  ;;  %v1980_v9 = vld [vmem:[#allocation3] sm:$0xff]   ;;  %v1989_v11 = vld [vmem:[%s2383_s3 + $0x8] sm:$0xff]   ;;  %vm98_vm1 = vcmask 523264   ;;  %v49_v18 = vshrl.u32 %v48_v17, 7  ;;  %vm171_vm2 = vcmask 261120   ;;  %vm324_vm3 = vcmask 254976  }
  0x11   :  { %112 = vmatprep.subr.bf16.mxu0 %v1750_v4  ;;  %1614 = vmatprep.subr.bf16.mxu1 %v1916_v0  ;;  %v1757_v10 = vld [vmem:[%s2381_s1 + $0x4] ss:$8 sps:$4 sm:$0xff]   ;;  %v1759_v12 = vld [vmem:[%s2381_s1] ss:$8 sps:$4 sm:$0xff]   ;;  %vm495_vm4 = vcmask 257026   ;;  %vm330_vm5 = vcmask 523526  }
  0x12   :  { %v35_v13 = vld [vmem:[%s2380_s0] sm:$0xff]  ;;  %v36_v14 = vld [vmem:[%s2380_s0 + $0x8] sm:$0xff]  ;;  %v50_v19 = vsub.s32 0, %v49_v18  ;;  %v54_v22 = vsub.s32 1, %v49_v18  ;;  %vm667_vm6 = vcmask 259076   ;;  %vm501_vm7 = vcmask 521476  }
  0x13   :  { %v37_v15 = vpack.c.bf16 %v36_v14, %v35_v13  ;;  %v2005_v16 = vld [vmem:[%s2383_s3] sm:$0xff]   ;;  %s1919_s3 = smov 32   ;;  %vm836_vm8 = vcmask 261126   ;;  %vm673_vm9 = vcmask 519426   ;;  %vm842_vm10 = vcmask 517376  }
  0x14   :  { %113 = vmatpush1.bf16.msra.mxu0 %v1752_v5  ;;  %1615 = vmatpush3.bf16.msra.mxu1 %v1980_v9  ;;  %v46_v20 = vld [vmem:[%s2384_s4] sm:$0x3] }
  0x15   :  { %114 = vmatprep.subr.bf16.mxu0 %v1753_v6  ;;  %1620 = vmatprep.subr.bf16.mxu1 %v1916_v0  ;;  %v51_v23 = vrot.slane %v46_v20, %v50_v19  ;;  %v55_v25 = vrot.slane %v46_v20, %v54_v22 }
  0x17   :  { %1617 = vmatmul.mubr.bf16.vlgmr.msra.gmra.mxu1 %v1917_v1 }
  0x18   :  { %115 = vmatpush1.bf16.msra.mxu0 %v1755_v8  ;;  %1621 = vmatpush3.bf16.msra.mxu1 %v1989_v11 }
  0x19   :  { %116 = vmatprep.subr.bf16.mxu0 %v1757_v10  ;;  %1624 = vmatprep.mubr.msk.bf16.mxu1 %vm1918_vm0, %v1916_v0 }
  0x1a   :  { %1622 = vmatprep.subr.bf16.mxu1 %v1916_v0 }
  0x1c   :  { %117 = vmatpush1.bf16.msra.mxu0 %v1759_v12  ;;  %1623 = vmatpush3.bf16.msra.mxu1 %v2005_v16 }
  0x1d   :  { %1628 = vmatprep.subr.bf16.mxu0 %v1916_v0  ;;  %1636 = vmatprep.subr.bf16.mxu1 %v1916_v0 }
  0x1f   :  { %1529 = vmatmul.mubr.msk.bf16.vlgmr.msra.gmra.mxu0 %vm98_vm1, %v37_v15  ;;  %1625 = vmatmul.mubr.bf16.vlgmr.msra.gmra.mxu1 %v1917_v1 }
  0x20   :  { %1629 = vmatpush3.bf16.msra.mxu0 %v1973_v7  ;;  %1632 = vmatprep.mubr.msk.bf16.mxu0 %vm1918_vm0, %v1916_v0 }
  0x21   :  { %1630 = vmatprep.subr.bf16.mxu0 %v1916_v0  ;;  %1637 = vmatpush3.bf16.msra.mxu1 %v1989_v11 }
  0x22   :  { %1640 = vmatprep.mubr.msk.bf16.mxu1 %vm1918_vm0, %v1916_v0  ;;  %1638 = vmatprep.subr.bf16.mxu1 %v1916_v0 }
  0x24   :  { %1631 = vmatpush3.bf16.msra.mxu0 %v1980_v9 }
  0x25   :  { %1644 = vmatprep.subr.bf16.mxu0 %v1916_v0  ;;  %1639 = vmatpush3.bf16.msra.mxu1 %v2005_v16 }
  0x26   :  { %1652 = vmatprep.subr.bf16.mxu1 %v1916_v0 }
  0xd7   :  { %v209_v21 = vpop.f32.mrf.mxu1 }
  0xd9   :  { %v1618_v24 = vpop.f32.mrf.mxu1 }
  0xdb   :  { %v212_v26 = vpop.f32.mrf.mxu1 }
  0xdd   :  { %v1619_v29 = vpop.f32.mrf.mxu1 }
  0xdf   :  { %v136_v27 = vpop.f32.mrf.mxu0  ;;  %v286_v32 = vpop.f32.mrf.mxu1 }
  0xe0   :  { %v137_v28 = vadd.f32 %v136_v27, %v51_v23  ;;  %v293_v42 = vrot.slane %v286_v32, 2 }
  0xe1   :  { %v138_v30 = vpop.f32.mrf.mxu0  ;;  %v1626_v35 = vpop.f32.mrf.mxu1 }
  0xe2   :  { %145 = vst [vmem:[#allocation2 + $0x10] sm:$0xff] %v137_v28  ;;  %v139_v31 = vadd.f32 %v138_v30, %v55_v25 }
  0xe3   :  { %v140_v33 = vpop.f32.mrf.mxu0  ;;  %v289_v38 = vpop.f32.mrf.mxu1 }
  0xe4   :  { %146 = vst [vmem:[#allocation2] sm:$0xff] %v139_v31  ;;  %v141_v34 = vadd.f32 %v140_v33, %v51_v23 }
  0xe5   :  { %v142_v36 = vpop.f32.mrf.mxu0  ;;  %v1627_v39 = vpop.f32.mrf.mxu1 }
  0xe6   :  { %147 = vst [vmem:[#allocation2 + $0x18] sm:$0xff] %v141_v34  ;;  %v143_v37 = vadd.f32 %v142_v36, %v55_v25 }
  0xe8   :  { %148 = vst [vmem:[#allocation2 + $0x8] sm:$0xff] %v143_v37 }
  0xe9   :  { %v157_v40 = vld [vmem:[#allocation2 + $0x10] sm:$0x3]  ;;  %v332_v19 = vld [vmem:[#allocation2 + $0x10] sm:$0xc] }
  0xea   :  { %v215_v41 = vadd.f32 %v209_v21, %v157_v40 }
  0xec   :  { %1763 = vtanh.f32 %v215_v41  ;;  %v1532_v47 = vmul.f32 -1.442695, %v215_v41 }
  0xef   :  { %v158_v43 = vld [vmem:[#allocation2 + $0x8] sm:$0xc0]  ;;  %v333_v26 = vld [vmem:[#allocation2 + $0x8] sm:$0x30] }
  0xf0   :  { %v295_v44 = vadd.f32 %v293_v42, %v158_v43 }
  0xf2   :  { %1765 = vtanh.f32 %v295_v44  ;;  %v1535_v48 = vmul.f32 -1.442695, %v295_v44 }
  0xf3   :  { %1767 = vpow2.f32 %v1532_v47 }
  0xf4   :  { %1769 = vpow2.f32 %v1535_v48 }
  0xf9   :  { %v1764_v45 = vpop.eup %1763 }
  0xfa   :  { %225 = vrot.lane.b32.xlu0 %v1764_v45, %s1914_s21 }
  0xff   :  { %v1766_v46 = vpop.eup %1765 }
 0x100   :  { %305 = vrot.lane.b32.xlu0 %v1766_v46, %s1914_s21  ;;  %v1768_v49 = vpop.eup %1767 }
 0x101   :  { %v219_v50 = vadd.f32 1.0, %v1768_v49  ;;  %v1770_v51 = vpop.eup %1769 }
 0x102   :  { %v299_v52 = vadd.f32 1.0, %v1770_v51 }
 0x103   :  { %1771 = vrcp.f32 %v219_v50 }
 0x104   :  { %1773 = vrcp.f32 %v299_v52 }
 0x110   :  { %v1772_v53 = vpop.eup %1771 }
 0x111   :  { %v1774_v56 = vpop.eup %1773  ;;  %v223_v59 = vmul.f32 0.0, %v1772_v53 }
 0x112   :  { %v303_v62 = vmul.f32 0.0, %v1774_v56 }
 0x16c   :  { %v226_v54 = vpop.permute.xlu0 %225 }
 0x16d   :  { %v228_v55 = vmul.f32 %v1772_v53, %v226_v54 }
 0x16f   :  { %230 = vrot.lane.b32.xlu1 %v228_v55, %s1919_s3 }
 0x172   :  { %v306_v57 = vpop.permute.xlu0 %305 }
 0x173   :  { %v308_v58 = vmul.f32 %v1774_v56, %v306_v57 }
 0x175   :  { %310 = vrot.lane.b32.xlu1 %v308_v58, %s1919_s3 }
 0x1e1   :  { %v231_v60 = vpop.permute.xlu1 %230 }
 0x1e2   :  { %v2032_v61 = vadd.f32 %v231_v60, %v223_v59 }
 0x1e4   :  { %1775 = vtanh.f32 %v2032_v61  ;;  %v393_v45 = vrot.slane %v2032_v61, 6 }
 0x1e7   :  { %v311_v63 = vpop.permute.xlu1 %310 }
 0x1e8   :  { %v2035_v1 = vadd.f32 %v311_v63, %v303_v62 }
 0x1ea   :  { %1777 = vtanh.f32 %v2035_v1  ;;  %v472_v49 = vrot.slane %v2035_v1, 2 }
 0x1f1   :  { %v1776_v2 = vpop.eup %1775 }
 0x1f2   :  { %236 = vrot.lane.b32.xlu0 %v1776_v2, %s1914_s21 }
 0x1f7   :  { %v1778_v3 = vpop.eup %1777 }
 0x1f8   :  { %316 = vrot.lane.b32.xlu1 %v1778_v3, %s1914_s21 }
 0x264   :  { %v237_v4 = vpop.permute.xlu0 %236 }
 0x265   :  { %v2040_v5 = vmul.f32 %v1772_v53, %v237_v4  ;;  %v503_v4 = vld [vmem:[#allocation2 + $0x10] sm:$0x30] }
 0x267   :  { %v334_v6 = vpack.c.bf16 %v2040_v5, %v2040_v5 }
 0x269   :  { %336 = vrot.lane.b32.xlu0 %v334_v6, %s1919_s3 }
 0x26a   :  { %v317_v8 = vpop.permute.xlu1 %316 }
 0x26b   :  { %v2045_v10 = vmul.f32 %v1774_v56, %v317_v8 }
 0x26d   :  { %v412_v12 = vpack.c.bf16 %v2045_v10, %v2045_v10 }
 0x26f   :  { %v414_v13 = vrot.slane %v412_v12, 3 }
 0x271   :  { %415 = vrot.lane.b32.xlu1 %v414_v13, %s1919_s3 }
 0x2db   :  { %v337_v14 = vpop.permute.xlu0 %336 }
 0x2dc   :  { %1633 = vmatmul.mubr.msk.bf16.vlgmr.msra.gmra.mxu0 %vm171_vm2, %v337_v14 }
 0x2dd   :  { %1645 = vmatpush3.bf16.msra.mxu0 %v1973_v7  ;;  %1648 = vmatprep.mubr.msk.bf16.mxu0 %vm1918_vm0, %v1916_v0 }
 0x2de   :  { %1646 = vmatprep.subr.bf16.mxu0 %v1916_v0 }
 0x2e1   :  { %1647 = vmatpush3.bf16.msra.mxu0 %v1980_v9 }
 0x2e2   :  { %1660 = vmatprep.subr.bf16.mxu0 %v1916_v0 }
 0x2e3   :  { %v416_v15 = vpop.permute.xlu1 %415 }
 0x2e4   :  { %1641 = vmatmul.mubr.msk.bf16.vlgmr.msra.gmra.mxu1 %vm171_vm2, %v416_v15 }
 0x2e5   :  { %1653 = vmatpush3.bf16.msra.mxu1 %v1989_v11  ;;  %1656 = vmatprep.mubr.msk.bf16.mxu1 %vm1918_vm0, %v1916_v0 }
 0x2e6   :  { %1654 = vmatprep.subr.bf16.mxu1 %v1916_v0 }
 0x2e9   :  { %1655 = vmatpush3.bf16.msra.mxu1 %v2005_v16 }
 0x2ea   :  { %1668 = vmatprep.subr.bf16.mxu1 %v1916_v0 }
 0x39c   :  { %v375_v17 = vpop.f32.mrf.mxu0 }
 0x39d   :  { %v382_v18 = vrot.slane %v375_v17, 6  ;;  %v504_v17 = vld [vmem:[#allocation2 + $0x8] sm:$0xc] }
 0x39e   :  { %v1634_v20 = vpop.f32.mrf.mxu0 }
 0x39f   :  { %v384_v21 = vadd.f32 %v382_v18, %v332_v19 }
 0x3a0   :  { %v378_v22 = vpop.f32.mrf.mxu0 }
 0x3a1   :  { %1779 = vtanh.f32 %v384_v21  ;;  %v1537_v33 = vmul.f32 -1.442695, %v384_v21 }
 0x3a2   :  { %v1635_v23 = vpop.f32.mrf.mxu0 }
 0x3a4   :  { %v454_v24 = vpop.f32.mrf.mxu1 }
 0x3a5   :  { %v461_v25 = vrot.slane %v454_v24, 4 }
 0x3a6   :  { %v1642_v27 = vpop.f32.mrf.mxu1 }
 0x3a7   :  { %v463_v28 = vadd.f32 %v461_v25, %v333_v26 }
 0x3a8   :  { %v457_v29 = vpop.f32.mrf.mxu1 }
 0x3a9   :  { %1781 = vtanh.f32 %v463_v28  ;;  %v1539_v34 = vmul.f32 -1.442695, %v463_v28 }
 0x3aa   :  { %v1643_v30 = vpop.f32.mrf.mxu1  ;;  %1783 = vpow2.f32 %v1537_v33 }
 0x3ab   :  { %1785 = vpow2.f32 %v1539_v34 }
 0x3ae   :  { %v1780_v31 = vpop.eup %1779 }
 0x3af   :  { %397 = vrot.lane.b32.xlu0 %v1780_v31, %s1914_s21 }
 0x3b6   :  { %v1782_v32 = vpop.eup %1781 }
 0x3b7   :  { %476 = vrot.lane.b32.xlu1 %v1782_v32, %s1914_s21  ;;  %v1784_v35 = vpop.eup %1783 }
 0x3b8   :  { %v388_v36 = vadd.f32 1.0, %v1784_v35  ;;  %v1786_v37 = vpop.eup %1785 }
 0x3b9   :  { %v467_v38 = vadd.f32 1.0, %v1786_v37 }
 0x3ba   :  { %1787 = vrcp.f32 %v388_v36 }
 0x3bb   :  { %1789 = vrcp.f32 %v467_v38 }
 0x3c7   :  { %v1788_v39 = vpop.eup %1787 }
 0x3c8   :  { %v1790_v42 = vpop.eup %1789  ;;  %v395_v46 = vmul.f32 %v1788_v39, %v393_v45 }
 0x3c9   :  { %v474_v50 = vmul.f32 %v1790_v42, %v472_v49 }
 0x421   :  { %v398_v40 = vpop.permute.xlu0 %397 }
 0x422   :  { %v400_v41 = vmul.f32 %v1788_v39, %v398_v40 }
 0x424   :  { %402 = vrot.lane.b32.xlu0 %v400_v41, %s1919_s3 }
 0x429   :  { %v477_v43 = vpop.permute.xlu1 %476 }
 0x42a   :  { %v479_v44 = vmul.f32 %v1790_v42, %v477_v43 }
 0x42c   :  { %481 = vrot.lane.b32.xlu1 %v479_v44, %s1919_s3 }
 0x496   :  { %v403_v47 = vpop.permute.xlu0 %402 }
 0x497   :  { %v2069_v48 = vadd.f32 %v403_v47, %v395_v46 }
 0x499   :  { %1791 = vtanh.f32 %v2069_v48  ;;  %v565_v36 = vrot.slane %v2069_v48, 6 }
 0x49e   :  { %v482_v51 = vpop.permute.xlu1 %481 }
 0x49f   :  { %v2073_v52 = vadd.f32 %v482_v51, %v474_v50 }
 0x4a1   :  { %1793 = vtanh.f32 %v2073_v52  ;;  %v644_v40 = vrot.slane %v2073_v52, 2 }
 0x4a6   :  { %v1792_v53 = vpop.eup %1791 }
 0x4a7   :  { %408 = vrot.lane.b32.xlu0 %v1792_v53, %s1914_s21 }
 0x4ae   :  { %v1794_v54 = vpop.eup %1793 }
 0x4af   :  { %487 = vrot.lane.b32.xlu1 %v1794_v54, %s1914_s21 }
 0x519   :  { %v409_v55 = vpop.permute.xlu0 %408 }
 0x51a   :  { %v2078_v56 = vmul.f32 %v1788_v39, %v409_v55 }
 0x51c   :  { %v505_v57 = vpack.c.bf16 %v2078_v56, %v2078_v56 }
 0x51e   :  { %v507_v58 = vrot.slane %v505_v57, 1 }
 0x520   :  { %508 = vrot.lane.b32.xlu0 %v507_v58, %s1919_s3 }
 0x521   :  { %v488_v59 = vpop.permute.xlu1 %487 }
 0x522   :  { %v2083_v60 = vmul.f32 %v1790_v42, %v488_v59  ;;  %v675_v59 = vld [vmem:[#allocation2 + $0x10] sm:$0xc0] }
 0x524   :  { %v584_v61 = vpack.c.bf16 %v2083_v60, %v2083_v60 }
 0x526   :  { %v586_v62 = vrot.slane %v584_v61, 2 }
 0x528   :  { %587 = vrot.lane.b32.xlu1 %v586_v62, %s1919_s3 }
 0x592   :  { %v509_v63 = vpop.permute.xlu0 %508 }
 0x593   :  { %1649 = vmatmul.mubr.msk.bf16.vlgmr.msra.gmra.mxu0 %vm171_vm2, %v509_v63 }
 0x594   :  { %1661 = vmatpush3.bf16.msra.mxu0 %v1973_v7  ;;  %1664 = vmatprep.mubr.msk.bf16.mxu0 %vm1918_vm0, %v1916_v0 }
 0x595   :  { %1662 = vmatprep.subr.bf16.mxu0 %v1916_v0 }
 0x598   :  { %1663 = vmatpush3.bf16.msra.mxu0 %v1980_v9 }
 0x599   :  { %1676 = vmatprep.subr.bf16.mxu0 %v1916_v0 }
 0x59a   :  { %v588_v1 = vpop.permute.xlu1 %587 }
 0x59b   :  { %1657 = vmatmul.mubr.msk.bf16.vlgmr.msra.gmra.mxu1 %vm171_vm2, %v588_v1 }
 0x59c   :  { %1669 = vmatpush3.bf16.msra.mxu1 %v1989_v11  ;;  %1672 = vmatprep.mubr.msk.bf16.mxu1 %vm1918_vm0, %v1916_v0 }
 0x59d   :  { %1670 = vmatprep.subr.bf16.mxu1 %v1916_v0 }
 0x5a0   :  { %1671 = vmatpush3.bf16.msra.mxu1 %v2005_v16 }
 0x5a1   :  { %1684 = vmatprep.subr.bf16.mxu1 %v1916_v0 }
 0x653   :  { %v547_v2 = vpop.f32.mrf.mxu0 }
 0x654   :  { %v554_v3 = vrot.slane %v547_v2, 4  ;;  %v676_v2 = vld [vmem:[#allocation2 + $0x8] sm:$0x3] }
 0x655   :  { %v1650_v6 = vpop.f32.mrf.mxu0 }
 0x656   :  { %v556_v8 = vadd.f32 %v554_v3, %v503_v4 }
 0x657   :  { %v550_v12 = vpop.f32.mrf.mxu0 }
 0x658   :  { %1795 = vtanh.f32 %v556_v8  ;;  %v1541_v24 = vmul.f32 -1.442695, %v556_v8 }
 0x659   :  { %v1651_v13 = vpop.f32.mrf.mxu0 }
 0x65b   :  { %v626_v14 = vpop.f32.mrf.mxu1 }
 0x65c   :  { %v633_v15 = vrot.slane %v626_v14, 6 }
 0x65d   :  { %v1658_v18 = vpop.f32.mrf.mxu1 }
 0x65e   :  { %v635_v19 = vadd.f32 %v633_v15, %v504_v17 }
 0x65f   :  { %v629_v20 = vpop.f32.mrf.mxu1 }
 0x660   :  { %1797 = vtanh.f32 %v635_v19  ;;  %v1543_v25 = vmul.f32 -1.442695, %v635_v19 }
 0x661   :  { %v1659_v21 = vpop.f32.mrf.mxu1  ;;  %1799 = vpow2.f32 %v1541_v24 }
 0x662   :  { %1801 = vpow2.f32 %v1543_v25 }
 0x665   :  { %v1796_v22 = vpop.eup %1795 }
 0x666   :  { %569 = vrot.lane.b32.xlu0 %v1796_v22, %s1914_s21 }
 0x66d   :  { %v1798_v23 = vpop.eup %1797 }
 0x66e   :  { %648 = vrot.lane.b32.xlu1 %v1798_v23, %s1914_s21  ;;  %v1800_v26 = vpop.eup %1799 }
 0x66f   :  { %v560_v27 = vadd.f32 1.0, %v1800_v26  ;;  %v1802_v28 = vpop.eup %1801 }
 0x670   :  { %v639_v29 = vadd.f32 1.0, %v1802_v28 }
 0x671   :  { %1803 = vrcp.f32 %v560_v27 }
 0x672   :  { %1805 = vrcp.f32 %v639_v29 }
 0x67e   :  { %v1804_v30 = vpop.eup %1803 }
 0x67f   :  { %v1806_v33 = vpop.eup %1805  ;;  %v567_v37 = vmul.f32 %v1804_v30, %v565_v36 }
 0x680   :  { %v646_v41 = vmul.f32 %v1806_v33, %v644_v40 }
 0x6d8   :  { %v570_v31 = vpop.permute.xlu0 %569 }
 0x6d9   :  { %v572_v32 = vmul.f32 %v1804_v30, %v570_v31 }
 0x6db   :  { %574 = vrot.lane.b32.xlu0 %v572_v32, %s1919_s3 }
 0x6e0   :  { %v649_v34 = vpop.permute.xlu1 %648 }
 0x6e1   :  { %v651_v35 = vmul.f32 %v1806_v33, %v649_v34 }
 0x6e3   :  { %653 = vrot.lane.b32.xlu1 %v651_v35, %s1919_s3 }
 0x74d   :  { %v575_v38 = vpop.permute.xlu0 %574 }
 0x74e   :  { %v2107_v39 = vadd.f32 %v575_v38, %v567_v37 }
 0x750   :  { %1807 = vtanh.f32 %v2107_v39  ;;  %v737_v28 = vrot.slane %v2107_v39, 6 }
 0x755   :  { %v654_v42 = vpop.permute.xlu1 %653 }
 0x756   :  { %v2111_v43 = vadd.f32 %v654_v42, %v646_v41 }
 0x758   :  { %1809 = vtanh.f32 %v2111_v43  ;;  %v813_v32 = vrot.slane %v2111_v43, 2 }
 0x75d   :  { %v1808_v44 = vpop.eup %1807 }
 0x75e   :  { %580 = vrot.lane.b32.xlu0 %v1808_v44, %s1914_s21 }
 0x765   :  { %v1810_v45 = vpop.eup %1809 }
 0x766   :  { %659 = vrot.lane.b32.xlu1 %v1810_v45, %s1914_s21 }
 0x7d0   :  { %v581_v46 = vpop.permute.xlu0 %580 }
 0x7d1   :  { %v2116_v47 = vmul.f32 %v1804_v30, %v581_v46 }
 0x7d3   :  { %v677_v48 = vpack.c.bf16 %v2116_v47, %v2116_v47 }
 0x7d5   :  { %v679_v49 = vrot.slane %v677_v48, 2  ;;  %v844_v48 = vld [vmem:[#allocation2 + $0x18] sm:$0x3] }
 0x7d7   :  { %680 = vrot.lane.b32.xlu0 %v679_v49, %s1919_s3 }
 0x7d8   :  { %v660_v50 = vpop.permute.xlu1 %659 }
 0x7d9   :  { %v2121_v51 = vmul.f32 %v1806_v33, %v660_v50 }
 0x7db   :  { %v756_v52 = vpack.c.bf16 %v2121_v51, %v2121_v51 }
 0x7dd   :  { %v758_v53 = vrot.slane %v756_v52, 1 }
 0x7df   :  { %759 = vrot.lane.b32.xlu1 %v758_v53, %s1919_s3 }
 0x849   :  { %v681_v54 = vpop.permute.xlu0 %680 }
 0x84a   :  { %1665 = vmatmul.mubr.msk.bf16.vlgmr.msra.gmra.mxu0 %vm171_vm2, %v681_v54 }
 0x84b   :  { %1677 = vmatpush3.bf16.msra.mxu0 %v1973_v7  ;;  %1680 = vmatprep.mubr.msk.bf16.mxu0 %vm1918_vm0, %v1916_v0 }
 0x84c   :  { %1678 = vmatprep.subr.bf16.mxu0 %v1916_v0 }
 0x84f   :  { %1679 = vmatpush3.bf16.msra.mxu0 %v1980_v9 }
 0x850   :  { %1692 = vmatprep.subr.bf16.mxu0 %v1916_v0 }
 0x851   :  { %v760_v55 = vpop.permute.xlu1 %759 }
 0x852   :  { %1673 = vmatmul.mubr.msk.bf16.vlgmr.msra.gmra.mxu1 %vm171_vm2, %v760_v55 }
 0x853   :  { %1685 = vmatpush3.bf16.msra.mxu1 %v1989_v11  ;;  %1688 = vmatprep.mubr.msk.bf16.mxu1 %vm1918_vm0, %v1916_v0 }
 0x854   :  { %1686 = vmatprep.subr.bf16.mxu1 %v1916_v0 }
 0x857   :  { %1687 = vmatpush3.bf16.msra.mxu1 %v2005_v16 }
 0x858   :  { %1700 = vmatprep.subr.bf16.mxu1 %v1916_v0 }
 0x90a   :  { %v719_v57 = vpop.f32.mrf.mxu0 }
 0x90b   :  { %v726_v58 = vrot.slane %v719_v57, 2  ;;  %v845_v57 = vld [vmem:[#allocation2] sm:$0xc0] }
 0x90c   :  { %v1666_v61 = vpop.f32.mrf.mxu0 }
 0x90d   :  { %v728_v62 = vadd.f32 %v726_v58, %v675_v59 }
 0x90e   :  { %v722_v63 = vpop.f32.mrf.mxu0 }
 0x90f   :  { %1811 = vtanh.f32 %v728_v62  ;;  %v1545_v15 = vmul.f32 -1.442695, %v728_v62 }
 0x910   :  { %v1667_v1 = vpop.f32.mrf.mxu0 }
 0x912   :  { %v798_v3 = vpop.f32.mrf.mxu1 }
 0x913   :  { %v804_v4 = vadd.f32 %v798_v3, %v676_v2 }
 0x914   :  { %v1674_v6 = vpop.f32.mrf.mxu1 }
 0x915   :  { %1813 = vtanh.f32 %v804_v4  ;;  %v1547_v17 = vmul.f32 -1.442695, %v804_v4 }
 0x916   :  { %v801_v8 = vpop.f32.mrf.mxu1  ;;  %1815 = vpow2.f32 %v1545_v15 }
 0x917   :  { %1817 = vpow2.f32 %v1547_v17 }
 0x918   :  { %v1675_v12 = vpop.f32.mrf.mxu1 }
 0x91c   :  { %v1812_v13 = vpop.eup %1811 }
 0x91d   :  { %741 = vrot.lane.b32.xlu0 %v1812_v13, %s1914_s21 }
 0x922   :  { %v1814_v14 = vpop.eup %1813 }
 0x923   :  { %817 = vrot.lane.b32.xlu1 %v1814_v14, %s1914_s21  ;;  %v1816_v18 = vpop.eup %1815 }
 0x924   :  { %v732_v19 = vadd.f32 1.0, %v1816_v18  ;;  %v1818_v20 = vpop.eup %1817 }
 0x925   :  { %v808_v21 = vadd.f32 1.0, %v1818_v20 }
 0x926   :  { %1819 = vrcp.f32 %v732_v19 }
 0x927   :  { %1821 = vrcp.f32 %v808_v21 }
 0x933   :  { %v1820_v22 = vpop.eup %1819 }
 0x934   :  { %v1822_v25 = vpop.eup %1821  ;;  %v739_v29 = vmul.f32 %v1820_v22, %v737_v28 }
 0x935   :  { %v815_v33 = vmul.f32 %v1822_v25, %v813_v32 }
 0x98f   :  { %v742_v23 = vpop.permute.xlu0 %741 }
 0x990   :  { %v744_v24 = vmul.f32 %v1820_v22, %v742_v23 }
 0x992   :  { %746 = vrot.lane.b32.xlu0 %v744_v24, %s1919_s3 }
 0x995   :  { %v818_v26 = vpop.permute.xlu1 %817 }
 0x996   :  { %v820_v27 = vmul.f32 %v1822_v25, %v818_v26 }
 0x998   :  { %822 = vrot.lane.b32.xlu1 %v820_v27, %s1919_s3 }
 0xa04   :  { %v747_v30 = vpop.permute.xlu0 %746 }
 0xa05   :  { %v2145_v31 = vadd.f32 %v747_v30, %v739_v29 }
 0xa07   :  { %1823 = vtanh.f32 %v2145_v31  ;;  %v903_v21 = vrot.slane %v2145_v31, 6 }
 0xa0a   :  { %v823_v34 = vpop.permute.xlu1 %822 }
 0xa0b   :  { %v2149_v35 = vadd.f32 %v823_v34, %v815_v33 }
 0xa0d   :  { %1825 = vtanh.f32 %v2149_v35 }
 0xa14   :  { %v1824_v36 = vpop.eup %1823 }
 0xa15   :  { %752 = vrot.lane.b32.xlu0 %v1824_v36, %s1914_s21 }
 0xa1a   :  { %v1826_v37 = vpop.eup %1825 }
 0xa1b   :  { %828 = vrot.lane.b32.xlu1 %v1826_v37, %s1914_s21 }
 0xa87   :  { %v753_v38 = vpop.permute.xlu0 %752 }
 0xa88   :  { %v2154_v39 = vmul.f32 %v1820_v22, %v753_v38 }
 0xa8a   :  { %v846_v40 = vpack.c.bf16 %v2154_v39, %v2154_v39 }
 0xa8c   :  { %v848_v41 = vrot.slane %v846_v40, 3 }
 0xa8d   :  { %v829_v42 = vpop.permute.xlu1 %828 }
 0xa8e   :  { %v2158_v43 = vmul.f32 %v1822_v25, %v829_v42  ;;  %849 = vrot.lane.b32.xlu1 %v848_v41, %s1919_s3  ;;  %v981_v25 = vrot.slane %v2149_v35, 2 }
 0xa90   :  { %v922_v44 = vpack.c.bf16 %v2158_v43, %v2158_v43 }
 0xa92   :  { %924 = vrot.lane.b32.xlu0 %v922_v44, %s1919_s3  ;;  %v1010_v44 = vld [vmem:[#allocation2 + $0x18] sm:$0xc] }
 0xb00   :  { %v850_v45 = vpop.permute.xlu1 %849 }
 0xb01   :  { %1681 = vmatmul.mubr.msk.bf16.vlgmr.msra.gmra.mxu0 %vm171_vm2, %v850_v45 }
 0xb02   :  { %1693 = vmatpush3.bf16.msra.mxu0 %v1973_v7  ;;  %1696 = vmatprep.mubr.msk.bf16.mxu0 %vm1918_vm0, %v1916_v0 }
 0xb03   :  { %1694 = vmatprep.subr.bf16.mxu0 %v1916_v0 }
 0xb04   :  { %v925_v46 = vpop.permute.xlu0 %924 }
 0xb05   :  { %1689 = vmatmul.mubr.msk.bf16.vlgmr.msra.gmra.mxu1 %vm171_vm2, %v925_v46 }
 0xb06   :  { %1695 = vmatpush3.bf16.msra.mxu0 %v1980_v9  ;;  %1701 = vmatpush3.bf16.msra.mxu1 %v1989_v11 }
 0xb07   :  { %1702 = vmatprep.subr.bf16.mxu1 %v1916_v0  ;;  %1704 = vmatprep.mubr.msk.bf16.mxu1 %vm1918_vm0, %v1916_v0 }
 0xb08   :  { %1708 = vmatprep.subr.bf16.mxu0 %v1916_v0 }
 0xb0a   :  { %1703 = vmatpush3.bf16.msra.mxu1 %v2005_v16 }
 0xb0b   :  { %1716 = vmatprep.subr.bf16.mxu1 %v1916_v0 }
 0xbc1   :  { %v888_v49 = vpop.f32.mrf.mxu0 }
 0xbc2   :  { %v894_v50 = vadd.f32 %v888_v49, %v844_v48 }
 0xbc3   :  { %v1682_v52 = vpop.f32.mrf.mxu0 }
 0xbc4   :  { %1827 = vtanh.f32 %v894_v50  ;;  %v1549_v3 = vmul.f32 -1.442695, %v894_v50 }
 0xbc5   :  { %v891_v53 = vpop.f32.mrf.mxu0  ;;  %v963_v54 = vpop.f32.mrf.mxu1 }
 0xbc6   :  { %v970_v55 = vrot.slane %v963_v54, 2  ;;  %v1011_v53 = vld [vmem:[#allocation2] sm:$0x30] }
 0xbc7   :  { %v1683_v58 = vpop.f32.mrf.mxu0  ;;  %v1690_v59 = vpop.f32.mrf.mxu1 }
 0xbc8   :  { %v972_v61 = vadd.f32 %v970_v55, %v845_v57 }
 0xbc9   :  { %v966_v62 = vpop.f32.mrf.mxu1 }
 0xbca   :  { %1829 = vtanh.f32 %v972_v61  ;;  %v1551_v4 = vmul.f32 -1.442695, %v972_v61 }
 0xbcb   :  { %v1691_v63 = vpop.f32.mrf.mxu1  ;;  %1831 = vpow2.f32 %v1549_v3 }
 0xbcc   :  { %1833 = vpow2.f32 %v1551_v4 }
 0xbd1   :  { %v1828_v1 = vpop.eup %1827 }
 0xbd2   :  { %907 = vrot.lane.b32.xlu0 %v1828_v1, %s1914_s21 }
 0xbd7   :  { %v1830_v2 = vpop.eup %1829 }
 0xbd8   :  { %985 = vrot.lane.b32.xlu1 %v1830_v2, %s1914_s21  ;;  %v1832_v6 = vpop.eup %1831 }
 0xbd9   :  { %v898_v8 = vadd.f32 1.0, %v1832_v6  ;;  %v1834_v12 = vpop.eup %1833 }
 0xbda   :  { %v976_v13 = vadd.f32 1.0, %v1834_v12 }
 0xbdb   :  { %1835 = vrcp.f32 %v898_v8 }
 0xbdc   :  { %1837 = vrcp.f32 %v976_v13 }
 0xbe8   :  { %v1836_v14 = vpop.eup %1835 }
 0xbe9   :  { %v1838_v18 = vpop.eup %1837  ;;  %v905_v22 = vmul.f32 %v1836_v14, %v903_v21 }
 0xbea   :  { %v983_v26 = vmul.f32 %v1838_v18, %v981_v25 }
 0xc44   :  { %v908_v15 = vpop.permute.xlu0 %907 }
 0xc45   :  { %v910_v17 = vmul.f32 %v1836_v14, %v908_v15 }
 0xc47   :  { %912 = vrot.lane.b32.xlu0 %v910_v17, %s1919_s3 }
 0xc4a   :  { %v986_v19 = vpop.permute.xlu1 %985 }
 0xc4b   :  { %v988_v20 = vmul.f32 %v1838_v18, %v986_v19 }
 0xc4d   :  { %990 = vrot.lane.b32.xlu1 %v988_v20, %s1919_s3 }
 0xcb9   :  { %v913_v23 = vpop.permute.xlu0 %912 }
 0xcba   :  { %v2183_v24 = vadd.f32 %v913_v23, %v905_v22 }
 0xcbc   :  { %1839 = vtanh.f32 %v2183_v24  ;;  %v1071_v17 = vrot.slane %v2183_v24, 6 }
 0xcbf   :  { %v991_v27 = vpop.permute.xlu1 %990 }
 0xcc0   :  { %v2187_v28 = vadd.f32 %v991_v27, %v983_v26 }
 0xcc2   :  { %1841 = vtanh.f32 %v2187_v28  ;;  %v1150_v21 = vrot.slane %v2187_v28, 2 }
 0xcc9   :  { %v1840_v29 = vpop.eup %1839 }
 0xcca   :  { %918 = vrot.lane.b32.xlu0 %v1840_v29, %s1914_s21 }
 0xccf   :  { %v1842_v30 = vpop.eup %1841 }
 0xcd0   :  { %996 = vrot.lane.b32.xlu1 %v1842_v30, %s1914_s21 }
 0xd3c   :  { %v919_v31 = vpop.permute.xlu0 %918 }
 0xd3d   :  { %v2192_v32 = vmul.f32 %v1836_v14, %v919_v31 }
 0xd3f   :  { %v1012_v33 = vpack.c.bf16 %v2192_v32, %v2192_v32 }
 0xd41   :  { %1014 = vrot.lane.b32.xlu0 %v1012_v33, %s1919_s3 }
 0xd42   :  { %v997_v34 = vpop.permute.xlu1 %996 }
 0xd43   :  { %v2197_v35 = vmul.f32 %v1838_v18, %v997_v34 }
 0xd45   :  { %v1090_v36 = vpack.c.bf16 %v2197_v35, %v2197_v35 }
 0xd47   :  { %v1092_v37 = vrot.slane %v1090_v36, 3 }
 0xd49   :  { %1093 = vrot.lane.b32.xlu1 %v1092_v37, %s1919_s3 }
 0xdb3   :  { %v1015_v38 = vpop.permute.xlu0 %1014 }
 0xdb4   :  { %1697 = vmatmul.mubr.msk.bf16.vlgmr.msra.gmra.mxu0 %vm171_vm2, %v1015_v38 }
 0xdb5   :  { %1709 = vmatpush3.bf16.msra.mxu0 %v1973_v7  ;;  %1712 = vmatprep.mubr.msk.bf16.mxu0 %vm1918_vm0, %v1916_v0 }
 0xdb6   :  { %1710 = vmatprep.subr.bf16.mxu0 %v1916_v0 }
 0xdb9   :  { %1711 = vmatpush3.bf16.msra.mxu0 %v1980_v9 }
 0xdba   :  { %1724 = vmatprep.subr.bf16.mxu0 %v1916_v0 }
 0xdbb   :  { %v1094_v40 = vpop.permute.xlu1 %1093 }
 0xdbc   :  { %1705 = vmatmul.mubr.msk.bf16.vlgmr.msra.gmra.mxu1 %vm171_vm2, %v1094_v40 }
 0xdbd   :  { %1717 = vmatpush3.bf16.msra.mxu1 %v1989_v11  ;;  %1720 = vmatprep.mubr.msk.bf16.mxu1 %vm1918_vm0, %v1916_v0 }
 0xdbe   :  { %1718 = vmatprep.subr.bf16.mxu1 %v1916_v0 }
 0xdc1   :  { %1719 = vmatpush3.bf16.msra.mxu1 %v2005_v16 }
 0xdc2   :  { %1732 = vmatprep.subr.bf16.mxu1 %v1916_v0 }
 0xe74   :  { %v1053_v41 = vpop.f32.mrf.mxu0 }
 0xe75   :  { %v1060_v42 = vrot.slane %v1053_v41, 6  ;;  %v1179_v41 = vld [vmem:[#allocation2 + $0x18] sm:$0x30] }
 0xe76   :  { %v1698_v45 = vpop.f32.mrf.mxu0 }
 0xe77   :  { %v1062_v46 = vadd.f32 %v1060_v42, %v1010_v44 }
 0xe78   :  { %v1056_v48 = vpop.f32.mrf.mxu0 }
 0xe79   :  { %1843 = vtanh.f32 %v1062_v46  ;;  %v1553_v62 = vmul.f32 -1.442695, %v1062_v46 }
 0xe7a   :  { %v1699_v49 = vpop.f32.mrf.mxu0 }
 0xe7b   :  { %v1180_v49 = vld [vmem:[#allocation2] sm:$0xc] }
 0xe7c   :  { %v1132_v50 = vpop.f32.mrf.mxu1 }
 0xe7d   :  { %v1139_v52 = vrot.slane %v1132_v50, 4 }
 0xe7e   :  { %v1706_v54 = vpop.f32.mrf.mxu1 }
 0xe7f   :  { %v1141_v55 = vadd.f32 %v1139_v52, %v1011_v53 }
 0xe80   :  { %v1135_v57 = vpop.f32.mrf.mxu1 }
 0xe81   :  { %1845 = vtanh.f32 %v1141_v55  ;;  %v1555_v63 = vmul.f32 -1.442695, %v1141_v55 }
 0xe82   :  { %v1707_v58 = vpop.f32.mrf.mxu1  ;;  %1847 = vpow2.f32 %v1553_v62 }
 0xe83   :  { %1849 = vpow2.f32 %v1555_v63 }
 0xe86   :  { %v1844_v59 = vpop.eup %1843 }
 0xe87   :  { %1075 = vrot.lane.b32.xlu0 %v1844_v59, %s1914_s21 }
 0xe8e   :  { %v1846_v61 = vpop.eup %1845 }
 0xe8f   :  { %1154 = vrot.lane.b32.xlu1 %v1846_v61, %s1914_s21  ;;  %v1848_v1 = vpop.eup %1847 }
 0xe90   :  { %v1066_v2 = vadd.f32 1.0, %v1848_v1  ;;  %v1850_v3 = vpop.eup %1849 }
 0xe91   :  { %v1145_v4 = vadd.f32 1.0, %v1850_v3 }
 0xe92   :  { %1851 = vrcp.f32 %v1066_v2 }
 0xe93   :  { %1853 = vrcp.f32 %v1145_v4 }
 0xe9f   :  { %v1852_v6 = vpop.eup %1851 }
 0xea0   :  { %v1854_v13 = vpop.eup %1853  ;;  %v1073_v18 = vmul.f32 %v1852_v6, %v1071_v17 }
 0xea1   :  { %v1152_v22 = vmul.f32 %v1854_v13, %v1150_v21 }
 0xef9   :  { %v1076_v8 = vpop.permute.xlu0 %1075 }
 0xefa   :  { %v1078_v12 = vmul.f32 %v1852_v6, %v1076_v8 }
 0xefc   :  { %1080 = vrot.lane.b32.xlu0 %v1078_v12, %s1919_s3 }
 0xf01   :  { %v1155_v14 = vpop.permute.xlu1 %1154 }
 0xf02   :  { %v1157_v15 = vmul.f32 %v1854_v13, %v1155_v14 }
 0xf04   :  { %1159 = vrot.lane.b32.xlu1 %v1157_v15, %s1919_s3 }
 0xf6e   :  { %v1081_v19 = vpop.permute.xlu0 %1080 }
 0xf6f   :  { %v2221_v20 = vadd.f32 %v1081_v19, %v1073_v18 }
 0xf71   :  { %1855 = vtanh.f32 %v2221_v20 }
 0xf76   :  { %v1160_v23 = vpop.permute.xlu1 %1159 }
 0xf77   :  { %v2225_v25 = vadd.f32 %v1160_v23, %v1152_v22 }
 0xf79   :  { %1857 = vtanh.f32 %v2225_v25  ;;  %v1320_v14 = vrot.slane %v2225_v25, 2 }
 0xf7e   :  { %v1856_v26 = vpop.eup %1855 }
 0xf7f   :  { %1086 = vrot.lane.b32.xlu0 %v1856_v26, %s1914_s21 }
 0xf86   :  { %v1858_v27 = vpop.eup %1857 }
 0xf87   :  { %1165 = vrot.lane.b32.xlu1 %v1858_v27, %s1914_s21 }
 0xff1   :  { %v1087_v24 = vpop.permute.xlu0 %1086 }
 0xff2   :  { %v2230_v29 = vmul.f32 %v1852_v6, %v1087_v24  ;;  %v1241_v6 = vrot.slane %v2221_v20, 6 }
 0xff4   :  { %v1181_v30 = vpack.c.bf16 %v2230_v29, %v2230_v29 }
 0xff6   :  { %v1183_v31 = vrot.slane %v1181_v30, 1 }
 0xff8   :  { %1184 = vrot.lane.b32.xlu0 %v1183_v31, %s1919_s3 }
 0xff9   :  { %v1166_v28 = vpop.permute.xlu1 %1165 }
 0xffa   :  { %v2235_v33 = vmul.f32 %v1854_v13, %v1166_v28 }
 0xffc   :  { %v1260_v34 = vpack.c.bf16 %v2235_v33, %v2235_v33 }
 0xffe   :  { %v1262_v36 = vrot.slane %v1260_v34, 2 }
0x1000   :  { %1263 = vrot.lane.b32.xlu1 %v1262_v36, %s1919_s3 }
0x106a   :  { %v1185_v37 = vpop.permute.xlu0 %1184 }
0x106b   :  { %1713 = vmatmul.mubr.msk.bf16.vlgmr.msra.gmra.mxu0 %vm171_vm2, %v1185_v37  ;;  %v1349_v37 = vld [vmem:[#allocation2 + $0x18] sm:$0xc0] }
0x106c   :  { %1725 = vmatpush3.bf16.msra.mxu0 %v1973_v7  ;;  %1728 = vmatprep.mubr.msk.bf16.mxu0 %vm1918_vm0, %v1916_v0 }
0x106d   :  { %1726 = vmatprep.subr.bf16.mxu0 %v1916_v0 }
0x1070   :  { %1727 = vmatpush3.bf16.msra.mxu0 %v1980_v9 }
0x1072   :  { %v1264_v38 = vpop.permute.xlu1 %1263 }
0x1073   :  { %1721 = vmatmul.mubr.msk.bf16.vlgmr.msra.gmra.mxu1 %vm171_vm2, %v1264_v38 }
0x1074   :  { %1733 = vmatpush3.bf16.msra.mxu1 %v1989_v11  ;;  %1736 = vmatprep.mubr.msk.bf16.mxu1 %vm1918_vm0, %v1916_v0 }
0x1075   :  { %1734 = vmatprep.subr.bf16.mxu1 %v1916_v0 }
0x1078   :  { %1735 = vmatpush3.bf16.msra.mxu1 %v2005_v16 }
0x112b   :  { %v1223_v7 = vpop.f32.mrf.mxu0 }
0x112c   :  { %v1230_v40 = vrot.slane %v1223_v7, 4 }
0x112d   :  { %v1714_v42 = vpop.f32.mrf.mxu0 }
0x112e   :  { %v1232_v44 = vadd.f32 %v1230_v40, %v1179_v41  ;;  %v1350_v42 = vld [vmem:[#allocation2] sm:$0x3] }
0x112f   :  { %v1226_v45 = vpop.f32.mrf.mxu0 }
0x1130   :  { %1859 = vtanh.f32 %v1232_v44  ;;  %v1557_v16 = vmul.f32 -1.442695, %v1232_v44 }
0x1131   :  { %v1715_v9 = vpop.f32.mrf.mxu0 }
0x1133   :  { %v1302_v46 = vpop.f32.mrf.mxu1 }
0x1134   :  { %v1309_v48 = vrot.slane %v1302_v46, 6 }
0x1135   :  { %v1722_v50 = vpop.f32.mrf.mxu1 }
0x1136   :  { %v1311_v11 = vadd.f32 %v1309_v48, %v1180_v49 }
0x1137   :  { %v1305_v52 = vpop.f32.mrf.mxu1 }
0x1138   :  { %1861 = vtanh.f32 %v1311_v11  ;;  %v1559_v55 = vmul.f32 -1.442695, %v1311_v11 }
0x1139   :  { %v1723_v53 = vpop.f32.mrf.mxu1  ;;  %1863 = vpow2.f32 %v1557_v16 }
0x113a   :  { %1865 = vpow2.f32 %v1559_v55 }
0x113d   :  { %v1860_v54 = vpop.eup %1859 }
0x113e   :  { %1245 = vrot.lane.b32.xlu0 %v1860_v54, %s1914_s21 }
0x1145   :  { %v1862_v0 = vpop.eup %1861 }
0x1146   :  { %1324 = vrot.lane.b32.xlu1 %v1862_v0, %s1914_s21  ;;  %v1864_v57 = vpop.eup %1863 }
0x1147   :  { %v1236_v58 = vadd.f32 1.0, %v1864_v57  ;;  %v1866_v59 = vpop.eup %1865 }
0x1148   :  { %v1315_v61 = vadd.f32 1.0, %v1866_v59 }
0x1149   :  { %1867 = vrcp.f32 %v1236_v58 }
0x114a   :  { %1869 = vrcp.f32 %v1315_v61 }
0x1156   :  { %v1868_v62 = vpop.eup %1867 }
0x1157   :  { %v1870_v2 = vpop.eup %1869  ;;  %v1243_v8 = vmul.f32 %v1868_v62, %v1241_v6 }
0x1158   :  { %v1322_v15 = vmul.f32 %v1870_v2, %v1320_v14 }
0x11b0   :  { %v1246_v63 = vpop.permute.xlu0 %1245 }
0x11b1   :  { %v1248_v1 = vmul.f32 %v1868_v62, %v1246_v63 }
0x11b3   :  { %1250 = vrot.lane.b32.xlu0 %v1248_v1, %s1919_s3 }
0x11b8   :  { %v1325_v3 = vpop.permute.xlu1 %1324 }
0x11b9   :  { %v1327_v4 = vmul.f32 %v1870_v2, %v1325_v3 }
0x11bb   :  { %1329 = vrot.lane.b32.xlu1 %v1327_v4, %s1919_s3 }
0x1225   :  { %v1251_v12 = vpop.permute.xlu0 %1250 }
0x1226   :  { %v2257_v13 = vadd.f32 %v1251_v12, %v1243_v8 }
0x1228   :  { %1871 = vtanh.f32 %v2257_v13  ;;  %v1411_v63 = vrot.slane %v2257_v13, 6 }
0x122d   :  { %v1330_v17 = vpop.permute.xlu1 %1329 }
0x122e   :  { %v2261_v18 = vadd.f32 %v1330_v17, %v1322_v15 }
0x1230   :  { %1873 = vtanh.f32 %v2261_v18  ;;  %v1487_v4 = vrot.slane %v2261_v18, 2 }
0x1235   :  { %v1872_v19 = vpop.eup %1871 }
0x1236   :  { %1256 = vrot.lane.b32.xlu0 %v1872_v19, %s1914_s21 }
0x123d   :  { %v1874_v21 = vpop.eup %1873 }
0x123e   :  { %1335 = vrot.lane.b32.xlu1 %v1874_v21, %s1914_s21 }
0x12a8   :  { %v1257_v20 = vpop.permute.xlu0 %1256 }
0x12a9   :  { %v2266_v22 = vmul.f32 %v1868_v62, %v1257_v20 }
0x12ab   :  { %v1351_v23 = vpack.c.bf16 %v2266_v22, %v2266_v22 }
0x12ad   :  { %v1353_v26 = vrot.slane %v1351_v23, 2 }
0x12af   :  { %1354 = vrot.lane.b32.xlu0 %v1353_v26, %s1919_s3 }
0x12b0   :  { %v1336_v25 = vpop.permute.xlu1 %1335 }
0x12b1   :  { %v2271_v27 = vmul.f32 %v1870_v2, %v1336_v25 }
0x12b3   :  { %v1430_v24 = vpack.c.bf16 %v2271_v27, %v2271_v27 }
0x12b5   :  { %v1432_v30 = vrot.slane %v1430_v24, 1 }
0x12b7   :  { %1433 = vrot.lane.b32.xlu1 %v1432_v30, %s1919_s3 }
0x1321   :  { %v1355_v31 = vpop.permute.xlu0 %1354 }
0x1322   :  { %1729 = vmatmul.mubr.msk.bf16.vlgmr.msra.gmra.mxu0 %vm171_vm2, %v1355_v31 }
0x1329   :  { %v1434_v28 = vpop.permute.xlu1 %1433 }
0x132a   :  { %1737 = vmatmul.mubr.msk.bf16.vlgmr.msra.gmra.mxu1 %vm171_vm2, %v1434_v28 }
0x13e2   :  { %v1393_v34 = vpop.f32.mrf.mxu0 }
0x13e3   :  { %v1400_v36 = vrot.slane %v1393_v34, 2 }
0x13e4   :  { %v1730_v38 = vpop.f32.mrf.mxu0 }
0x13e5   :  { %v1402_v7 = vadd.f32 %v1400_v36, %v1349_v37 }
0x13e6   :  { %v1396_v40 = vpop.f32.mrf.mxu0 }
0x13e7   :  { %1875 = vtanh.f32 %v1402_v7  ;;  %v1561_v11 = vmul.f32 -1.442695, %v1402_v7 }
0x13e8   :  { %v1731_v41 = vpop.f32.mrf.mxu0 }
0x13ea   :  { %v1472_v44 = vpop.f32.mrf.mxu1 }
0x13eb   :  { %v1478_v45 = vadd.f32 %v1472_v44, %v1350_v42 }
0x13ec   :  { %v1738_v9 = vpop.f32.mrf.mxu1 }
0x13ed   :  { %1877 = vtanh.f32 %v1478_v45  ;;  %v1563_v52 = vmul.f32 -1.442695, %v1478_v45 }
0x13ee   :  { %v1475_v46 = vpop.f32.mrf.mxu1  ;;  %1879 = vpow2.f32 %v1561_v11 }
0x13ef   :  { %1881 = vpow2.f32 %v1563_v52 }
0x13f0   :  { %v1739_v48 = vpop.f32.mrf.mxu1 }
0x13f4   :  { %v1876_v49 = vpop.eup %1875 }
0x13f5   :  { %1415 = vrot.lane.b32.xlu0 %v1876_v49, %s1914_s21 }
0x13fa   :  { %v1878_v50 = vpop.eup %1877 }
0x13fb   :  { %1491 = vrot.lane.b32.xlu1 %v1878_v50, %s1914_s21  ;;  %v1880_v53 = vpop.eup %1879 }
0x13fc   :  { %v1406_v54 = vadd.f32 1.0, %v1880_v53  ;;  %v1882_v0 = vpop.eup %1881 }
0x13fd   :  { %v1482_v16 = vadd.f32 1.0, %v1882_v0 }
0x13fe   :  { %1883 = vrcp.f32 %v1406_v54 }
0x13ff   :  { %1885 = vrcp.f32 %v1482_v16 }
0x140b   :  { %v1884_v55 = vpop.eup %1883 }
0x140c   :  { %v1886_v59 = vpop.eup %1885  ;;  %v1413_v1 = vmul.f32 %v1884_v55, %v1411_v63 }
0x140d   :  { %v1489_v6 = vmul.f32 %v1886_v59, %v1487_v4 }
0x1467   :  { %v1416_v57 = vpop.permute.xlu0 %1415 }
0x1468   :  { %v1418_v58 = vmul.f32 %v1884_v55, %v1416_v57 }
0x146a   :  { %1420 = vrot.lane.b32.xlu0 %v1418_v58, %s1919_s3 }
0x146d   :  { %v1492_v61 = vpop.permute.xlu1 %1491 }
0x146e   :  { %v1494_v62 = vmul.f32 %v1886_v59, %v1492_v61 }
0x1470   :  { %1496 = vrot.lane.b32.xlu1 %v1494_v62, %s1919_s3 }
0x14dc   :  { %v1421_v2 = vpop.permute.xlu0 %1420 }
0x14dd   :  { %v1423_v3 = vadd.f32 %v1421_v2, %v1413_v1 }
0x14df   :  { %1887 = vtanh.f32 %v1423_v3 }
0x14e2   :  { %v1497_v8 = vpop.permute.xlu1 %1496 }
0x14e3   :  { %v1499_v12 = vadd.f32 %v1497_v8, %v1489_v6 }
0x14e5   :  { %1889 = vtanh.f32 %v1499_v12 }
0x14ec   :  { %v1888_v14 = vpop.eup %1887 }
0x14ed   :  { %1426 = vrot.lane.b32.xlu0 %v1888_v14, %s1914_s21 }
0x14f1   :  { %321 = vrot.lane.b32.xlu0 %v2040_v5, %s1919_s3 }
0x14f2   :  { %v1890_v15 = vpop.eup %1889 }
0x14f3   :  { %1502 = vrot.lane.b32.xlu1 %v1890_v15, %s1914_s21 }
0x14f5   :  { %492 = vrot.lane.b32.xlu0 %v2078_v56, %s1919_s3 }
0x14f7   :  { %327 = vrot.lane.b32.xlu1 %v2045_v10, %s1914_s21 }
0x14f9   :  { %664 = vrot.lane.b32.xlu0 %v2116_v47, %s1919_s3 }
0x14fb   :  { %498 = vrot.lane.b32.xlu1 %v2083_v60, %s1914_s21 }
0x14fd   :  { %833 = vrot.lane.b32.xlu0 %v2154_v39, %s1919_s3 }
0x14ff   :  { %670 = vrot.lane.b32.xlu1 %v2121_v51, %s1914_s21 }
0x1501   :  { %1001 = vrot.lane.b32.xlu0 %v2192_v32, %s1919_s3 }
0x1503   :  { %839 = vrot.lane.b32.xlu1 %v2158_v43, %s1914_s21 }
0x1505   :  { %1170 = vrot.lane.b32.xlu0 %v2230_v29, %s1919_s3 }
0x1507   :  { %1006 = vrot.lane.b32.xlu1 %v2197_v35, %s1914_s21 }
0x1509   :  { %1340 = vrot.lane.b32.xlu0 %v2266_v22, %s1919_s3 }
0x150b   :  { %1175 = vrot.lane.b32.xlu1 %v2235_v33, %s1914_s21 }
0x150f   :  { %1345 = vrot.lane.b32.xlu1 %v2271_v27, %s1914_s21 }
0x155f   :  { %v1427_v5 = vpop.permute.xlu0 %1426 }
0x1560   :  { %v1429_v10 = vmul.f32 %v1884_v55, %v1427_v5 }
0x1562   :  { %1507 = vrot.lane.b32.xlu0 %v1429_v10, %s1919_s3 }
0x1563   :  { %v322_v56 = vpop.permute.xlu0 %321 }
0x1564   :  { %325 = vst.msk [vmem:[%s2385_s5] sm:$0x3] %vm324_vm3, %v322_v56 }
0x1565   :  { %v1503_v60 = vpop.permute.xlu1 %1502 }
0x1566   :  { %v1505_v47 = vmul.f32 %v1886_v59, %v1503_v60 }
0x1567   :  { %v493_v51 = vpop.permute.xlu0 %492 }
0x1568   :  { %496 = vst.msk [vmem:[%s2385_s5] sm:$0xc] %vm495_vm4, %v493_v51  ;;  %1512 = vrot.lane.b32.xlu1 %v1505_v47, %s1914_s21 }
0x1569   :  { %v328_v39 = vpop.permute.xlu1 %327 }
0x156a   :  { %331 = vst.msk [vmem:[%s2385_s5 + $0x8] sm:$0xc0] %vm330_vm5, %v328_v39 }
0x156b   :  { %v665_v43 = vpop.permute.xlu0 %664 }
0x156c   :  { %668 = vst.msk [vmem:[%s2385_s5] sm:$0x30] %vm667_vm6, %v665_v43 }
0x156d   :  { %v499_v32 = vpop.permute.xlu1 %498 }
0x156e   :  { %502 = vst.msk [vmem:[%s2385_s5 + $0x8] sm:$0x30] %vm501_vm7, %v499_v32 }
0x156f   :  { %v834_v35 = vpop.permute.xlu0 %833 }
0x1570   :  { %837 = vst.msk [vmem:[%s2385_s5] sm:$0xc0] %vm836_vm8, %v834_v35 }
0x1571   :  { %v671_v29 = vpop.permute.xlu1 %670 }
0x1572   :  { %674 = vst.msk [vmem:[%s2385_s5 + $0x8] sm:$0xc] %vm673_vm9, %v671_v29 }
0x1573   :  { %v1002_v33 = vpop.permute.xlu0 %1001 }
0x1575   :  { %v840_v13 = vpop.permute.xlu1 %839 }
0x1576   :  { %843 = vst.msk [vmem:[%s2385_s5 + $0x8] sm:$0x3] %vm842_vm10, %v840_v13 }
0x1577   :  { %1004 = vst.msk [vmem:[%s2385_s5 + $0x8] sm:$0x3] %vm324_vm3, %v1002_v33  ;;  %v1171_v17 = vpop.permute.xlu0 %1170 }
0x1578   :  { %1173 = vst.msk [vmem:[%s2385_s5 + $0x8] sm:$0xc] %vm495_vm4, %v1171_v17 }
0x1579   :  { %v1007_v18 = vpop.permute.xlu1 %1006 }
0x157a   :  { %1009 = vst.msk [vmem:[%s2385_s5] sm:$0xc0] %vm330_vm5, %v1007_v18 }
0x157b   :  { %v1341_v19 = vpop.permute.xlu0 %1340 }
0x157c   :  { %1343 = vst.msk [vmem:[%s2385_s5 + $0x8] sm:$0x30] %vm667_vm6, %v1341_v19 }
0x157d   :  { %v1176_v21 = vpop.permute.xlu1 %1175 }
0x157e   :  { %1178 = vst.msk [vmem:[%s2385_s5] sm:$0x30] %vm501_vm7, %v1176_v21 }
0x1581   :  { %v1346_v20 = vpop.permute.xlu1 %1345 }
0x1582   :  { %1348 = vst.msk [vmem:[%s2385_s5] sm:$0xc] %vm673_vm9, %v1346_v20 }
0x15d4   :  { %v1508_v22 = vpop.permute.xlu0 %1507 }
0x15d5   :  { %1510 = vst.msk [vmem:[%s2385_s5 + $0x8] sm:$0xc0] %vm836_vm8, %v1508_v22 }
0x15da   :  { %v1513_v23 = vpop.permute.xlu1 %1512 }
0x15db   :  { %1515 = vst.msk [vmem:[%s2385_s5] sm:$0x3] %vm842_vm10, %v1513_v23 }
0x15dc   :  { %1520 = vsyncpa [#allocation4], 1 }

</bundles_post_ra>
